<compile_context>
chip_gen: v5e
topology: v5e:2x2
jax: 0.10.0
libtpu: 0.0.40
codegen_flags: <defaults>
</compile_context>

<pallas_src>
import math
import functools

import numpy as np
import jax
import jax.numpy as jnp
from jax.experimental import pallas as pl
from jax.experimental.pallas import tpu as pltpu


def decoder_stack_kernel(x_ref, mem_ref, mask_ref, memmask_ref,
                         sa_w_ref, sa_b_ref, sa_wo_ref, sa_bo_ref,
                         ca_wq_ref, ca_bq_ref, ca_wkv_ref, ca_bkv_ref,
                         ca_wo_ref, ca_bo_ref,
                         w1_ref, b1_ref, w2_ref, b2_ref,
                         ln_w_ref, ln_b_ref,
                         out_ref,
                         h_scr,
                         *, dim, n_heads, apply_mem_mask):
    """Runs ALL decoder layers for one batch tile.

    grid = (batch_tiles, n_layers); the (Bt, L, D) activations stay resident in the
    f32 VMEM scratch `h_scr` across the layer axis, weights are streamed per layer
    (double-buffered by the BlockSpec pipeline).
    """
    D = dim
    H = n_heads
    hd = D // H
    scale = 1.0 / math.sqrt(hd)

    Bt, L, _ = x_ref.shape
    S = mem_ref.shape[1]
    l = pl.program_id(1)
    n_layers = pl.num_programs(1)

    # Layer 0: load the embedded target sequence into the resident activations.
    @pl.when(l == 0)
    def _():
        h_scr[...] = x_ref[...].astype(jnp.float32)

    x2 = h_scr[...].reshape(Bt * L, D)            # (Bt*L, D) f32 residual stream
    mem2 = mem_ref[...].reshape(Bt * S, D)        # (Bt*S, D) bf16 encoder memory

    # Additive masks, broadcast once (hoisted out of the head loops).
    self_mask = jnp.broadcast_to(mask_ref[...], (Bt, L, L))
    if apply_mem_mask:
        cross_mask = jnp.broadcast_to(memmask_ref[...][None, :, :], (Bt, L, S))
    else:
        cross_mask = None

    def layer_norm(z, idx):
        w = ln_w_ref[0, idx:idx + 1, :]           # (1, D)
        b = ln_b_ref[0, idx:idx + 1, :]
        mu = jnp.mean(z, axis=-1, keepdims=True)
        c = z - mu
        var = jnp.mean(c * c, axis=-1, keepdims=True)   # centered (PyTorch parity)
        return c * jax.lax.rsqrt(var + 1e-5) * w + b

    def attend(q, k, v, n_kv, add_mask, wo_ref, bo):
        """q: (Bt*L, D) f32 already scaled; k, v: (Bt*n_kv, D) f32.

        Per-head attention with the head output folded directly into its slice of
        the output projection: out = sum_h (softmax(q_h k_h^T) v_h) @ Wo[h].  All
        matmul outputs are full-D lane-dense; no scratch, no masked partial stores.
        """
        out = None
        for h in range(H):                        # static loop, H small
            sl = slice(h * hd, (h + 1) * hd)
            qh = q[:, sl].reshape(Bt, L, hd).astype(jnp.bfloat16)
            kh = k[:, sl].reshape(Bt, n_kv, hd).astype(jnp.bfloat16)
            vh = v[:, sl].reshape(Bt, n_kv, hd).astype(jnp.bfloat16)
            s = jnp.einsum('bld,bkd->blk', qh, kh,
                           preferred_element_type=jnp.float32)
            if add_mask is not None:
                s = s + add_mask
            s = s - jnp.max(s, axis=-1, keepdims=True)
            p = jnp.exp(s)
            p = p * pl.reciprocal(jnp.sum(p, axis=-1, keepdims=True), approx=True)
            oh = jnp.einsum('blk,bkd->bld', p.astype(jnp.bfloat16), vh,
                            preferred_element_type=jnp.float32)
            oh2 = oh.reshape(Bt * L, hd).astype(jnp.bfloat16)
            term = jnp.dot(oh2, wo_ref[0, sl, :],            # (hd, D) weight tile
                           preferred_element_type=jnp.float32)
            out = term if out is None else out + term
        return out + bo                           # (Bt*L, D) f32

    # TODO(synk): dropout omitted (inference / eval semantics).
    # --- self-attention (causal) + residual + norm1 (post-norm) -------------
    qkv = jnp.dot(x2.astype(jnp.bfloat16), sa_w_ref[0],
                  preferred_element_type=jnp.float32) + sa_b_ref[0]
    sa = attend(qkv[:, :D] * scale, qkv[:, D:2 * D], qkv[:, 2 * D:],
                L, self_mask, sa_wo_ref, sa_bo_ref[0])
    x2 = layer_norm(x2 + sa, 0)

    # --- cross-attention over encoder memory + residual + norm2 -------------
    q = jnp.dot(x2.astype(jnp.bfloat16), ca_wq_ref[0],
                preferred_element_type=jnp.float32) + ca_bq_ref[0]
    kv = jnp.dot(mem2, ca_wkv_ref[0],
                 preferred_element_type=jnp.float32) + ca_bkv_ref[0]
    ca = attend(q * scale, kv[:, :D], kv[:, D:],
                S, cross_mask, ca_wo_ref, ca_bo_ref[0])
    x2 = layer_norm(x2 + ca, 1)

    # --- feed-forward (ReLU) + residual + norm3 ------------------------------
    h1 = jnp.maximum(
        jnp.dot(x2.astype(jnp.bfloat16), w1_ref[0],
                preferred_element_type=jnp.float32) + b1_ref[0], 0.0)
    h2 = jnp.dot(h1.astype(jnp.bfloat16), w2_ref[0],
                 preferred_element_type=jnp.float32) + b2_ref[0]
    x2 = layer_norm(x2 + h2, 2)

    @pl.when(l < n_layers - 1)
    def _():
        h_scr[...] = x2.reshape(Bt, L, D)         # carry to next layer only

    @pl.when(l == n_layers - 1)
    def _():
        out_ref[...] = x2.reshape(Bt, L, D).astype(out_ref.dtype)


def _vmem_capacity_bytes():
    try:
        return int(pltpu.get_tpu_info().vmem_capacity_bytes)
    except Exception:
        return 64 * 2 ** 20            # conservative fallback (v7x-sized VMEM)


def _pick_batch_tile(B, L, S, D, vmem_cap):
    """Smallest batch tile whose flattened M = Bt*L reaches the MXU's native M tile
    (maximizes batch-tile parallelism across cores while keeping matmuls tall).
    If even the full batch can't reach it, the kernel is weight-stream bound: keep
    one fat tile so per-layer weights are streamed only once."""
    divisors = [d for d in range(1, B + 1) if B % d == 0]
    bt = next((d for d in divisors if d * L >= 256), B)

    def tile_bytes(d):
        return (2 * d * L * D * 4      # x block, double-buffered f32
                + 2 * d * S * D * 2    # encoder memory block, double-buffered bf16
                + d * L * D * 4        # output block
                + d * L * D * 4)       # resident activation scratch

    while bt > 1 and tile_bytes(bt) > 0.35 * vmem_cap:
        bt = [d for d in divisors if d < bt][-1]
    return bt


def run_decoder_stack(x, mem, mask, mem_mask, apply_mem_mask, p, *,
                      dim, n_heads, n_layers, batch_tile=None):
    """x: (B, Lp, D) f32, mem: (B, Sp, D) bf16, mask: (Lp, Lp) f32 additive,
    mem_mask: (1, Sp) f32 additive key mask for padded encoder positions."""
    B, L, D = x.shape
    S = mem.shape[1]

    vmem_cap = _vmem_capacity_bytes()
    if batch_tile is None:
        batch_tile = _pick_batch_tile(B, L, S, D, vmem_cap)
    Bt = batch_tile
    assert B % Bt == 0, "batch must be divisible by batch_tile"
    nb = B // Bt

    kernel = functools.partial(decoder_stack_kernel, dim=dim, n_heads=n_heads,
                               apply_mem_mask=apply_mem_mask)

    weight_order = ["sa_w", "sa_b", "sa_wo", "sa_bo",
                    "ca_wq", "ca_bq", "ca_wkv", "ca_bkv", "ca_wo", "ca_bo",
                    "w1", "b1", "w2", "b2", "ln_w", "ln_b"]
    weight_args = [p[k] for k in weight_order]

    def batch_spec(shape):
        return pl.BlockSpec(shape, lambda b, l: (b, 0, 0))

    def layer_spec(w):
        return pl.BlockSpec((1,) + w.shape[1:], lambda b, l: (l, 0, 0))

    in_specs = ([batch_spec((Bt, L, D)),                       # target activations
                 batch_spec((Bt, S, D)),                       # encoder memory
                 pl.BlockSpec((L, L), lambda b, l: (0, 0)),    # causal mask
                 pl.BlockSpec((1, S), lambda b, l: (0, 0))]    # memory key mask
                + [layer_spec(w) for w in weight_args])

    # --- generation-aware VMEM budget ---------------------------------------
    def bb(shape, dtype):
        return int(np.prod(shape)) * np.dtype(dtype).itemsize

    blocks = (bb((Bt, L, D), x.dtype) + bb((Bt, S, D), mem.dtype)
              + bb((L, L), mask.dtype) + bb((1, S), mem_mask.dtype)
              + sum(bb((1,) + w.shape[1:], w.dtype) for w in weight_args)
              + bb((Bt, L, D), jnp.float32))                   # output block
    scratch_bytes = bb((Bt, L, D), jnp.float32)
    est = 2 * blocks + scratch_bytes
    vmem_limit = int(min(0.85 * vmem_cap, max(32 * 2 ** 20, 2.5 * est)))
    # TODO(synk): for very large D on v7x (64 MiB VMEM) double-buffered per-layer FFN
    # weights may not fit; an FFN-column tiling fallback (emit_pipeline over w1/w2
    # kept in HBM) is not implemented here.

    # Advisory cost estimate for the XLA scheduler.
    flops = 2 * n_layers * B * (
        L * D * 3 * D + 4 * L * L * D + L * D * D                # self-attention
        + L * D * D + S * D * 2 * D + 4 * L * S * D + L * D * D  # cross-attention
        + 2 * L * D * 4 * D)                                     # FFN
    transcendentals = n_layers * B * n_heads * (L * L + L * S)
    bytes_accessed = (nb * sum(int(w.size) * np.dtype(w.dtype).itemsize
                               for w in weight_args)
                      + 2 * int(x.size) * 4 + int(mem.size) * 2)

    return pl.pallas_call(
        kernel,
        out_shape=jax.ShapeDtypeStruct((B, L, D), jnp.float32),
        grid=(nb, n_layers),
        in_specs=in_specs,
        out_specs=batch_spec((Bt, L, D)),
        scratch_shapes=[pltpu.VMEM((Bt, L, D), jnp.float32)],   # resident activations
        compiler_params=pltpu.CompilerParams(
            dimension_semantics=("parallel", "arbitrary"),
            vmem_limit_bytes=vmem_limit),
        cost_estimate=pl.CostEstimate(flops=int(flops),
                                      transcendentals=int(transcendentals),
                                      bytes_accessed=int(bytes_accessed)),
    )(x, mem, mask, mem_mask, *weight_args)


class Decoder:
    """JAX/Pallas port of the PyTorch Decoder (transformer decoder stack)."""

    def __init__(self, dim, n_heads, n_layers, max_len, num_classes, dropout=0.1, *, key):
        assert dim % n_heads == 0
        self.dim = dim
        self.n_heads = n_heads
        self.n_layers = n_layers
        self.max_len = max_len + 2
        self.num_classes = num_classes

        keys = jax.random.split(key, 1 + n_layers)
        # nn.Embedding default init: N(0, 1)
        self.embedding = jax.random.normal(keys[0], (num_classes, dim), jnp.float32)

        # Sinusoidal positional encoding.
        pos = jnp.arange(self.max_len, dtype=jnp.float32)[:, None]
        div = jnp.exp(jnp.arange(0, dim, 2, dtype=jnp.float32) * (-math.log(10000.0) / dim))
        pe = jnp.zeros((self.max_len, dim), jnp.float32)
        pe = pe.at[:, 0::2].set(jnp.sin(pos * div))
        pe = pe.at[:, 1::2].set(jnp.cos(pos * div))
        self.pe = pe

        # triangular_mask(max_len + 2): additive causal mask.
        idx = jnp.arange(self.max_len)
        self.mask = jnp.where(idx[None, :] > idx[:, None], -1e9, 0.0).astype(jnp.float32)

        def init_layer(k):
            ks = jax.random.split(k, 6)
            s = 0.02
            rnd = lambda kk, shp: s * jax.random.normal(kk, shp, jnp.float32)
            return {
                "sa_w": rnd(ks[0], (3 * dim, dim)), "sa_b": jnp.zeros((3 * dim,), jnp.float32),
                "sa_wo": rnd(ks[1], (dim, dim)),    "sa_bo": jnp.zeros((dim,), jnp.float32),
                "ca_w": rnd(ks[2], (3 * dim, dim)), "ca_b": jnp.zeros((3 * dim,), jnp.float32),
                "ca_wo": rnd(ks[3], (dim, dim)),    "ca_bo": jnp.zeros((dim,), jnp.float32),
                "w1": rnd(ks[4], (4 * dim, dim)),   "b1": jnp.zeros((4 * dim,), jnp.float32),
                "w2": rnd(ks[5], (dim, 4 * dim)),   "b2": jnp.zeros((dim,), jnp.float32),
                "ln_w": jnp.ones((3, dim), jnp.float32),
                "ln_b": jnp.zeros((3, dim), jnp.float32),
            }

        layers = [init_layer(k) for k in keys[1:]]
        D = dim

        def stack_T(name, rows=None):      # torch (out, in) -> (in, out), stacked, bf16
            ws = []
            for lyr in layers:
                w = lyr[name]
                if rows is not None:
                    w = w[rows[0]:rows[1], :]
                ws.append(w.T)
            return jnp.stack(ws).astype(jnp.bfloat16)

        def stack_bias(name, cols=None):   # (n,) -> (n_layers, 1, n) f32
            bs = []
            for lyr in layers:
                b = lyr[name]
                if cols is not None:
                    b = b[cols[0]:cols[1]]
                bs.append(b[None, :])
            return jnp.stack(bs)

        self.params = {
            "sa_w": stack_T("sa_w"), "sa_b": stack_bias("sa_b"),
            "sa_wo": stack_T("sa_wo"), "sa_bo": stack_bias("sa_bo"),
            # Cross-attention Q / KV projections stored separately (no in-kernel
            # slicing of a fused (D, 3D) weight).
            "ca_wq": stack_T("ca_w", rows=(0, D)),
            "ca_bq": stack_bias("ca_b", cols=(0, D)),
            "ca_wkv": stack_T("ca_w", rows=(D, 3 * D)),
            "ca_bkv": stack_bias("ca_b", cols=(D, 3 * D)),
            "ca_wo": stack_T("ca_wo"), "ca_bo": stack_bias("ca_bo"),
            "w1": stack_T("w1"), "b1": stack_bias("b1"),
            "w2": stack_T("w2"), "b2": stack_bias("b2"),
            "ln_w": jnp.stack([lyr["ln_w"] for lyr in layers]),
            "ln_b": jnp.stack([lyr["ln_b"] for lyr in layers]),
        }

    def __call__(self, x_encoded, y, length=None):
        # x_encoded: (S, B, D) seq-first encoder memory; y: (B, L) int token ids.
        B, L = y.shape
        D = self.dim
        S = x_encoded.shape[0]

        emb = jnp.take(self.embedding, y, axis=0) * math.sqrt(D)          # (B, L, D)
        h = (emb + self.pe[:L][None, :, :]).astype(jnp.float32)
        mem = jnp.transpose(x_encoded, (1, 0, 2)).astype(jnp.bfloat16)    # (B, S, D)

        # Pad L and S to sublane multiples (8) so in-kernel flattens are free views.
        Lp = -(-L // 8) * 8
        Sp = -(-S // 8) * 8
        if Lp != L:
            h = jnp.pad(h, ((0, 0), (0, Lp - L), (0, 0)))
        if Sp != S:
            mem = jnp.pad(mem, ((0, 0), (0, Sp - S), (0, 0)))

        # Causal mask over the padded length (padded key columns lie strictly in the
        # future of every real query, so the triangular mask already hides them).
        idx = jnp.arange(Lp)
        mask = jnp.where(idx[None, :] > idx[:, None], -1e9, 0.0).astype(jnp.float32)
        # Encoder-memory key padding mask (only applied when S was padded).
        mem_mask = jnp.where(jnp.arange(Sp)[None, :] >= S, -1e9, 0.0).astype(jnp.float32)
        apply_mem_mask = (Sp != S)

        # TODO(synk): tgt_key_padding_mask path (length is not None) not implemented.
        out = run_decoder_stack(h, mem, mask, mem_mask, apply_mem_mask, self.params,
                                dim=D, n_heads=self.n_heads, n_layers=self.n_layers)
        out = out[:, :L, :]
        return jnp.transpose(out, (1, 0, 2))      # back to (L, B, D), matching PyTorch


if __name__ == "__main__":
    # D = 128 keeps the residual/weight lane dimension dense (full 128-lane vregs).
    dim, n_heads, n_layers, max_len, num_classes = 128, 4, 2, 8, 20
    B, L, S = 2, 8, 16

    key = jax.random.PRNGKey(0)
    k_params, k_x, k_y = jax.random.split(key, 3)

    decoder = Decoder(dim, n_heads, n_layers, max_len, num_classes, key=k_params)
    x_encoded = jax.random.normal(k_x, (S, B, dim), jnp.float32)            # encoder memory
    y = jax.random.randint(k_y, (B, L), 0, num_classes, dtype=jnp.int32)    # token ids

    out = decoder(x_encoded, y)
    out = jax.block_until_ready(out)
    assert out.shape == (L, B, dim)
    assert bool(jnp.all(jnp.isfinite(out)))
    print("KERNEL_OK")
</pallas_src>

<mosaic_0001>
module attributes {stable_mosaic.version = 11 : i64} {
  func.func @decoder_stack_kernel(%arg0: i32, %arg1: i32, %arg2: memref<2x8x128xf32, #tpu.memory_space<vmem>>, %arg3: memref<2x16x128xbf16, #tpu.memory_space<vmem>>, %arg4: memref<8x8xf32, #tpu.memory_space<vmem>>, %arg5: memref<1x16xf32, #tpu.memory_space<vmem>>, %arg6: memref<1x128x384xbf16, #tpu.memory_space<vmem>>, %arg7: memref<1x1x384xf32, #tpu.memory_space<vmem>>, %arg8: memref<1x128x128xbf16, #tpu.memory_space<vmem>>, %arg9: memref<1x1x128xf32, #tpu.memory_space<vmem>>, %arg10: memref<1x128x128xbf16, #tpu.memory_space<vmem>>, %arg11: memref<1x1x128xf32, #tpu.memory_space<vmem>>, %arg12: memref<1x128x256xbf16, #tpu.memory_space<vmem>>, %arg13: memref<1x1x256xf32, #tpu.memory_space<vmem>>, %arg14: memref<1x128x128xbf16, #tpu.memory_space<vmem>>, %arg15: memref<1x1x128xf32, #tpu.memory_space<vmem>>, %arg16: memref<1x128x512xbf16, #tpu.memory_space<vmem>>, %arg17: memref<1x1x512xf32, #tpu.memory_space<vmem>>, %arg18: memref<1x512x128xbf16, #tpu.memory_space<vmem>>, %arg19: memref<1x1x128xf32, #tpu.memory_space<vmem>>, %arg20: memref<1x3x128xf32, #tpu.memory_space<vmem>>, %arg21: memref<1x3x128xf32, #tpu.memory_space<vmem>>, %arg22: memref<2x8x128xf32, #tpu.memory_space<vmem>>, %arg23: memref<2x8x128xf32, #tpu.memory_space<vmem>>) attributes {dimension_semantics = [#tpu.dimension_semantics<parallel>, #tpu.dimension_semantics<arbitrary>], iteration_bounds = array<i64: 1, 2>, scalar_prefetch = 0 : i64, scratch_operands = 1 : i64, tpu.core_type = #tpu.core_type<tc>, window_params = [{transform_indices = @transform_0, window_bounds = array<i64: 2, 8, 128>}, {transform_indices = @transform_1, window_bounds = array<i64: 2, 16, 128>}, {pipeline_mode = #tpu.pipeline_mode<synchronous>, transform_indices = @transform_2, window_bounds = array<i64: 8, 8>}, {pipeline_mode = #tpu.pipeline_mode<synchronous>, transform_indices = @transform_3, window_bounds = array<i64: 1, 16>}, {transform_indices = @transform_4, window_bounds = array<i64: 1, 128, 384>}, {transform_indices = @transform_5, window_bounds = array<i64: 1, 1, 384>}, {transform_indices = @transform_6, window_bounds = array<i64: 1, 128, 128>}, {transform_indices = @transform_7, window_bounds = array<i64: 1, 1, 128>}, {transform_indices = @transform_8, window_bounds = array<i64: 1, 128, 128>}, {transform_indices = @transform_9, window_bounds = array<i64: 1, 1, 128>}, {transform_indices = @transform_10, window_bounds = array<i64: 1, 128, 256>}, {transform_indices = @transform_11, window_bounds = array<i64: 1, 1, 256>}, {transform_indices = @transform_12, window_bounds = array<i64: 1, 128, 128>}, {transform_indices = @transform_13, window_bounds = array<i64: 1, 1, 128>}, {transform_indices = @transform_14, window_bounds = array<i64: 1, 128, 512>}, {transform_indices = @transform_15, window_bounds = array<i64: 1, 1, 512>}, {transform_indices = @transform_16, window_bounds = array<i64: 1, 512, 128>}, {transform_indices = @transform_17, window_bounds = array<i64: 1, 1, 128>}, {transform_indices = @transform_18, window_bounds = array<i64: 1, 3, 128>}, {transform_indices = @transform_19, window_bounds = array<i64: 1, 3, 128>}, {transform_indices = @transform_20, window_bounds = array<i64: 2, 8, 128>}]} {
    %c0_i32 = arith.constant 0 : i32
    %0 = arith.cmpi eq, %arg1, %c0_i32 : i32
    %1 = arith.extui %0 : i1 to i32
    %c0_i32_0 = arith.constant 0 : i32
    %2 = arith.cmpi ne, %1, %c0_i32_0 : i32
    scf.if %2 {
      %c0_146 = arith.constant 0 : index
      %c0_147 = arith.constant 0 : index
      %c0_148 = arith.constant 0 : index
      %375 = vector.load %arg2[%c0_146, %c0_147, %c0_148] : memref<2x8x128xf32, #tpu.memory_space<vmem>>, vector<2x8x128xf32>
      %c0_149 = arith.constant 0 : index
      %c0_150 = arith.constant 0 : index
      %c0_151 = arith.constant 0 : index
      %376 = vector.load %arg23[%c0_149, %c0_150, %c0_151] : memref<2x8x128xf32, #tpu.memory_space<vmem>>, vector<2x8x128xf32>
      tpu.vector_store %arg23[%c0_149, %c0_150, %c0_151], %375 {strides = array<i32>} : memref<2x8x128xf32, #tpu.memory_space<vmem>>, vector<2x8x128xf32>,
    } else {
    }
    %c0 = arith.constant 0 : index
    %c0_1 = arith.constant 0 : index
    %c0_2 = arith.constant 0 : index
    %3 = vector.load %arg23[%c0, %c0_1, %c0_2] : memref<2x8x128xf32, #tpu.memory_space<vmem>>, vector<2x8x128xf32>
    %4 = vector.shape_cast %3 : vector<2x8x128xf32> to vector<16x128xf32>
    %c0_3 = arith.constant 0 : index
    %c0_4 = arith.constant 0 : index
    %c0_5 = arith.constant 0 : index
    %5 = vector.load %arg3[%c0_3, %c0_4, %c0_5] : memref<2x16x128xbf16, #tpu.memory_space<vmem>>, vector<2x16x128xbf16>
    %6 = vector.shape_cast %5 : vector<2x16x128xbf16> to vector<32x128xbf16>
    %c0_6 = arith.constant 0 : index
    %c0_7 = arith.constant 0 : index
    %7 = vector.load %arg4[%c0_6, %c0_7] : memref<8x8xf32, #tpu.memory_space<vmem>>, vector<8x8xf32>
    %8 = vector.shape_cast %7 : vector<8x8xf32> to vector<1x8x8xf32>
    %9 = vector.broadcast %8 : vector<1x8x8xf32> to vector<2x8x8xf32>
    %10 = arith.truncf %4 : vector<16x128xf32> to vector<16x128xbf16>
    %c0_8 = arith.constant 0 : index
    %c0_9 = arith.constant 0 : index
    %c0_10 = arith.constant 0 : index
    %11 = vector.load %arg6[%c0_8, %c0_9, %c0_10] : memref<1x128x384xbf16, #tpu.memory_space<vmem>>, vector<1x128x384xbf16>
    %12 = vector.shape_cast %11 : vector<1x128x384xbf16> to vector<128x384xbf16>
    %cst = arith.constant dense<0.000000e+00> : vector<16x384xf32>
    %13 = tpu.matmul %10, %12, %cst {dimension_numbers = #tpu.dot_dimension_numbers<[1], [0], [0], [1], [0, 0, 1, 1], [], []>} : vector<16x128xbf16>, vector<128x384xbf16>, vector<16x384xf32> -> vector<16x384xf32>
    %c0_11 = arith.constant 0 : index
    %c0_12 = arith.constant 0 : index
    %c0_13 = arith.constant 0 : index
    %14 = vector.load %arg7[%c0_11, %c0_12, %c0_13] : memref<1x1x384xf32, #tpu.memory_space<vmem>>, vector<1x1x384xf32>
    %15 = vector.shape_cast %14 : vector<1x1x384xf32> to vector<1x384xf32>
    %16 = vector.broadcast %15 : vector<1x384xf32> to vector<16x384xf32>
    %17 = arith.addf %13, %16 : vector<16x384xf32>
    %18 = vector.extract_strided_slice %17 {offsets = [0, 0], sizes = [16, 128], strides = [1, 1]} : vector<16x384xf32> to vector<16x128xf32>
    %cst_14 = arith.constant 0.176776692 : f32
    %19 = vector.broadcast %cst_14 : f32 to vector<16x128xf32>
    %20 = arith.mulf %18, %19 : vector<16x128xf32>
    %21 = vector.extract_strided_slice %17 {offsets = [0, 128], sizes = [16, 128], strides = [1, 1]} : vector<16x384xf32> to vector<16x128xf32>
    %22 = vector.extract_strided_slice %17 {offsets = [0, 256], sizes = [16, 128], strides = [1, 1]} : vector<16x384xf32> to vector<16x128xf32>
    %c0_15 = arith.constant 0 : index
    %c0_16 = arith.constant 0 : index
    %c0_17 = arith.constant 0 : index
    %23 = vector.load %arg9[%c0_15, %c0_16, %c0_17] : memref<1x1x128xf32, #tpu.memory_space<vmem>>, vector<1x1x128xf32>
    %24 = vector.shape_cast %23 : vector<1x1x128xf32> to vector<1x128xf32>
    %25 = vector.extract_strided_slice %20 {offsets = [0, 0], sizes = [16, 32], strides = [1, 1]} : vector<16x128xf32> to vector<16x32xf32>
    %26 = vector.shape_cast %25 : vector<16x32xf32> to vector<2x8x32xf32>
    %27 = arith.truncf %26 : vector<2x8x32xf32> to vector<2x8x32xbf16>
    %28 = vector.extract_strided_slice %21 {offsets = [0, 0], sizes = [16, 32], strides = [1, 1]} : vector<16x128xf32> to vector<16x32xf32>
    %29 = vector.shape_cast %28 : vector<16x32xf32> to vector<2x8x32xf32>
    %30 = arith.truncf %29 : vector<2x8x32xf32> to vector<2x8x32xbf16>
    %31 = vector.extract_strided_slice %22 {offsets = [0, 0], sizes = [16, 32], strides = [1, 1]} : vector<16x128xf32> to vector<16x32xf32>
    %32 = vector.shape_cast %31 : vector<16x32xf32> to vector<2x8x32xf32>
    %33 = arith.truncf %32 : vector<2x8x32xf32> to vector<2x8x32xbf16>
    "tpu.trace_start"() <{level = 10 : i32, message = "bld,bkd->blk"}> : () -> ()
    %cst_18 = arith.constant dense<0.000000e+00> : vector<2x8x8xf32>
    %34 = tpu.matmul %27, %30, %cst_18 {dimension_numbers = #tpu.dot_dimension_numbers<[2], [2], [1], [1], [0, 0, 0, 1, 1, 1], [0], [0]>} : vector<2x8x32xbf16>, vector<2x8x32xbf16>, vector<2x8x8xf32> -> vector<2x8x8xf32>
    "tpu.trace_stop"() : () -> ()
    %35 = arith.addf %34, %9 : vector<2x8x8xf32>
    %cst_19 = arith.constant dense<0xFF800000> : vector<2x8xf32>
    %36 = vector.multi_reduction <maximumf>, %35, %cst_19 [2] : vector<2x8x8xf32> to vector<2x8xf32>
    %37 = vector.shape_cast %36 : vector<2x8xf32> to vector<2x8x1xf32>
    %38 = vector.broadcast %37 : vector<2x8x1xf32> to vector<2x8x8xf32>
    %39 = arith.subf %35, %38 : vector<2x8x8xf32>
    %40 = math.exp %39 : vector<2x8x8xf32>
    %cst_20 = arith.constant dense<0.000000e+00> : vector<2x8xf32>
    %41 = vector.multi_reduction <add>, %40, %cst_20 [2] : vector<2x8x8xf32> to vector<2x8xf32>
    %42 = vector.shape_cast %41 : vector<2x8xf32> to vector<2x8x1xf32>
    %43 = tpu.reciprocal %42 {approx = true} : vector<2x8x1xf32> -> vector<2x8x1xf32>
    %44 = vector.broadcast %43 : vector<2x8x1xf32> to vector<2x8x8xf32>
    %45 = arith.mulf %40, %44 : vector<2x8x8xf32>
    %46 = arith.truncf %45 : vector<2x8x8xf32> to vector<2x8x8xbf16>
    "tpu.trace_start"() <{level = 10 : i32, message = "blk,bkd->bld"}> : () -> ()
    %cst_21 = arith.constant dense<0.000000e+00> : vector<2x8x32xf32>
    %47 = tpu.matmul %46, %33, %cst_21 {dimension_numbers = #tpu.dot_dimension_numbers<[2], [1], [1], [2], [0, 0, 0, 1, 1, 2], [0], [0]>} : vector<2x8x8xbf16>, vector<2x8x32xbf16>, vector<2x8x32xf32> -> vector<2x8x32xf32>
    "tpu.trace_stop"() : () -> ()
    %48 = vector.shape_cast %47 : vector<2x8x32xf32> to vector<16x32xf32>
    %49 = arith.truncf %48 : vector<16x32xf32> to vector<16x32xbf16>
    %c0_22 = arith.constant 0 : index
    %c0_23 = arith.constant 0 : index
    %c0_24 = arith.constant 0 : index
    %50 = vector.load %arg8[%c0_22, %c0_23, %c0_24] : memref<1x128x128xbf16, #tpu.memory_space<vmem>>, vector<1x32x128xbf16>
    %51 = vector.shape_cast %50 : vector<1x32x128xbf16> to vector<32x128xbf16>
    %cst_25 = arith.constant dense<0.000000e+00> : vector<16x128xf32>
    %52 = tpu.matmul %49, %51, %cst_25 {dimension_numbers = #tpu.dot_dimension_numbers<[1], [0], [0], [1], [0, 0, 1, 1], [], []>} : vector<16x32xbf16>, vector<32x128xbf16>, vector<16x128xf32> -> vector<16x128xf32>
    %53 = vector.extract_strided_slice %20 {offsets = [0, 32], sizes = [16, 32], strides = [1, 1]} : vector<16x128xf32> to vector<16x32xf32>
    %54 = vector.shape_cast %53 : vector<16x32xf32> to vector<2x8x32xf32>
    %55 = arith.truncf %54 : vector<2x8x32xf32> to vector<2x8x32xbf16>
    %56 = vector.extract_strided_slice %21 {offsets = [0, 32], sizes = [16, 32], strides = [1, 1]} : vector<16x128xf32> to vector<16x32xf32>
    %57 = vector.shape_cast %56 : vector<16x32xf32> to vector<2x8x32xf32>
    %58 = arith.truncf %57 : vector<2x8x32xf32> to vector<2x8x32xbf16>
    %59 = vector.extract_strided_slice %22 {offsets = [0, 32], sizes = [16, 32], strides = [1, 1]} : vector<16x128xf32> to vector<16x32xf32>
    %60 = vector.shape_cast %59 : vector<16x32xf32> to vector<2x8x32xf32>
    %61 = arith.truncf %60 : vector<2x8x32xf32> to vector<2x8x32xbf16>
    "tpu.trace_start"() <{level = 10 : i32, message = "bld,bkd->blk"}> : () -> ()
    %cst_26 = arith.constant dense<0.000000e+00> : vector<2x8x8xf32>
    %62 = tpu.matmul %55, %58, %cst_26 {dimension_numbers = #tpu.dot_dimension_numbers<[2], [2], [1], [1], [0, 0, 0, 1, 1, 1], [0], [0]>} : vector<2x8x32xbf16>, vector<2x8x32xbf16>, vector<2x8x8xf32> -> vector<2x8x8xf32>
    "tpu.trace_stop"() : () -> ()
    %63 = arith.addf %62, %9 : vector<2x8x8xf32>
    %cst_27 = arith.constant dense<0xFF800000> : vector<2x8xf32>
    %64 = vector.multi_reduction <maximumf>, %63, %cst_27 [2] : vector<2x8x8xf32> to vector<2x8xf32>
    %65 = vector.shape_cast %64 : vector<2x8xf32> to vector<2x8x1xf32>
    %66 = vector.broadcast %65 : vector<2x8x1xf32> to vector<2x8x8xf32>
    %67 = arith.subf %63, %66 : vector<2x8x8xf32>
    %68 = math.exp %67 : vector<2x8x8xf32>
    %cst_28 = arith.constant dense<0.000000e+00> : vector<2x8xf32>
    %69 = vector.multi_reduction <add>, %68, %cst_28 [2] : vector<2x8x8xf32> to vector<2x8xf32>
    %70 = vector.shape_cast %69 : vector<2x8xf32> to vector<2x8x1xf32>
    %71 = tpu.reciprocal %70 {approx = true} : vector<2x8x1xf32> -> vector<2x8x1xf32>
    %72 = vector.broadcast %71 : vector<2x8x1xf32> to vector<2x8x8xf32>
    %73 = arith.mulf %68, %72 : vector<2x8x8xf32>
    %74 = arith.truncf %73 : vector<2x8x8xf32> to vector<2x8x8xbf16>
    "tpu.trace_start"() <{level = 10 : i32, message = "blk,bkd->bld"}> : () -> ()
    %cst_29 = arith.constant dense<0.000000e+00> : vector<2x8x32xf32>
    %75 = tpu.matmul %74, %61, %cst_29 {dimension_numbers = #tpu.dot_dimension_numbers<[2], [1], [1], [2], [0, 0, 0, 1, 1, 2], [0], [0]>} : vector<2x8x8xbf16>, vector<2x8x32xbf16>, vector<2x8x32xf32> -> vector<2x8x32xf32>
    "tpu.trace_stop"() : () -> ()
    %76 = vector.shape_cast %75 : vector<2x8x32xf32> to vector<16x32xf32>
    %77 = arith.truncf %76 : vector<16x32xf32> to vector<16x32xbf16>
    %c0_30 = arith.constant 0 : index
    %c32 = arith.constant 32 : index
    %c0_31 = arith.constant 0 : index
    %78 = vector.load %arg8[%c0_30, %c32, %c0_31] : memref<1x128x128xbf16, #tpu.memory_space<vmem>>, vector<1x32x128xbf16>
    %79 = vector.shape_cast %78 : vector<1x32x128xbf16> to vector<32x128xbf16>
    %cst_32 = arith.constant dense<0.000000e+00> : vector<16x128xf32>
    %80 = tpu.matmul %77, %79, %cst_32 {dimension_numbers = #tpu.dot_dimension_numbers<[1], [0], [0], [1], [0, 0, 1, 1], [], []>} : vector<16x32xbf16>, vector<32x128xbf16>, vector<16x128xf32> -> vector<16x128xf32>
    %81 = arith.addf %52, %80 : vector<16x128xf32>
    %82 = vector.extract_strided_slice %20 {offsets = [0, 64], sizes = [16, 32], strides = [1, 1]} : vector<16x128xf32> to vector<16x32xf32>
    %83 = vector.shape_cast %82 : vector<16x32xf32> to vector<2x8x32xf32>
    %84 = arith.truncf %83 : vector<2x8x32xf32> to vector<2x8x32xbf16>
    %85 = vector.extract_strided_slice %21 {offsets = [0, 64], sizes = [16, 32], strides = [1, 1]} : vector<16x128xf32> to vector<16x32xf32>
    %86 = vector.shape_cast %85 : vector<16x32xf32> to vector<2x8x32xf32>
    %87 = arith.truncf %86 : vector<2x8x32xf32> to vector<2x8x32xbf16>
    %88 = vector.extract_strided_slice %22 {offsets = [0, 64], sizes = [16, 32], strides = [1, 1]} : vector<16x128xf32> to vector<16x32xf32>
    %89 = vector.shape_cast %88 : vector<16x32xf32> to vector<2x8x32xf32>
    %90 = arith.truncf %89 : vector<2x8x32xf32> to vector<2x8x32xbf16>
    "tpu.trace_start"() <{level = 10 : i32, message = "bld,bkd->blk"}> : () -> ()
    %cst_33 = arith.constant dense<0.000000e+00> : vector<2x8x8xf32>
    %91 = tpu.matmul %84, %87, %cst_33 {dimension_numbers = #tpu.dot_dimension_numbers<[2], [2], [1], [1], [0, 0, 0, 1, 1, 1], [0], [0]>} : vector<2x8x32xbf16>, vector<2x8x32xbf16>, vector<2x8x8xf32> -> vector<2x8x8xf32>
    "tpu.trace_stop"() : () -> ()
    %92 = arith.addf %91, %9 : vector<2x8x8xf32>
    %cst_34 = arith.constant dense<0xFF800000> : vector<2x8xf32>
    %93 = vector.multi_reduction <maximumf>, %92, %cst_34 [2] : vector<2x8x8xf32> to vector<2x8xf32>
    %94 = vector.shape_cast %93 : vector<2x8xf32> to vector<2x8x1xf32>
    %95 = vector.broadcast %94 : vector<2x8x1xf32> to vector<2x8x8xf32>
    %96 = arith.subf %92, %95 : vector<2x8x8xf32>
    %97 = math.exp %96 : vector<2x8x8xf32>
    %cst_35 = arith.constant dense<0.000000e+00> : vector<2x8xf32>
    %98 = vector.multi_reduction <add>, %97, %cst_35 [2] : vector<2x8x8xf32> to vector<2x8xf32>
    %99 = vector.shape_cast %98 : vector<2x8xf32> to vector<2x8x1xf32>
    %100 = tpu.reciprocal %99 {approx = true} : vector<2x8x1xf32> -> vector<2x8x1xf32>
    %101 = vector.broadcast %100 : vector<2x8x1xf32> to vector<2x8x8xf32>
    %102 = arith.mulf %97, %101 : vector<2x8x8xf32>
    %103 = arith.truncf %102 : vector<2x8x8xf32> to vector<2x8x8xbf16>
    "tpu.trace_start"() <{level = 10 : i32, message = "blk,bkd->bld"}> : () -> ()
    %cst_36 = arith.constant dense<0.000000e+00> : vector<2x8x32xf32>
    %104 = tpu.matmul %103, %90, %cst_36 {dimension_numbers = #tpu.dot_dimension_numbers<[2], [1], [1], [2], [0, 0, 0, 1, 1, 2], [0], [0]>} : vector<2x8x8xbf16>, vector<2x8x32xbf16>, vector<2x8x32xf32> -> vector<2x8x32xf32>
    "tpu.trace_stop"() : () -> ()
    %105 = vector.shape_cast %104 : vector<2x8x32xf32> to vector<16x32xf32>
    %106 = arith.truncf %105 : vector<16x32xf32> to vector<16x32xbf16>
    %c0_37 = arith.constant 0 : index
    %c64 = arith.constant 64 : index
    %c0_38 = arith.constant 0 : index
    %107 = vector.load %arg8[%c0_37, %c64, %c0_38] : memref<1x128x128xbf16, #tpu.memory_space<vmem>>, vector<1x32x128xbf16>
    %108 = vector.shape_cast %107 : vector<1x32x128xbf16> to vector<32x128xbf16>
    %cst_39 = arith.constant dense<0.000000e+00> : vector<16x128xf32>
    %109 = tpu.matmul %106, %108, %cst_39 {dimension_numbers = #tpu.dot_dimension_numbers<[1], [0], [0], [1], [0, 0, 1, 1], [], []>} : vector<16x32xbf16>, vector<32x128xbf16>, vector<16x128xf32> -> vector<16x128xf32>
    %110 = arith.addf %81, %109 : vector<16x128xf32>
    %111 = vector.extract_strided_slice %20 {offsets = [0, 96], sizes = [16, 32], strides = [1, 1]} : vector<16x128xf32> to vector<16x32xf32>
    %112 = vector.shape_cast %111 : vector<16x32xf32> to vector<2x8x32xf32>
    %113 = arith.truncf %112 : vector<2x8x32xf32> to vector<2x8x32xbf16>
    %114 = vector.extract_strided_slice %21 {offsets = [0, 96], sizes = [16, 32], strides = [1, 1]} : vector<16x128xf32> to vector<16x32xf32>
    %115 = vector.shape_cast %114 : vector<16x32xf32> to vector<2x8x32xf32>
    %116 = arith.truncf %115 : vector<2x8x32xf32> to vector<2x8x32xbf16>
    %117 = vector.extract_strided_slice %22 {offsets = [0, 96], sizes = [16, 32], strides = [1, 1]} : vector<16x128xf32> to vector<16x32xf32>
    %118 = vector.shape_cast %117 : vector<16x32xf32> to vector<2x8x32xf32>
    %119 = arith.truncf %118 : vector<2x8x32xf32> to vector<2x8x32xbf16>
    "tpu.trace_start"() <{level = 10 : i32, message = "bld,bkd->blk"}> : () -> ()
    %cst_40 = arith.constant dense<0.000000e+00> : vector<2x8x8xf32>
    %120 = tpu.matmul %113, %116, %cst_40 {dimension_numbers = #tpu.dot_dimension_numbers<[2], [2], [1], [1], [0, 0, 0, 1, 1, 1], [0], [0]>} : vector<2x8x32xbf16>, vector<2x8x32xbf16>, vector<2x8x8xf32> -> vector<2x8x8xf32>
    "tpu.trace_stop"() : () -> ()
    %121 = arith.addf %120, %9 : vector<2x8x8xf32>
    %cst_41 = arith.constant dense<0xFF800000> : vector<2x8xf32>
    %122 = vector.multi_reduction <maximumf>, %121, %cst_41 [2] : vector<2x8x8xf32> to vector<2x8xf32>
    %123 = vector.shape_cast %122 : vector<2x8xf32> to vector<2x8x1xf32>
    %124 = vector.broadcast %123 : vector<2x8x1xf32> to vector<2x8x8xf32>
    %125 = arith.subf %121, %124 : vector<2x8x8xf32>
    %126 = math.exp %125 : vector<2x8x8xf32>
    %cst_42 = arith.constant dense<0.000000e+00> : vector<2x8xf32>
    %127 = vector.multi_reduction <add>, %126, %cst_42 [2] : vector<2x8x8xf32> to vector<2x8xf32>
    %128 = vector.shape_cast %127 : vector<2x8xf32> to vector<2x8x1xf32>
    %129 = tpu.reciprocal %128 {approx = true} : vector<2x8x1xf32> -> vector<2x8x1xf32>
    %130 = vector.broadcast %129 : vector<2x8x1xf32> to vector<2x8x8xf32>
    %131 = arith.mulf %126, %130 : vector<2x8x8xf32>
    %132 = arith.truncf %131 : vector<2x8x8xf32> to vector<2x8x8xbf16>
    "tpu.trace_start"() <{level = 10 : i32, message = "blk,bkd->bld"}> : () -> ()
    %cst_43 = arith.constant dense<0.000000e+00> : vector<2x8x32xf32>
    %133 = tpu.matmul %132, %119, %cst_43 {dimension_numbers = #tpu.dot_dimension_numbers<[2], [1], [1], [2], [0, 0, 0, 1, 1, 2], [0], [0]>} : vector<2x8x8xbf16>, vector<2x8x32xbf16>, vector<2x8x32xf32> -> vector<2x8x32xf32>
    "tpu.trace_stop"() : () -> ()
    %134 = vector.shape_cast %133 : vector<2x8x32xf32> to vector<16x32xf32>
    %135 = arith.truncf %134 : vector<16x32xf32> to vector<16x32xbf16>
    %c0_44 = arith.constant 0 : index
    %c96 = arith.constant 96 : index
    %c0_45 = arith.constant 0 : index
    %136 = vector.load %arg8[%c0_44, %c96, %c0_45] : memref<1x128x128xbf16, #tpu.memory_space<vmem>>, vector<1x32x128xbf16>
    %137 = vector.shape_cast %136 : vector<1x32x128xbf16> to vector<32x128xbf16>
    %cst_46 = arith.constant dense<0.000000e+00> : vector<16x128xf32>
    %138 = tpu.matmul %135, %137, %cst_46 {dimension_numbers = #tpu.dot_dimension_numbers<[1], [0], [0], [1], [0, 0, 1, 1], [], []>} : vector<16x32xbf16>, vector<32x128xbf16>, vector<16x128xf32> -> vector<16x128xf32>
    %139 = arith.addf %110, %138 : vector<16x128xf32>
    %140 = vector.broadcast %24 : vector<1x128xf32> to vector<16x128xf32>
    %141 = arith.addf %139, %140 : vector<16x128xf32>
    %142 = arith.addf %4, %141 : vector<16x128xf32>
    %c0_47 = arith.constant 0 : index
    %c0_48 = arith.constant 0 : index
    %c0_49 = arith.constant 0 : index
    %143 = vector.load %arg20[%c0_47, %c0_48, %c0_49] : memref<1x3x128xf32, #tpu.memory_space<vmem>>, vector<1x1x128xf32>
    %144 = vector.shape_cast %143 : vector<1x1x128xf32> to vector<1x128xf32>
    %c0_50 = arith.constant 0 : index
    %c0_51 = arith.constant 0 : index
    %c0_52 = arith.constant 0 : index
    %145 = vector.load %arg21[%c0_50, %c0_51, %c0_52] : memref<1x3x128xf32, #tpu.memory_space<vmem>>, vector<1x1x128xf32>
    %146 = vector.shape_cast %145 : vector<1x1x128xf32> to vector<1x128xf32>
    %cst_53 = arith.constant dense<0.000000e+00> : vector<16xf32>
    %147 = vector.multi_reduction <add>, %142, %cst_53 [1] : vector<16x128xf32> to vector<16xf32>
    %148 = vector.shape_cast %147 : vector<16xf32> to vector<16x1xf32>
    %cst_54 = arith.constant 1.280000e+02 : f32
    %149 = vector.broadcast %cst_54 : f32 to vector<16x1xf32>
    %150 = arith.divf %148, %149 : vector<16x1xf32>
    %151 = vector.broadcast %150 : vector<16x1xf32> to vector<16x128xf32>
    %152 = arith.subf %142, %151 : vector<16x128xf32>
    %153 = arith.mulf %152, %152 : vector<16x128xf32>
    %cst_55 = arith.constant dense<0.000000e+00> : vector<16xf32>
    %154 = vector.multi_reduction <add>, %153, %cst_55 [1] : vector<16x128xf32> to vector<16xf32>
    %155 = vector.shape_cast %154 : vector<16xf32> to vector<16x1xf32>
    %cst_56 = arith.constant 1.280000e+02 : f32
    %156 = vector.broadcast %cst_56 : f32 to vector<16x1xf32>
    %157 = arith.divf %155, %156 : vector<16x1xf32>
    %cst_57 = arith.constant 9.99999974E-6 : f32
    %158 = vector.broadcast %cst_57 : f32 to vector<16x1xf32>
    %159 = arith.addf %157, %158 : vector<16x1xf32>
    %160 = math.rsqrt %159 : vector<16x1xf32>
    %161 = vector.broadcast %160 : vector<16x1xf32> to vector<16x128xf32>
    %162 = arith.mulf %152, %161 : vector<16x128xf32>
    %163 = vector.broadcast %144 : vector<1x128xf32> to vector<16x128xf32>
    %164 = arith.mulf %162, %163 : vector<16x128xf32>
    %165 = vector.broadcast %146 : vector<1x128xf32> to vector<16x128xf32>
    %166 = arith.addf %164, %165 : vector<16x128xf32>
    %167 = arith.truncf %166 : vector<16x128xf32> to vector<16x128xbf16>
    %c0_58 = arith.constant 0 : index
    %c0_59 = arith.constant 0 : index
    %c0_60 = arith.constant 0 : index
    %168 = vector.load %arg10[%c0_58, %c0_59, %c0_60] : memref<1x128x128xbf16, #tpu.memory_space<vmem>>, vector<1x128x128xbf16>
    %169 = vector.shape_cast %168 : vector<1x128x128xbf16> to vector<128x128xbf16>
    %cst_61 = arith.constant dense<0.000000e+00> : vector<16x128xf32>
    %170 = tpu.matmul %167, %169, %cst_61 {dimension_numbers = #tpu.dot_dimension_numbers<[1], [0], [0], [1], [0, 0, 1, 1], [], []>} : vector<16x128xbf16>, vector<128x128xbf16>, vector<16x128xf32> -> vector<16x128xf32>
    %c0_62 = arith.constant 0 : index
    %c0_63 = arith.constant 0 : index
    %c0_64 = arith.constant 0 : index
    %171 = vector.load %arg11[%c0_62, %c0_63, %c0_64] : memref<1x1x128xf32, #tpu.memory_space<vmem>>, vector<1x1x128xf32>
    %172 = vector.shape_cast %171 : vector<1x1x128xf32> to vector<1x128xf32>
    %173 = vector.broadcast %172 : vector<1x128xf32> to vector<16x128xf32>
    %174 = arith.addf %170, %173 : vector<16x128xf32>
    %c0_65 = arith.constant 0 : index
    %c0_66 = arith.constant 0 : index
    %c0_67 = arith.constant 0 : index
    %175 = vector.load %arg12[%c0_65, %c0_66, %c0_67] : memref<1x128x256xbf16, #tpu.memory_space<vmem>>, vector<1x128x256xbf16>
    %176 = vector.shape_cast %175 : vector<1x128x256xbf16> to vector<128x256xbf16>
    %cst_68 = arith.constant dense<0.000000e+00> : vector<32x256xf32>
    %177 = tpu.matmul %6, %176, %cst_68 {dimension_numbers = #tpu.dot_dimension_numbers<[1], [0], [0], [1], [0, 0, 1, 1], [], []>} : vector<32x128xbf16>, vector<128x256xbf16>, vector<32x256xf32> -> vector<32x256xf32>
    %c0_69 = arith.constant 0 : index
    %c0_70 = arith.constant 0 : index
    %c0_71 = arith.constant 0 : index
    %178 = vector.load %arg13[%c0_69, %c0_70, %c0_71] : memref<1x1x256xf32, #tpu.memory_space<vmem>>, vector<1x1x256xf32>
    %179 = vector.shape_cast %178 : vector<1x1x256xf32> to vector<1x256xf32>
    %180 = vector.broadcast %179 : vector<1x256xf32> to vector<32x256xf32>
    %181 = arith.addf %177, %180 : vector<32x256xf32>
    %cst_72 = arith.constant 0.176776692 : f32
    %182 = vector.broadcast %cst_72 : f32 to vector<16x128xf32>
    %183 = arith.mulf %174, %182 : vector<16x128xf32>
    %184 = vector.extract_strided_slice %181 {offsets = [0, 0], sizes = [32, 128], strides = [1, 1]} : vector<32x256xf32> to vector<32x128xf32>
    %185 = vector.extract_strided_slice %181 {offsets = [0, 128], sizes = [32, 128], strides = [1, 1]} : vector<32x256xf32> to vector<32x128xf32>
    %c0_73 = arith.constant 0 : index
    %c0_74 = arith.constant 0 : index
    %c0_75 = arith.constant 0 : index
    %186 = vector.load %arg15[%c0_73, %c0_74, %c0_75] : memref<1x1x128xf32, #tpu.memory_space<vmem>>, vector<1x1x128xf32>
    %187 = vector.shape_cast %186 : vector<1x1x128xf32> to vector<1x128xf32>
    %188 = vector.extract_strided_slice %183 {offsets = [0, 0], sizes = [16, 32], strides = [1, 1]} : vector<16x128xf32> to vector<16x32xf32>
    %189 = vector.shape_cast %188 : vector<16x32xf32> to vector<2x8x32xf32>
    %190 = arith.truncf %189 : vector<2x8x32xf32> to vector<2x8x32xbf16>
    %191 = vector.extract_strided_slice %184 {offsets = [0, 0], sizes = [32, 32], strides = [1, 1]} : vector<32x128xf32> to vector<32x32xf32>
    %192 = vector.shape_cast %191 : vector<32x32xf32> to vector<2x16x32xf32>
    %193 = arith.truncf %192 : vector<2x16x32xf32> to vector<2x16x32xbf16>
    %194 = vector.extract_strided_slice %185 {offsets = [0, 0], sizes = [32, 32], strides = [1, 1]} : vector<32x128xf32> to vector<32x32xf32>
    %195 = vector.shape_cast %194 : vector<32x32xf32> to vector<2x16x32xf32>
    %196 = arith.truncf %195 : vector<2x16x32xf32> to vector<2x16x32xbf16>
    "tpu.trace_start"() <{level = 10 : i32, message = "bld,bkd->blk"}> : () -> ()
    %cst_76 = arith.constant dense<0.000000e+00> : vector<2x8x16xf32>
    %197 = tpu.matmul %190, %193, %cst_76 {dimension_numbers = #tpu.dot_dimension_numbers<[2], [2], [1], [1], [0, 0, 0, 1, 1, 1], [0], [0]>} : vector<2x8x32xbf16>, vector<2x16x32xbf16>, vector<2x8x16xf32> -> vector<2x8x16xf32>
    "tpu.trace_stop"() : () -> ()
    %cst_77 = arith.constant dense<0xFF800000> : vector<2x8xf32>
    %198 = vector.multi_reduction <maximumf>, %197, %cst_77 [2] : vector<2x8x16xf32> to vector<2x8xf32>
    %199 = vector.shape_cast %198 : vector<2x8xf32> to vector<2x8x1xf32>
    %200 = vector.broadcast %199 : vector<2x8x1xf32> to vector<2x8x16xf32>
    %201 = arith.subf %197, %200 : vector<2x8x16xf32>
    %202 = math.exp %201 : vector<2x8x16xf32>
    %cst_78 = arith.constant dense<0.000000e+00> : vector<2x8xf32>
    %203 = vector.multi_reduction <add>, %202, %cst_78 [2] : vector<2x8x16xf32> to vector<2x8xf32>
    %204 = vector.shape_cast %203 : vector<2x8xf32> to vector<2x8x1xf32>
    %205 = tpu.reciprocal %204 {approx = true} : vector<2x8x1xf32> -> vector<2x8x1xf32>
    %206 = vector.broadcast %205 : vector<2x8x1xf32> to vector<2x8x16xf32>
    %207 = arith.mulf %202, %206 : vector<2x8x16xf32>
    %208 = arith.truncf %207 : vector<2x8x16xf32> to vector<2x8x16xbf16>
    "tpu.trace_start"() <{level = 10 : i32, message = "blk,bkd->bld"}> : () -> ()
    %cst_79 = arith.constant dense<0.000000e+00> : vector<2x8x32xf32>
    %209 = tpu.matmul %208, %196, %cst_79 {dimension_numbers = #tpu.dot_dimension_numbers<[2], [1], [1], [2], [0, 0, 0, 1, 1, 2], [0], [0]>} : vector<2x8x16xbf16>, vector<2x16x32xbf16>, vector<2x8x32xf32> -> vector<2x8x32xf32>
    "tpu.trace_stop"() : () -> ()
    %210 = vector.shape_cast %209 : vector<2x8x32xf32> to vector<16x32xf32>
    %211 = arith.truncf %210 : vector<16x32xf32> to vector<16x32xbf16>
    %c0_80 = arith.constant 0 : index
    %c0_81 = arith.constant 0 : index
    %c0_82 = arith.constant 0 : index
    %212 = vector.load %arg14[%c0_80, %c0_81, %c0_82] : memref<1x128x128xbf16, #tpu.memory_space<vmem>>, vector<1x32x128xbf16>
    %213 = vector.shape_cast %212 : vector<1x32x128xbf16> to vector<32x128xbf16>
    %cst_83 = arith.constant dense<0.000000e+00> : vector<16x128xf32>
    %214 = tpu.matmul %211, %213, %cst_83 {dimension_numbers = #tpu.dot_dimension_numbers<[1], [0], [0], [1], [0, 0, 1, 1], [], []>} : vector<16x32xbf16>, vector<32x128xbf16>, vector<16x128xf32> -> vector<16x128xf32>
    %215 = vector.extract_strided_slice %183 {offsets = [0, 32], sizes = [16, 32], strides = [1, 1]} : vector<16x128xf32> to vector<16x32xf32>
    %216 = vector.shape_cast %215 : vector<16x32xf32> to vector<2x8x32xf32>
    %217 = arith.truncf %216 : vector<2x8x32xf32> to vector<2x8x32xbf16>
    %218 = vector.extract_strided_slice %184 {offsets = [0, 32], sizes = [32, 32], strides = [1, 1]} : vector<32x128xf32> to vector<32x32xf32>
    %219 = vector.shape_cast %218 : vector<32x32xf32> to vector<2x16x32xf32>
    %220 = arith.truncf %219 : vector<2x16x32xf32> to vector<2x16x32xbf16>
    %221 = vector.extract_strided_slice %185 {offsets = [0, 32], sizes = [32, 32], strides = [1, 1]} : vector<32x128xf32> to vector<32x32xf32>
    %222 = vector.shape_cast %221 : vector<32x32xf32> to vector<2x16x32xf32>
    %223 = arith.truncf %222 : vector<2x16x32xf32> to vector<2x16x32xbf16>
    "tpu.trace_start"() <{level = 10 : i32, message = "bld,bkd->blk"}> : () -> ()
    %cst_84 = arith.constant dense<0.000000e+00> : vector<2x8x16xf32>
    %224 = tpu.matmul %217, %220, %cst_84 {dimension_numbers = #tpu.dot_dimension_numbers<[2], [2], [1], [1], [0, 0, 0, 1, 1, 1], [0], [0]>} : vector<2x8x32xbf16>, vector<2x16x32xbf16>, vector<2x8x16xf32> -> vector<2x8x16xf32>
    "tpu.trace_stop"() : () -> ()
    %cst_85 = arith.constant dense<0xFF800000> : vector<2x8xf32>
    %225 = vector.multi_reduction <maximumf>, %224, %cst_85 [2] : vector<2x8x16xf32> to vector<2x8xf32>
    %226 = vector.shape_cast %225 : vector<2x8xf32> to vector<2x8x1xf32>
    %227 = vector.broadcast %226 : vector<2x8x1xf32> to vector<2x8x16xf32>
    %228 = arith.subf %224, %227 : vector<2x8x16xf32>
    %229 = math.exp %228 : vector<2x8x16xf32>
    %cst_86 = arith.constant dense<0.000000e+00> : vector<2x8xf32>
    %230 = vector.multi_reduction <add>, %229, %cst_86 [2] : vector<2x8x16xf32> to vector<2x8xf32>
    %231 = vector.shape_cast %230 : vector<2x8xf32> to vector<2x8x1xf32>
    %232 = tpu.reciprocal %231 {approx = true} : vector<2x8x1xf32> -> vector<2x8x1xf32>
    %233 = vector.broadcast %232 : vector<2x8x1xf32> to vector<2x8x16xf32>
    %234 = arith.mulf %229, %233 : vector<2x8x16xf32>
    %235 = arith.truncf %234 : vector<2x8x16xf32> to vector<2x8x16xbf16>
    "tpu.trace_start"() <{level = 10 : i32, message = "blk,bkd->bld"}> : () -> ()
    %cst_87 = arith.constant dense<0.000000e+00> : vector<2x8x32xf32>
    %236 = tpu.matmul %235, %223, %cst_87 {dimension_numbers = #tpu.dot_dimension_numbers<[2], [1], [1], [2], [0, 0, 0, 1, 1, 2], [0], [0]>} : vector<2x8x16xbf16>, vector<2x16x32xbf16>, vector<2x8x32xf32> -> vector<2x8x32xf32>
    "tpu.trace_stop"() : () -> ()
    %237 = vector.shape_cast %236 : vector<2x8x32xf32> to vector<16x32xf32>
    %238 = arith.truncf %237 : vector<16x32xf32> to vector<16x32xbf16>
    %c0_88 = arith.constant 0 : index
    %c32_89 = arith.constant 32 : index
    %c0_90 = arith.constant 0 : index
    %239 = vector.load %arg14[%c0_88, %c32_89, %c0_90] : memref<1x128x128xbf16, #tpu.memory_space<vmem>>, vector<1x32x128xbf16>
    %240 = vector.shape_cast %239 : vector<1x32x128xbf16> to vector<32x128xbf16>
    %cst_91 = arith.constant dense<0.000000e+00> : vector<16x128xf32>
    %241 = tpu.matmul %238, %240, %cst_91 {dimension_numbers = #tpu.dot_dimension_numbers<[1], [0], [0], [1], [0, 0, 1, 1], [], []>} : vector<16x32xbf16>, vector<32x128xbf16>, vector<16x128xf32> -> vector<16x128xf32>
    %242 = arith.addf %214, %241 : vector<16x128xf32>
    %243 = vector.extract_strided_slice %183 {offsets = [0, 64], sizes = [16, 32], strides = [1, 1]} : vector<16x128xf32> to vector<16x32xf32>
    %244 = vector.shape_cast %243 : vector<16x32xf32> to vector<2x8x32xf32>
    %245 = arith.truncf %244 : vector<2x8x32xf32> to vector<2x8x32xbf16>
    %246 = vector.extract_strided_slice %184 {offsets = [0, 64], sizes = [32, 32], strides = [1, 1]} : vector<32x128xf32> to vector<32x32xf32>
    %247 = vector.shape_cast %246 : vector<32x32xf32> to vector<2x16x32xf32>
    %248 = arith.truncf %247 : vector<2x16x32xf32> to vector<2x16x32xbf16>
    %249 = vector.extract_strided_slice %185 {offsets = [0, 64], sizes = [32, 32], strides = [1, 1]} : vector<32x128xf32> to vector<32x32xf32>
    %250 = vector.shape_cast %249 : vector<32x32xf32> to vector<2x16x32xf32>
    %251 = arith.truncf %250 : vector<2x16x32xf32> to vector<2x16x32xbf16>
    "tpu.trace_start"() <{level = 10 : i32, message = "bld,bkd->blk"}> : () -> ()
    %cst_92 = arith.constant dense<0.000000e+00> : vector<2x8x16xf32>
    %252 = tpu.matmul %245, %248, %cst_92 {dimension_numbers = #tpu.dot_dimension_numbers<[2], [2], [1], [1], [0, 0, 0, 1, 1, 1], [0], [0]>} : vector<2x8x32xbf16>, vector<2x16x32xbf16>, vector<2x8x16xf32> -> vector<2x8x16xf32>
    "tpu.trace_stop"() : () -> ()
    %cst_93 = arith.constant dense<0xFF800000> : vector<2x8xf32>
    %253 = vector.multi_reduction <maximumf>, %252, %cst_93 [2] : vector<2x8x16xf32> to vector<2x8xf32>
    %254 = vector.shape_cast %253 : vector<2x8xf32> to vector<2x8x1xf32>
    %255 = vector.broadcast %254 : vector<2x8x1xf32> to vector<2x8x16xf32>
    %256 = arith.subf %252, %255 : vector<2x8x16xf32>
    %257 = math.exp %256 : vector<2x8x16xf32>
    %cst_94 = arith.constant dense<0.000000e+00> : vector<2x8xf32>
    %258 = vector.multi_reduction <add>, %257, %cst_94 [2] : vector<2x8x16xf32> to vector<2x8xf32>
    %259 = vector.shape_cast %258 : vector<2x8xf32> to vector<2x8x1xf32>
    %260 = tpu.reciprocal %259 {approx = true} : vector<2x8x1xf32> -> vector<2x8x1xf32>
    %261 = vector.broadcast %260 : vector<2x8x1xf32> to vector<2x8x16xf32>
    %262 = arith.mulf %257, %261 : vector<2x8x16xf32>
    %263 = arith.truncf %262 : vector<2x8x16xf32> to vector<2x8x16xbf16>
    "tpu.trace_start"() <{level = 10 : i32, message = "blk,bkd->bld"}> : () -> ()
    %cst_95 = arith.constant dense<0.000000e+00> : vector<2x8x32xf32>
    %264 = tpu.matmul %263, %251, %cst_95 {dimension_numbers = #tpu.dot_dimension_numbers<[2], [1], [1], [2], [0, 0, 0, 1, 1, 2], [0], [0]>} : vector<2x8x16xbf16>, vector<2x16x32xbf16>, vector<2x8x32xf32> -> vector<2x8x32xf32>
    "tpu.trace_stop"() : () -> ()
    %265 = vector.shape_cast %264 : vector<2x8x32xf32> to vector<16x32xf32>
    %266 = arith.truncf %265 : vector<16x32xf32> to vector<16x32xbf16>
    %c0_96 = arith.constant 0 : index
    %c64_97 = arith.constant 64 : index
    %c0_98 = arith.constant 0 : index
    %267 = vector.load %arg14[%c0_96, %c64_97, %c0_98] : memref<1x128x128xbf16, #tpu.memory_space<vmem>>, vector<1x32x128xbf16>
    %268 = vector.shape_cast %267 : vector<1x32x128xbf16> to vector<32x128xbf16>
    %cst_99 = arith.constant dense<0.000000e+00> : vector<16x128xf32>
    %269 = tpu.matmul %266, %268, %cst_99 {dimension_numbers = #tpu.dot_dimension_numbers<[1], [0], [0], [1], [0, 0, 1, 1], [], []>} : vector<16x32xbf16>, vector<32x128xbf16>, vector<16x128xf32> -> vector<16x128xf32>
    %270 = arith.addf %242, %269 : vector<16x128xf32>
    %271 = vector.extract_strided_slice %183 {offsets = [0, 96], sizes = [16, 32], strides = [1, 1]} : vector<16x128xf32> to vector<16x32xf32>
    %272 = vector.shape_cast %271 : vector<16x32xf32> to vector<2x8x32xf32>
    %273 = arith.truncf %272 : vector<2x8x32xf32> to vector<2x8x32xbf16>
    %274 = vector.extract_strided_slice %184 {offsets = [0, 96], sizes = [32, 32], strides = [1, 1]} : vector<32x128xf32> to vector<32x32xf32>
    %275 = vector.shape_cast %274 : vector<32x32xf32> to vector<2x16x32xf32>
    %276 = arith.truncf %275 : vector<2x16x32xf32> to vector<2x16x32xbf16>
    %277 = vector.extract_strided_slice %185 {offsets = [0, 96], sizes = [32, 32], strides = [1, 1]} : vector<32x128xf32> to vector<32x32xf32>
    %278 = vector.shape_cast %277 : vector<32x32xf32> to vector<2x16x32xf32>
    %279 = arith.truncf %278 : vector<2x16x32xf32> to vector<2x16x32xbf16>
    "tpu.trace_start"() <{level = 10 : i32, message = "bld,bkd->blk"}> : () -> ()
    %cst_100 = arith.constant dense<0.000000e+00> : vector<2x8x16xf32>
    %280 = tpu.matmul %273, %276, %cst_100 {dimension_numbers = #tpu.dot_dimension_numbers<[2], [2], [1], [1], [0, 0, 0, 1, 1, 1], [0], [0]>} : vector<2x8x32xbf16>, vector<2x16x32xbf16>, vector<2x8x16xf32> -> vector<2x8x16xf32>
    "tpu.trace_stop"() : () -> ()
    %cst_101 = arith.constant dense<0xFF800000> : vector<2x8xf32>
    %281 = vector.multi_reduction <maximumf>, %280, %cst_101 [2] : vector<2x8x16xf32> to vector<2x8xf32>
    %282 = vector.shape_cast %281 : vector<2x8xf32> to vector<2x8x1xf32>
    %283 = vector.broadcast %282 : vector<2x8x1xf32> to vector<2x8x16xf32>
    %284 = arith.subf %280, %283 : vector<2x8x16xf32>
    %285 = math.exp %284 : vector<2x8x16xf32>
    %cst_102 = arith.constant dense<0.000000e+00> : vector<2x8xf32>
    %286 = vector.multi_reduction <add>, %285, %cst_102 [2] : vector<2x8x16xf32> to vector<2x8xf32>
    %287 = vector.shape_cast %286 : vector<2x8xf32> to vector<2x8x1xf32>
    %288 = tpu.reciprocal %287 {approx = true} : vector<2x8x1xf32> -> vector<2x8x1xf32>
    %289 = vector.broadcast %288 : vector<2x8x1xf32> to vector<2x8x16xf32>
    %290 = arith.mulf %285, %289 : vector<2x8x16xf32>
    %291 = arith.truncf %290 : vector<2x8x16xf32> to vector<2x8x16xbf16>
    "tpu.trace_start"() <{level = 10 : i32, message = "blk,bkd->bld"}> : () -> ()
    %cst_103 = arith.constant dense<0.000000e+00> : vector<2x8x32xf32>
    %292 = tpu.matmul %291, %279, %cst_103 {dimension_numbers = #tpu.dot_dimension_numbers<[2], [1], [1], [2], [0, 0, 0, 1, 1, 2], [0], [0]>} : vector<2x8x16xbf16>, vector<2x16x32xbf16>, vector<2x8x32xf32> -> vector<2x8x32xf32>
    "tpu.trace_stop"() : () -> ()
    %293 = vector.shape_cast %292 : vector<2x8x32xf32> to vector<16x32xf32>
    %294 = arith.truncf %293 : vector<16x32xf32> to vector<16x32xbf16>
    %c0_104 = arith.constant 0 : index
    %c96_105 = arith.constant 96 : index
    %c0_106 = arith.constant 0 : index
    %295 = vector.load %arg14[%c0_104, %c96_105, %c0_106] : memref<1x128x128xbf16, #tpu.memory_space<vmem>>, vector<1x32x128xbf16>
    %296 = vector.shape_cast %295 : vector<1x32x128xbf16> to vector<32x128xbf16>
    %cst_107 = arith.constant dense<0.000000e+00> : vector<16x128xf32>
    %297 = tpu.matmul %294, %296, %cst_107 {dimension_numbers = #tpu.dot_dimension_numbers<[1], [0], [0], [1], [0, 0, 1, 1], [], []>} : vector<16x32xbf16>, vector<32x128xbf16>, vector<16x128xf32> -> vector<16x128xf32>
    %298 = arith.addf %270, %297 : vector<16x128xf32>
    %299 = vector.broadcast %187 : vector<1x128xf32> to vector<16x128xf32>
    %300 = arith.addf %298, %299 : vector<16x128xf32>
    %301 = arith.addf %166, %300 : vector<16x128xf32>
    %c0_108 = arith.constant 0 : index
    %c1 = arith.constant 1 : index
    %c0_109 = arith.constant 0 : index
    %302 = vector.load %arg20[%c0_108, %c1, %c0_109] : memref<1x3x128xf32, #tpu.memory_space<vmem>>, vector<1x1x128xf32>
    %303 = vector.shape_cast %302 : vector<1x1x128xf32> to vector<1x128xf32>
    %c0_110 = arith.constant 0 : index
    %c1_111 = arith.constant 1 : index
    %c0_112 = arith.constant 0 : index
    %304 = vector.load %arg21[%c0_110, %c1_111, %c0_112] : memref<1x3x128xf32, #tpu.memory_space<vmem>>, vector<1x1x128xf32>
    %305 = vector.shape_cast %304 : vector<1x1x128xf32> to vector<1x128xf32>
    %cst_113 = arith.constant dense<0.000000e+00> : vector<16xf32>
    %306 = vector.multi_reduction <add>, %301, %cst_113 [1] : vector<16x128xf32> to vector<16xf32>
    %307 = vector.shape_cast %306 : vector<16xf32> to vector<16x1xf32>
    %cst_114 = arith.constant 1.280000e+02 : f32
    %308 = vector.broadcast %cst_114 : f32 to vector<16x1xf32>
    %309 = arith.divf %307, %308 : vector<16x1xf32>
    %310 = vector.broadcast %309 : vector<16x1xf32> to vector<16x128xf32>
    %311 = arith.subf %301, %310 : vector<16x128xf32>
    %312 = arith.mulf %311, %311 : vector<16x128xf32>
    %cst_115 = arith.constant dense<0.000000e+00> : vector<16xf32>
    %313 = vector.multi_reduction <add>, %312, %cst_115 [1] : vector<16x128xf32> to vector<16xf32>
    %314 = vector.shape_cast %313 : vector<16xf32> to vector<16x1xf32>
    %cst_116 = arith.constant 1.280000e+02 : f32
    %315 = vector.broadcast %cst_116 : f32 to vector<16x1xf32>
    %316 = arith.divf %314, %315 : vector<16x1xf32>
    %cst_117 = arith.constant 9.99999974E-6 : f32
    %317 = vector.broadcast %cst_117 : f32 to vector<16x1xf32>
    %318 = arith.addf %316, %317 : vector<16x1xf32>
    %319 = math.rsqrt %318 : vector<16x1xf32>
    %320 = vector.broadcast %319 : vector<16x1xf32> to vector<16x128xf32>
    %321 = arith.mulf %311, %320 : vector<16x128xf32>
    %322 = vector.broadcast %303 : vector<1x128xf32> to vector<16x128xf32>
    %323 = arith.mulf %321, %322 : vector<16x128xf32>
    %324 = vector.broadcast %305 : vector<1x128xf32> to vector<16x128xf32>
    %325 = arith.addf %323, %324 : vector<16x128xf32>
    %326 = arith.truncf %325 : vector<16x128xf32> to vector<16x128xbf16>
    %c0_118 = arith.constant 0 : index
    %c0_119 = arith.constant 0 : index
    %c0_120 = arith.constant 0 : index
    %327 = vector.load %arg16[%c0_118, %c0_119, %c0_120] : memref<1x128x512xbf16, #tpu.memory_space<vmem>>, vector<1x128x512xbf16>
    %328 = vector.shape_cast %327 : vector<1x128x512xbf16> to vector<128x512xbf16>
    %cst_121 = arith.constant dense<0.000000e+00> : vector<16x512xf32>
    %329 = tpu.matmul %326, %328, %cst_121 {dimension_numbers = #tpu.dot_dimension_numbers<[1], [0], [0], [1], [0, 0, 1, 1], [], []>} : vector<16x128xbf16>, vector<128x512xbf16>, vector<16x512xf32> -> vector<16x512xf32>
    %c0_122 = arith.constant 0 : index
    %c0_123 = arith.constant 0 : index
    %c0_124 = arith.constant 0 : index
    %330 = vector.load %arg17[%c0_122, %c0_123, %c0_124] : memref<1x1x512xf32, #tpu.memory_space<vmem>>, vector<1x1x512xf32>
    %331 = vector.shape_cast %330 : vector<1x1x512xf32> to vector<1x512xf32>
    %332 = vector.broadcast %331 : vector<1x512xf32> to vector<16x512xf32>
    %333 = arith.addf %329, %332 : vector<16x512xf32>
    %cst_125 = arith.constant 0.000000e+00 : f32
    %334 = vector.broadcast %cst_125 : f32 to vector<16x512xf32>
    %335 = arith.maximumf %333, %334 : vector<16x512xf32>
    %336 = arith.truncf %335 : vector<16x512xf32> to vector<16x512xbf16>
    %c0_126 = arith.constant 0 : index
    %c0_127 = arith.constant 0 : index
    %c0_128 = arith.constant 0 : index
    %337 = vector.load %arg18[%c0_126, %c0_127, %c0_128] : memref<1x512x128xbf16, #tpu.memory_space<vmem>>, vector<1x512x128xbf16>
    %338 = vector.shape_cast %337 : vector<1x512x128xbf16> to vector<512x128xbf16>
    %cst_129 = arith.constant dense<0.000000e+00> : vector<16x128xf32>
    %339 = tpu.matmul %336, %338, %cst_129 {dimension_numbers = #tpu.dot_dimension_numbers<[1], [0], [0], [1], [0, 0, 1, 1], [], []>} : vector<16x512xbf16>, vector<512x128xbf16>, vector<16x128xf32> -> vector<16x128xf32>
    %c0_130 = arith.constant 0 : index
    %c0_131 = arith.constant 0 : index
    %c0_132 = arith.constant 0 : index
    %340 = vector.load %arg19[%c0_130, %c0_131, %c0_132] : memref<1x1x128xf32, #tpu.memory_space<vmem>>, vector<1x1x128xf32>
    %341 = vector.shape_cast %340 : vector<1x1x128xf32> to vector<1x128xf32>
    %342 = vector.broadcast %341 : vector<1x128xf32> to vector<16x128xf32>
    %343 = arith.addf %339, %342 : vector<16x128xf32>
    %344 = arith.addf %325, %343 : vector<16x128xf32>
    %c0_133 = arith.constant 0 : index
    %c2 = arith.constant 2 : index
    %c0_134 = arith.constant 0 : index
    %345 = vector.load %arg20[%c0_133, %c2, %c0_134] : memref<1x3x128xf32, #tpu.memory_space<vmem>>, vector<1x1x128xf32>
    %346 = vector.shape_cast %345 : vector<1x1x128xf32> to vector<1x128xf32>
    %c0_135 = arith.constant 0 : index
    %c2_136 = arith.constant 2 : index
    %c0_137 = arith.constant 0 : index
    %347 = vector.load %arg21[%c0_135, %c2_136, %c0_137] : memref<1x3x128xf32, #tpu.memory_space<vmem>>, vector<1x1x128xf32>
    %348 = vector.shape_cast %347 : vector<1x1x128xf32> to vector<1x128xf32>
    %cst_138 = arith.constant dense<0.000000e+00> : vector<16xf32>
    %349 = vector.multi_reduction <add>, %344, %cst_138 [1] : vector<16x128xf32> to vector<16xf32>
    %350 = vector.shape_cast %349 : vector<16xf32> to vector<16x1xf32>
    %cst_139 = arith.constant 1.280000e+02 : f32
    %351 = vector.broadcast %cst_139 : f32 to vector<16x1xf32>
    %352 = arith.divf %350, %351 : vector<16x1xf32>
    %353 = vector.broadcast %352 : vector<16x1xf32> to vector<16x128xf32>
    %354 = arith.subf %344, %353 : vector<16x128xf32>
    %355 = arith.mulf %354, %354 : vector<16x128xf32>
    %cst_140 = arith.constant dense<0.000000e+00> : vector<16xf32>
    %356 = vector.multi_reduction <add>, %355, %cst_140 [1] : vector<16x128xf32> to vector<16xf32>
    %357 = vector.shape_cast %356 : vector<16xf32> to vector<16x1xf32>
    %cst_141 = arith.constant 1.280000e+02 : f32
    %358 = vector.broadcast %cst_141 : f32 to vector<16x1xf32>
    %359 = arith.divf %357, %358 : vector<16x1xf32>
    %cst_142 = arith.constant 9.99999974E-6 : f32
    %360 = vector.broadcast %cst_142 : f32 to vector<16x1xf32>
    %361 = arith.addf %359, %360 : vector<16x1xf32>
    %362 = math.rsqrt %361 : vector<16x1xf32>
    %363 = vector.broadcast %362 : vector<16x1xf32> to vector<16x128xf32>
    %364 = arith.mulf %354, %363 : vector<16x128xf32>
    %365 = vector.broadcast %346 : vector<1x128xf32> to vector<16x128xf32>
    %366 = arith.mulf %364, %365 : vector<16x128xf32>
    %367 = vector.broadcast %348 : vector<1x128xf32> to vector<16x128xf32>
    %368 = arith.addf %366, %367 : vector<16x128xf32>
    %c1_i32 = arith.constant 1 : i32
    %369 = arith.cmpi slt, %arg1, %c1_i32 : i32
    %370 = arith.extui %369 : i1 to i32
    %c0_i32_143 = arith.constant 0 : i32
    %371 = arith.cmpi ne, %370, %c0_i32_143 : i32
    scf.if %371 {
      %375 = vector.shape_cast %368 : vector<16x128xf32> to vector<2x8x128xf32>
      %c0_146 = arith.constant 0 : index
      %c0_147 = arith.constant 0 : index
      %c0_148 = arith.constant 0 : index
      %376 = vector.load %arg23[%c0_146, %c0_147, %c0_148] : memref<2x8x128xf32, #tpu.memory_space<vmem>>, vector<2x8x128xf32>
      tpu.vector_store %arg23[%c0_146, %c0_147, %c0_148], %375 {strides = array<i32>} : memref<2x8x128xf32, #tpu.memory_space<vmem>>, vector<2x8x128xf32>,
    } else {
    }
    %c1_i32_144 = arith.constant 1 : i32
    %372 = arith.cmpi eq, %arg1, %c1_i32_144 : i32
    %373 = arith.extui %372 : i1 to i32
    %c0_i32_145 = arith.constant 0 : i32
    %374 = arith.cmpi ne, %373, %c0_i32_145 : i32
    scf.if %374 {
      %375 = vector.shape_cast %368 : vector<16x128xf32> to vector<2x8x128xf32>
      %c0_146 = arith.constant 0 : index
      %c0_147 = arith.constant 0 : index
      %c0_148 = arith.constant 0 : index
      %376 = vector.load %arg22[%c0_146, %c0_147, %c0_148] : memref<2x8x128xf32, #tpu.memory_space<vmem>>, vector<2x8x128xf32>
      tpu.vector_store %arg22[%c0_146, %c0_147, %c0_148], %375 {strides = array<i32>} : memref<2x8x128xf32, #tpu.memory_space<vmem>>, vector<2x8x128xf32>,
    } else {
    }
    return
  }
  func.func @transform_0(%arg0: i32, %arg1: i32) -> (i32, i32, i32) {
    %c0_i32 = arith.constant 0 : i32
    %c0_i32_0 = arith.constant 0 : i32
    %c0_i32_1 = arith.constant 0 : i32
    return %arg0, %c0_i32, %c0_i32_0 : i32, i32, i32
  }
  func.func @transform_1(%arg0: i32, %arg1: i32) -> (i32, i32, i32) {
    %c0_i32 = arith.constant 0 : i32
    %c0_i32_0 = arith.constant 0 : i32
    %c0_i32_1 = arith.constant 0 : i32
    return %arg0, %c0_i32, %c0_i32_0 : i32, i32, i32
  }
  func.func @transform_2(%arg0: i32, %arg1: i32) -> (i32, i32) {
    %c0_i32 = arith.constant 0 : i32
    %c0_i32_0 = arith.constant 0 : i32
    %c0_i32_1 = arith.constant 0 : i32
    return %c0_i32, %c0_i32_0 : i32, i32
  }
  func.func @transform_3(%arg0: i32, %arg1: i32) -> (i32, i32) {
    %c0_i32 = arith.constant 0 : i32
    %c0_i32_0 = arith.constant 0 : i32
    %c0_i32_1 = arith.constant 0 : i32
    return %c0_i32, %c0_i32_0 : i32, i32
  }
  func.func @transform_4(%arg0: i32, %arg1: i32) -> (i32, i32, i32) {
    %c0_i32 = arith.constant 0 : i32
    %c0_i32_0 = arith.constant 0 : i32
    %c0_i32_1 = arith.constant 0 : i32
    return %arg1, %c0_i32, %c0_i32_0 : i32, i32, i32
  }
  func.func @transform_5(%arg0: i32, %arg1: i32) -> (i32, i32, i32) {
    %c0_i32 = arith.constant 0 : i32
    %c0_i32_0 = arith.constant 0 : i32
    %c0_i32_1 = arith.constant 0 : i32
    return %arg1, %c0_i32, %c0_i32_0 : i32, i32, i32
  }
  func.func @transform_6(%arg0: i32, %arg1: i32) -> (i32, i32, i32) {
    %c0_i32 = arith.constant 0 : i32
    %c0_i32_0 = arith.constant 0 : i32
    %c0_i32_1 = arith.constant 0 : i32
    return %arg1, %c0_i32, %c0_i32_0 : i32, i32, i32
  }
  func.func @transform_7(%arg0: i32, %arg1: i32) -> (i32, i32, i32) {
    %c0_i32 = arith.constant 0 : i32
    %c0_i32_0 = arith.constant 0 : i32
    %c0_i32_1 = arith.constant 0 : i32
    return %arg1, %c0_i32, %c0_i32_0 : i32, i32, i32
  }
  func.func @transform_8(%arg0: i32, %arg1: i32) -> (i32, i32, i32) {
    %c0_i32 = arith.constant 0 : i32
    %c0_i32_0 = arith.constant 0 : i32
    %c0_i32_1 = arith.constant 0 : i32
    return %arg1, %c0_i32, %c0_i32_0 : i32, i32, i32
  }
  func.func @transform_9(%arg0: i32, %arg1: i32) -> (i32, i32, i32) {
    %c0_i32 = arith.constant 0 : i32
    %c0_i32_0 = arith.constant 0 : i32
    %c0_i32_1 = arith.constant 0 : i32
    return %arg1, %c0_i32, %c0_i32_0 : i32, i32, i32
  }
  func.func @transform_10(%arg0: i32, %arg1: i32) -> (i32, i32, i32) {
    %c0_i32 = arith.constant 0 : i32
    %c0_i32_0 = arith.constant 0 : i32
    %c0_i32_1 = arith.constant 0 : i32
    return %arg1, %c0_i32, %c0_i32_0 : i32, i32, i32
  }
  func.func @transform_11(%arg0: i32, %arg1: i32) -> (i32, i32, i32) {
    %c0_i32 = arith.constant 0 : i32
    %c0_i32_0 = arith.constant 0 : i32
    %c0_i32_1 = arith.constant 0 : i32
    return %arg1, %c0_i32, %c0_i32_0 : i32, i32, i32
  }
  func.func @transform_12(%arg0: i32, %arg1: i32) -> (i32, i32, i32) {
    %c0_i32 = arith.constant 0 : i32
    %c0_i32_0 = arith.constant 0 : i32
    %c0_i32_1 = arith.constant 0 : i32
    return %arg1, %c0_i32, %c0_i32_0 : i32, i32, i32
  }
  func.func @transform_13(%arg0: i32, %arg1: i32) -> (i32, i32, i32) {
    %c0_i32 = arith.constant 0 : i32
    %c0_i32_0 = arith.constant 0 : i32
    %c0_i32_1 = arith.constant 0 : i32
    return %arg1, %c0_i32, %c0_i32_0 : i32, i32, i32
  }
  func.func @transform_14(%arg0: i32, %arg1: i32) -> (i32, i32, i32) {
    %c0_i32 = arith.constant 0 : i32
    %c0_i32_0 = arith.constant 0 : i32
    %c0_i32_1 = arith.constant 0 : i32
    return %arg1, %c0_i32, %c0_i32_0 : i32, i32, i32
  }
  func.func @transform_15(%arg0: i32, %arg1: i32) -> (i32, i32, i32) {
    %c0_i32 = arith.constant 0 : i32
    %c0_i32_0 = arith.constant 0 : i32
    %c0_i32_1 = arith.constant 0 : i32
    return %arg1, %c0_i32, %c0_i32_0 : i32, i32, i32
  }
  func.func @transform_16(%arg0: i32, %arg1: i32) -> (i32, i32, i32) {
    %c0_i32 = arith.constant 0 : i32
    %c0_i32_0 = arith.constant 0 : i32
    %c0_i32_1 = arith.constant 0 : i32
    return %arg1, %c0_i32, %c0_i32_0 : i32, i32, i32
  }
  func.func @transform_17(%arg0: i32, %arg1: i32) -> (i32, i32, i32) {
    %c0_i32 = arith.constant 0 : i32
    %c0_i32_0 = arith.constant 0 : i32
    %c0_i32_1 = arith.constant 0 : i32
    return %arg1, %c0_i32, %c0_i32_0 : i32, i32, i32
  }
  func.func @transform_18(%arg0: i32, %arg1: i32) -> (i32, i32, i32) {
    %c0_i32 = arith.constant 0 : i32
    %c0_i32_0 = arith.constant 0 : i32
    %c0_i32_1 = arith.constant 0 : i32
    return %arg1, %c0_i32, %c0_i32_0 : i32, i32, i32
  }
  func.func @transform_19(%arg0: i32, %arg1: i32) -> (i32, i32, i32) {
    %c0_i32 = arith.constant 0 : i32
    %c0_i32_0 = arith.constant 0 : i32
    %c0_i32_1 = arith.constant 0 : i32
    return %arg1, %c0_i32, %c0_i32_0 : i32, i32, i32
  }
  func.func @transform_20(%arg0: i32, %arg1: i32) -> (i32, i32, i32) {
    %c0_i32 = arith.constant 0 : i32
    %c0_i32_0 = arith.constant 0 : i32
    %c0_i32_1 = arith.constant 0 : i32
    return %arg0, %c0_i32, %c0_i32_0 : i32, i32, i32
  }
}

</mosaic_0001>

<bundles_post_ra>
// kernel: tpu_custom_call.1
= control target key start
LH: loop header
LB: loop body
LE: loop exit
PB: predicated region body
PF: predicated region fallthrough
CT: control target
= control target key end

     0   :  { %s6416_s0 = inlined_call_operand.vmem [shape: f32[2,8,128], index: 0, kind: input, shape index: {}]   ;;  %s6417_s1 = inlined_call_operand.hbm [shape: bf16[2,16,128], index: 1, kind: input, shape index: {}]   ;;  %s6418_s2 = inlined_call_operand.vmem [shape: f32[8,8], index: 2, kind: input, shape index: {}]   ;;  %s6419_s3 = inlined_call_operand.hbm [shape: f32[1,16], index: 3, kind: input, shape index: {}]   ;;  %s6420_s4 = inlined_call_operand.hbm [shape: bf16[2,128,384], index: 4, kind: input, shape index: {}]   ;;  %s6421_s5 = inlined_call_operand.hbm [shape: f32[2,1,384], index: 5, kind: input, shape index: {}]   ;;  %s6422_s6 = inlined_call_operand.hbm [shape: bf16[2,128,128], index: 6, kind: input, shape index: {}]   ;;  %s6423_s7 = inlined_call_operand.hbm [shape: f32[2,1,128], index: 7, kind: input, shape index: {}]   ;;  %s6424_s8 = inlined_call_operand.hbm [shape: bf16[2,128,128], index: 8, kind: input, shape index: {}]   ;;  %s6425_s9 = inlined_call_operand.hbm [shape: f32[2,1,128], index: 9, kind: input, shape index: {}]   ;;  %s6426_s10 = inlined_call_operand.hbm [shape: bf16[2,128,256], index: 10, kind: input, shape index: {}]   ;;  %s6427_s11 = inlined_call_operand.hbm [shape: f32[2,1,256], index: 11, kind: input, shape index: {}]   ;;  %s6428_s12 = inlined_call_operand.hbm [shape: bf16[2,128,128], index: 12, kind: input, shape index: {}]   ;;  %s6429_s13 = inlined_call_operand.hbm [shape: f32[2,1,128], index: 13, kind: input, shape index: {}]   ;;  %s6430_s14 = inlined_call_operand.hbm [shape: bf16[2,128,512], index: 14, kind: input, shape index: {}]   ;;  %s6431_s15 = inlined_call_operand.vmem [shape: f32[2,1,512], index: 15, kind: input, shape index: {}]   ;;  %s6432_s16 = inlined_call_operand.hbm [shape: bf16[2,512,128], index: 16, kind: input, shape index: {}]   ;;  %s6433_s17 = inlined_call_operand.hbm [shape: f32[2,1,128], index: 17, kind: input, shape index: {}]   ;;  %s6434_s18 = inlined_call_operand.vmem [shape: f32[2,3,128], index: 18, kind: input, shape index: {}]   ;;  %s6435_s19 = inlined_call_operand.vmem [shape: f32[2,3,128], index: 19, kind: input, shape index: {}]   ;;  %s6436_s20 = inlined_call_operand.hbm [shape: f32[2,8,128], index: 20, kind: output, shape index: {}]  }
   0x1   :  { %6452 = sst [smem:[#allocation35_spill]] %s6416_s0 }
   0x2   :  { %6453 = sst [smem:[#allocation36_spill]] %s6417_s1 }
   0x3   :  { %6454 = sst [smem:[#allocation37_spill]] %s6418_s2 }
   0x4   :  { %6455 = sst [smem:[#allocation38_spill]] %s6419_s3 }
   0x5   :  { %6456 = sst [smem:[#allocation39_spill]] %s6420_s4 }
   0x6   :  { %6457 = sst [smem:[#allocation40_spill]] %s6421_s5 }
   0x7   :  { %6458 = sst [smem:[#allocation41_spill]] %s6422_s6 }
   0x8   :  { %6459 = sst [smem:[#allocation42_spill]] %s6423_s7 }
   0x9   :  { %6460 = sst [smem:[#allocation43_spill]] %s6424_s8 }
   0xa   :  { %6461 = sst [smem:[#allocation44_spill]] %s6425_s9 }
   0xb   :  { %6462 = sst [smem:[#allocation45_spill]] %s6426_s10 }
   0xc   :  { %6463 = sst [smem:[#allocation46_spill]] %s6427_s11 }
   0xd   :  { %6464 = sst [smem:[#allocation47_spill]] %s6431_s15 }
   0xe   :  { %6465 = sst [smem:[#allocation48_spill]] %s6434_s18 }
   0xf   :  { %6466 = sst [smem:[#allocation49_spill]] %s6435_s19 }
  0x10   :  { %6467 = sst [smem:[#allocation50_spill]] %s6436_s20 }
  0x11   :  { %25 = vsyncpa [#allocation4], 0 }
  0x12   :  { %26 = vsyncpa [#allocation7], 0 }
  0x13   :  { %27 = vsyncpa [#allocation5], 0  ;;  %s5602_s1 = smov 0   ;;  %s5604_s22 = smov 0  }
  0x14   :  { %s5606_s23 = smov 0   ;;  %s5608_s24 = smov 0  }
  0x15   :  { %s5610_s2 = smov 0   ;;  %s5612_s25 = smov 0  }
  0x16 LB: > { %6468 = sst [smem:[#allocation26_spill]] %s5460_s22  ;;  %s5631_s3 = sadd.s32 4294967295, %s5476_s25   ;;  %s5476_s25 = sphi %s5612_s25, %s33_s25   ;;  %s5472_s2 = sphi %s5610_s2, %s6515_s2   ;;  %s5468_s24 = sphi %s5608_s24, %s6514_s24   ;;  %s5464_s23 = sphi %s5606_s23, %s6512_s23   ;;  %s5460_s22 = sphi %s5604_s22, %s6511_s22   ;;  %s5456_s1 = sphi %s5602_s1, %s6510_s1  }
  0x17   : > { %6469 = sst [smem:[#allocation27_spill]] %s5464_s23  ;;  %s42_s26 = sadd.s32 1, %s5472_s2 }
  0x18   : > { %6470 = sst [smem:[#allocation28_spill]] %s5468_s24  ;;  %p43_p0 = scmp.ge.s32.totalorder %s42_s26, 2 }
  0x19   : > { %6471 = sst [smem:[#allocation29_spill]] %s5476_s25  ;;  %s146_s27 = sadd.s32 1, %s5464_s23 }
  0x1a   : > { %6472 = sst [smem:[#allocation30_spill]] %s5631_s3  ;;  %p153_p1 = scmp.ne.s32.totalorder %s5464_s23, %s5460_s22 }
  0x1b   : > { %p154_p2 = scmp.eq.s32.totalorder %s5476_s25, 0  ;;  %s6517_s26 = smov (%p43_p0, %s42_s26), 0 }
  0x1c   : > { %6473 = sst [smem:[#allocation31_spill]] %s6517_s26  ;;  %p159_p4 = scmp.ne.s32.totalorder %s5460_s22, %s5456_s1 }
  0x1d   : > { %p5640_p3 = por %p154_p2, %p153_p1  ;;  %s143_s4 = ssub.s32 %s5472_s2, %s6517_s26 }
  0x1e   : > { %p160_p5 = scmp.eq.s32.totalorder %s5631_s3, 0  ;;  %p144_p6 = scmp.eq.s32.totalorder %s143_s4, 0 }
  0x1f   : > { %p4008_p7 = scmp.ge.s32.totalorder %s5476_s25, 1  ;;  %p586_p9 = scmp.lt.s32.totalorder %s5476_s25, 3 }
  0x20   : > { %p5651_p8 = por %p160_p5, %p159_p4  ;;  %s6480_s19 = sld [smem:[#allocation36_spill]] }
  0x21   : > { %s5657_s30 = scalar_select %p144_p6, %s5464_s23, %s146_s27  }
  0x22   : > { %s6475_s29 = scalar_select %p5651_p8, 1, 0 }
  0x23   : > { %6477 = sst [smem:[#allocation33_spill]] %s5657_s30  ;;  %p5659_p10 = pnand %p4008_p7, %p586_p9 }
  0x24   : > { %6476 = sst [smem:[#allocation32_spill]] %s6475_s29  ;;  %s5478_s4 = smov [#allocation3]  }
  0x25   : > { %s6478_s0 = scalar_select %p5659_p10, 1, 0 }
  0x26   : > { %s610_s1 = sshll.u32 %s6480_s19, 4  ;;  %p4794_p11 = pneg %p5659_p10  ;;  %s611_s1 = int_to_ptr.hbm [resolvable:$true] %s610_s1 }
  0x27   : > { %6479 = sst [smem:[#allocation34_spill]] %s6478_s0  ;;  %s612_s26 = sshll.u32 %s5478_s4, 4  ;;  %s613_s26 = int_to_ptr.vmem [resolvable:$true] %s612_s26 }
  0x28   : > { %p4795_p12 = pnand %p4794_p11, %p160_p5  ;;  %s6481_s30 = sld [smem:[#allocation38_spill]] }
  0x29   : > { %s5479_s24 = smov 64   ;;  %s5480_s29 = smov 4  }
  0x2a   : > { %4797 = dma.hbm_to_vmem [thread:$0]  (!%p4795_p12), %s611_s1, 256, %s613_s26, [#allocation4], %s5479_s24, %s5479_s24, %s5480_s29  }
  0x2b   : > { %s5481_s22 = smov [#allocation6]   ;;  %p4012_p13 = scmp.ge.s32.totalorder %s5476_s25, 2 }
  0x2c   : > { %s630_s20 = sshll.u32 %s5481_s22, 4  ;;  %s641_s19 = sand.u32 (!%p4012_p13), 1, %s5476_s25   ;;  %s631_s20 = int_to_ptr.vmem [resolvable:$true] %s630_s20 }
  0x2d   : > { %637 = sbr.rel (%p4012_p13) target bundleno = 102 (0x66), region = 32  ;;  %s5676_s21 = sand.u32 (!%p4012_p13), 1, %s5464_s23  }
  0x2e   : > { %s628_s15 = sshll.u32 %s6481_s30, 4  ;;  %s4750_s18 = smul.u32 (!%p4012_p13), 192, %s5676_s21  ;;  %s629_s15 = int_to_ptr.hbm [resolvable:$true] %s628_s15 }
  0x2f   : > { %4800 = dma.hbm_to_vmem [thread:$0]  (!%p4795_p12), %s629_s15, 16, %s631_s20, [#allocation7]  }
  0x30   : > { %s4751_s24 = smul.u32 (!%p4012_p13), 192, %s5472_s2  ;;  %s6482_s29 = sld [smem:[#allocation39_spill]] (!%p4012_p13) }
  0x31   : > { %s645_s30 = scalar_lea.vmem (!%p4012_p13), [#allocation8], %s4750_s18  ;;  %s4752_s27 = smul.u32 (!%p4012_p13), 3, %s5676_s21 }
  0x32   : > { %s653_s1 = sshll.u32 %s645_s30, 4  ;;  %s5684_s20 = scalar_lea.sflag [#allocation4], %s641_s19  ;;  %s654_s1 = int_to_ptr.vmem [resolvable:$true] %s653_s1 }
  0x33   : > { %s5482_s23 = smov 192   ;;  %s5483_s25 = smov 12  }
  0x34   : > { %s4753_s3 = smul.u32 3, %s5472_s2  ;;  %s667_s0 = scalar_lea.vmem [#allocation9], %s4752_s27 }
  0x35   : > { %s675_s26 = sshll.u32 %s667_s0, 4  ;;  %s5691_s18 = sshll.u32 %s5676_s21, 6  ;;  %s676_s26 = int_to_ptr.vmem [resolvable:$true] %s675_s26 }
  0x36   : > { %s650_s15 = scalar_lea.hbm %s6482_s29, %s4751_s24  ;;  %s6483_s5 = sld [smem:[#allocation40_spill]] }
  0x37   : > { %s651_s4 = sshll.u32 %s650_s15, 4  ;;  %s5697_s15 = sshll.u32 %s5472_s2, 6  ;;  %s652_s4 = int_to_ptr.hbm [resolvable:$true] %s651_s4 }
  0x38   : > { %4760 = dma.hbm_to_vmem [thread:$0]  (%p5640_p3), %s652_s4, 3072, %s654_s1, %s5684_s20, %s5482_s23, %s5482_s23, %s5483_s25  }
  0x39   : > { %s6484_s6 = sld [smem:[#allocation41_spill]]  ;;  %s686_s30 = scalar_lea.vmem [#allocation10], %s5691_s18 }
  0x3a   : > { %s694_s1 = sshll.u32 %s686_s30, 4  ;;  %s6448_s4 = smov 64   ;;  %s695_s1 = int_to_ptr.vmem [resolvable:$true] %s694_s1 }
  0x3b   : > { %s6450_s27 = smov 4   ;;  %s6485_s7 = sld [smem:[#allocation42_spill]] }
  0x3c   : > { %s671_s19 = scalar_lea.hbm %s6483_s5, %s4753_s3  ;;  %s6486_s8 = sld [smem:[#allocation43_spill]] }
  0x3d   : > { %s673_s29 = sshll.u32 %s671_s19, 4  ;;  %s707_s19 = scalar_lea.vmem [#allocation11], %s5676_s21  ;;  %s674_s29 = int_to_ptr.hbm [resolvable:$true] %s673_s29 }
  0x3e   : > { %4761 = dma.hbm_to_vmem [thread:$0]  (%p5640_p3), %s674_s29, 48, %s676_s26, %s5684_s20  }
  0x3f   : > { %s691_s0 = scalar_lea.hbm %s6484_s6, %s5697_s15  ;;  %s714_s29 = sshll.u32 %s707_s19, 4  ;;  %s715_s29 = int_to_ptr.vmem [resolvable:$true] %s714_s29 }
  0x40   : > { %s692_s3 = sshll.u32 %s691_s0, 4  ;;  %s6487_s9 = sld [smem:[#allocation44_spill]]  ;;  %s693_s3 = int_to_ptr.hbm [resolvable:$true] %s692_s3 }
  0x41   : > { %4762 = dma.hbm_to_vmem [thread:$0]  (%p5640_p3), %s693_s3, 1024, %s695_s1, %s5684_s20, %s6448_s4, %s6448_s4, %s6450_s27  }
  0x42   : > { %s710_s22 = scalar_lea.hbm %s6485_s7, %s5472_s2  ;;  %s730_s30 = scalar_lea.hbm %s6486_s8, %s5697_s15 }
  0x43   : > { %s712_s23 = sshll.u32 %s710_s22, 4  ;;  %s725_s1 = scalar_lea.vmem [#allocation12], %s5691_s18  ;;  %s713_s23 = int_to_ptr.hbm [resolvable:$true] %s712_s23 }
  0x44   : > { %4763 = dma.hbm_to_vmem [thread:$0]  (%p5640_p3), %s713_s23, 16, %s715_s29, %s5684_s20  }
  0x45   : > { %s733_s3 = sshll.u32 %s725_s1, 4  ;;  %s731_s26 = sshll.u32 %s730_s30, 4  ;;  %s734_s3 = int_to_ptr.vmem [resolvable:$true] %s733_s3  ;;  %s732_s26 = int_to_ptr.hbm [resolvable:$true] %s731_s26 }
  0x46   : > { %4764 = dma.hbm_to_vmem [thread:$0]  (%p5640_p3), %s732_s26, 1024, %s734_s3, %s5684_s20, %s6448_s4, %s6448_s4, %s6450_s27  }
  0x47   : > { %s749_s19 = scalar_lea.hbm %s6487_s9, %s5472_s2  ;;  %s746_s29 = scalar_lea.vmem [#allocation13], %s5676_s21 }
  0x48   : > { %s753_s23 = sshll.u32 %s746_s29, 4  ;;  %s751_s25 = sshll.u32 %s749_s19, 4  ;;  %s754_s23 = int_to_ptr.vmem [resolvable:$true] %s753_s23  ;;  %s752_s25 = int_to_ptr.hbm [resolvable:$true] %s751_s25 }
  0x49   : > { %s4020_s0 = sshll.u32 %s5676_s21, 7  ;;  %s4616_s30 = sshll.u32 %s5472_s2, 7 }
  0x4a   : > { %4765 = dma.hbm_to_vmem [thread:$0]  (%p5640_p3), %s752_s25, 16, %s754_s23, %s5684_s20  }
  0x4b   : > { %s6488_s10 = sld [smem:[#allocation45_spill]]  ;;  %s764_s26 = scalar_lea.vmem [#allocation14], %s4020_s0 }
  0x4c   : > { %s772_s24 = sshll.u32 %s764_s26, 4  ;;  %s4023_s19 = sshll.u32 %s5676_s21, 1  ;;  %s773_s24 = int_to_ptr.vmem [resolvable:$true] %s772_s24 }
  0x4d   : > { %s5486_s29 = smov 128   ;;  %s5487_s4 = smov 8  }
  0x4e   : > { %s4024_s23 = sshll.u32 %s5472_s2, 1  ;;  %s6489_s11 = sld [smem:[#allocation46_spill]] }
  0x4f   : > { %s5488_s5 = smov 256   ;;  %s5489_s25 = smov 16  }
  0x50   : > { %s897_s6 = scalar_lea.hbm %s6433_s17, %s5472_s2  ;;  %s894_s7 = scalar_lea.vmem [#allocation20], %s5676_s21 }
  0x51   : > { %s769_s3 = scalar_lea.hbm %s6488_s10, %s4616_s30  ;;  %s786_s30 = scalar_lea.vmem [#allocation15], %s4023_s19 }
  0x52   : > { %s770_s22 = sshll.u32 %s769_s3, 4  ;;  %s794_s1 = sshll.u32 %s786_s30, 4  ;;  %s771_s22 = int_to_ptr.hbm [resolvable:$true] %s770_s22  ;;  %s795_s1 = int_to_ptr.vmem [resolvable:$true] %s794_s1 }
  0x53   : > { %4766 = dma.hbm_to_vmem [thread:$0]  (%p5640_p3), %s771_s22, 2048, %s773_s24, %s5684_s20, %s5486_s29, %s5486_s29, %s5487_s4  }
  0x54   : > { %s790_s0 = scalar_lea.hbm %s6489_s11, %s4024_s23  ;;  %s810_s4 = scalar_lea.hbm %s6428_s12, %s5697_s15 }
  0x55   : > { %s792_s3 = sshll.u32 %s790_s0, 4  ;;  %s805_s24 = scalar_lea.vmem [#allocation16], %s5691_s18  ;;  %s793_s3 = int_to_ptr.hbm [resolvable:$true] %s792_s3 }
  0x56   : > { %4767 = dma.hbm_to_vmem [thread:$0]  (%p5640_p3), %s793_s3, 32, %s795_s1, %s5684_s20  }
  0x57   : > { %s813_s22 = sshll.u32 %s805_s24, 4  ;;  %s811_s29 = sshll.u32 %s810_s4, 4  ;;  %s814_s22 = int_to_ptr.vmem [resolvable:$true] %s813_s22  ;;  %s812_s29 = int_to_ptr.hbm [resolvable:$true] %s811_s29 }
  0x58   : > { %s6490_s19 = smov 4   ;;  %s6491_s23 = smov 64  }
  0x59   : > { %4768 = dma.hbm_to_vmem [thread:$0]  (%p5640_p3), %s812_s29, 1024, %s814_s22, %s5684_s20, %s6491_s23, %s6491_s23, %s6490_s19  }
  0x5a   : > { %s829_s0 = scalar_lea.hbm %s6429_s13, %s5472_s2  ;;  %s826_s30 = scalar_lea.vmem [#allocation17], %s5676_s21 }
  0x5b   : > { %s833_s27 = sshll.u32 %s826_s30, 4  ;;  %s831_s1 = sshll.u32 %s829_s0, 4  ;;  %s834_s27 = int_to_ptr.vmem [resolvable:$true] %s833_s27  ;;  %s832_s1 = int_to_ptr.hbm [resolvable:$true] %s831_s1 }
  0x5c   : > { %s4028_s18 = sshll.u32 %s5676_s21, 8  ;;  %s4618_s15 = sshll.u32 %s5472_s2, 8 }
  0x5d   : > { %4769 = dma.hbm_to_vmem [thread:$0]  (%p5640_p3), %s832_s1, 16, %s834_s27, %s5684_s20  }
  0x5e   : > { %s849_s4 = scalar_lea.hbm %s6430_s14, %s4618_s15  ;;  %s844_s24 = scalar_lea.vmem [#allocation18], %s4028_s18 }
  0x5f   : > { %s852_s22 = sshll.u32 %s844_s24, 4  ;;  %s850_s29 = sshll.u32 %s849_s4, 4  ;;  %s853_s22 = int_to_ptr.vmem [resolvable:$true] %s852_s22  ;;  %s851_s29 = int_to_ptr.hbm [resolvable:$true] %s850_s29 }
  0x60   : > { %4770 = dma.hbm_to_vmem [thread:$0]  (%p5640_p3), %s851_s29, 4096, %s853_s22, %s5684_s20, %s5488_s5, %s5488_s5, %s5489_s25  }
  0x61   : > { %s878_s27 = scalar_lea.hbm %s6432_s16, %s4618_s15  ;;  %s873_s1 = scalar_lea.vmem [#allocation19], %s4028_s18 }
  0x62   : > { %s881_s3 = sshll.u32 %s873_s1, 4  ;;  %s879_s26 = sshll.u32 %s878_s27, 4  ;;  %s882_s3 = int_to_ptr.vmem [resolvable:$true] %s881_s3  ;;  %s880_s26 = int_to_ptr.hbm [resolvable:$true] %s879_s26 }
  0x63   : > { %4771 = dma.hbm_to_vmem [thread:$0]  (%p5640_p3), %s880_s26, 4096, %s882_s3, %s5684_s20, %s6491_s23, %s6491_s23, %s6490_s19  }
  0x64   : > { %s901_s22 = sshll.u32 %s894_s7, 4  ;;  %s899_s29 = sshll.u32 %s897_s6, 4  ;;  %s902_s22 = int_to_ptr.vmem [resolvable:$true] %s901_s22  ;;  %s900_s29 = int_to_ptr.hbm [resolvable:$true] %s899_s29 }
  0x65   : > { %4772 = dma.hbm_to_vmem [thread:$0]  (%p5640_p3), %s900_s29, 16, %s902_s22, %s5684_s20  }
  0x66 PF: > { %924 = sbr.rel (%p5659_p10) target bundleno = 5032 (0x13a8), region = 100  ;;  %s6493_s15 = sld [smem:[#allocation30_spill]] (!%p5659_p10) }
  0x6b   : > { %5439 = dma.done.wait (%p160_p5), [#allocation4], 256  }
  0x6c   : > { %5441 = vsyncadd (%p160_p5), [#allocation4], 4294967040 }
  0x6d   : > { %5443 = dma.done.wait (%p160_p5), [#allocation7], 16  }
  0x6e   : > { %5445 = vsyncadd (%p160_p5), [#allocation7], 4294967280  ;;  %s6494_s6 = sld [smem:[#allocation26_spill]]  ;;  %s936_s28 = sand.u32 1, %s6493_s15  }
  0x6f   : > { %s937_s19 = scalar_lea.sflag [#allocation4], %s936_s28 }
  0x74   : > { %s5812_s21 = sand.u32 1, %s6494_s6  }
  0x75   : > { %s4754_s20 = smul.u32 192, %s5812_s21 }
  0x77   : > { %s5815_s23 = scalar_lea.vmem [#allocation8], %s4754_s20 }
  0x78   : > { %5447 = dma.done.wait (%p5651_p8), %s937_s19, 16528  }
  0x79   : > { %5449 = vsyncadd (%p5651_p8), %s937_s19, 4294950768  ;;  %s6496_s5 = sld [smem:[#allocation28_spill]]  ;;  %s4755_s25 = smul.u32 3, %s5812_s21 }
  0x7a   : > { %s4037_s0 = sshll.u32 %s5812_s21, 6  ;;  %s4039_s30 = sshll.u32 %s5812_s21, 7 }
  0x7b   : > { %s4040_s27 = sshll.u32 %s5812_s21, 1  ;;  %s4042_s1 = sshll.u32 %s5812_s21, 8 }
  0x7c   : > { %s6498_s6 = sld [smem:[#allocation48_spill]]  ;;  %s5846_s9 = scalar_lea.vmem [#allocation9], %s4755_s25 }
  0x7d   : > { %s6499_s19 = sld [smem:[#allocation49_spill]]  ;;  %s969_s10 = scalar_lea.vmem [#allocation11], %s5812_s21 }
  0x7e   : > { %s5851_s11 = scalar_lea.vmem [#allocation12], %s4037_s0  ;;  %s5854_s24 = scalar_lea.vmem [#allocation14], %s4039_s30 }
  0x7f   : > { %p1189_p0 = scmp.lt.s32.totalorder %s6496_s5, 1  ;;  %s5856_s22 = scalar_lea.vmem [#allocation15], %s4040_s27 }
  0x80   : > { %s5858_s18 = scalar_lea.vmem [#allocation16], %s4037_s0  ;;  %s1027_s15 = scalar_lea.vmem [#allocation17], %s5812_s21 }
  0x81   : > { %s1190_s3 = scalar_select %p1189_p0, %s6496_s5, 1 }
  0x82   : > { %s5863_s28 = scalar_lea.vmem [#allocation19], %s4042_s1  ;;  %s1056_s20 = scalar_lea.vmem [#allocation20], %s5812_s21 }
  0x83   : > { %s5828_s26 = sshll.u32 %s1190_s3, 2  ;;  %s5848_s3 = scalar_lea.vmem [#allocation10], %s4037_s0 }
  0x84   : > { %s5838_s7 = scalar_lea.vmem %s6498_s6, %s5828_s26  ;;  %s5844_s8 = scalar_lea.vmem %s6499_s19, %s5828_s26 }
  0x85   : > { %s5861_s6 = scalar_lea.vmem [#allocation18], %s4042_s1  ;;  %p4047_p1 = scmp.ne.s32.totalorder %s6496_s5, 0 }
  0x86   : > { %s6500_s29 = sld [smem:[#allocation35_spill]] (!%p4047_p1) }
  0x87   : > { %1206 = sbr.rel (%p4047_p1) target bundleno = 143 (0x8f), region = 164 }
  0x8c   : > { %v1207_v0 = vld [vmem:[%s6500_s29] sm:$0xff]  ;;  %v1208_v1 = vld [vmem:[%s6500_s29 + $0x8] sm:$0xff] }
  0x8d   : > { %1209 = vst [vmem:[#allocation2] sm:$0xff] %v1207_v0 }
  0x8e   : > { %1210 = vst [vmem:[#allocation2 + $0x8] sm:$0xff] %v1208_v1 }
  0x8f PF: > { %v4134_v2 = vld [vmem:[%s5815_s23 + $0xa8] sm:$0xf]  ;;  %v4644_v3 = vld [vmem:[%s5815_s23 + $0xb0] sm:$0xf0]  ;;  %v4643_v4 = vld [vmem:[%s5815_s23 + $0xac] sm:$0xf] }
  0x90   : > { %v4135_v5 = vor.u32 %v4644_v3, %v4134_v2  ;;  %v4136_v6 = vld [vmem:[%s5815_s23 + $0xb4] sm:$0xf0]  ;;  %v4122_v7 = vld [vmem:[%s5815_s23 + $0x90] sm:$0xf]  ;;  %v4641_v8 = vld [vmem:[%s5815_s23 + $0x98] sm:$0xf0] }
  0x91   : > { %v4139_v9 = vor.u32 %v4643_v4, %v4136_v6  ;;  %v4640_v10 = vld [vmem:[%s5815_s23 + $0x94] sm:$0xf]  ;;  %v4124_v11 = vld [vmem:[%s5815_s23 + $0x9c] sm:$0xf0]  ;;  %v4123_v12 = vor.u32 %v4641_v8, %v4122_v7  ;;  %v4110_v14 = vld [vmem:[%s5815_s23 + $0x78] sm:$0xf] }
  0x92   : > { %1387 = vmatpush.bf16.msra.mxu0 %v4135_v5  ;;  %v4127_v13 = vor.u32 %v4640_v10, %v4124_v11  ;;  %v4638_v15 = vld [vmem:[%s5815_s23 + $0x80] sm:$0xf0]  ;;  %v4637_v16 = vld [vmem:[%s5815_s23 + $0x7c] sm:$0xf]  ;;  %v4112_v17 = vld [vmem:[%s5815_s23 + $0x84] sm:$0xf0] }
  0x93   : > { %1401 = vmatpush.bf16.msra.mxu1 %v4139_v9  ;;  %v4111_v18 = vor.u32 %v4638_v15, %v4110_v14  ;;  %v4115_v19 = vor.u32 %v4637_v16, %v4112_v17  ;;  %v4098_v20 = vld [vmem:[%s5815_s23 + $0x60] sm:$0xf]  ;;  %v4635_v21 = vld [vmem:[%s5815_s23 + $0x68] sm:$0xf0]  ;;  %v4634_v22 = vld [vmem:[%s5815_s23 + $0x64] sm:$0xf] }
  0x94   : > { %v4100_v23 = vld [vmem:[%s5815_s23 + $0x6c] sm:$0xf0]  ;;  %v4086_v24 = vld [vmem:[%s5815_s23 + $0x48] sm:$0xf]  ;;  %v4099_v25 = vor.u32 %v4635_v21, %v4098_v20  ;;  %v4632_v26 = vld [vmem:[%s5815_s23 + $0x50] sm:$0xf0] }
  0x95   : > { %v4631_v27 = vld [vmem:[%s5815_s23 + $0x4c] sm:$0xf]  ;;  %v4103_v28 = vor.u32 %v4634_v22, %v4100_v23  ;;  %v4088_v29 = vld [vmem:[%s5815_s23 + $0x54] sm:$0xf0]  ;;  %v4087_v30 = vor.u32 %v4632_v26, %v4086_v24  ;;  %v4074_v32 = vld [vmem:[%s5815_s23 + $0x30] sm:$0xf] }
  0x96   : > { %1388 = vmatpush.bf16.msra.mxu0 %v4123_v12  ;;  %v4091_v31 = vor.u32 %v4631_v27, %v4088_v29  ;;  %v4629_v33 = vld [vmem:[%s5815_s23 + $0x38] sm:$0xf0]  ;;  %v4628_v34 = vld [vmem:[%s5815_s23 + $0x34] sm:$0xf]  ;;  %v4076_v35 = vld [vmem:[%s5815_s23 + $0x3c] sm:$0xf0] }
  0x97   : > { %1402 = vmatpush.bf16.msra.mxu1 %v4127_v13  ;;  %v4075_v36 = vor.u32 %v4629_v33, %v4074_v32  ;;  %v4079_v37 = vor.u32 %v4628_v34, %v4076_v35  ;;  %v4062_v38 = vld [vmem:[%s5815_s23 + $0x18] sm:$0xf]  ;;  %v4626_v39 = vld [vmem:[%s5815_s23 + $0x20] sm:$0xf0]  ;;  %v4625_v40 = vld [vmem:[%s5815_s23 + $0x1c] sm:$0xf] }
  0x98   : > { %v4064_v41 = vld [vmem:[%s5815_s23 + $0x24] sm:$0xf0]  ;;  %v4063_v42 = vor.u32 %v4626_v39, %v4062_v38  ;;  %v4050_v44 = vld [vmem:[%s5815_s23] sm:$0xf]  ;;  %v4623_v45 = vld [vmem:[%s5815_s23 + $0x8] sm:$0xf0] }
  0x99   : > { %v4067_v43 = vor.u32 %v4625_v40, %v4064_v41  ;;  %v4622_v46 = vld [vmem:[%s5815_s23 + $0x4] sm:$0xf]  ;;  %v4052_v47 = vld [vmem:[%s5815_s23 + $0xc] sm:$0xf0]  ;;  %v4051_v48 = vor.u32 %v4623_v45, %v4050_v44  ;;  %v4645_v57 = vld [vmem:[%s5815_s23 + $0xb8] sm:$0xf0] }
  0x9a   : > { %1389 = vmatpush.bf16.msra.mxu0 %v4111_v18  ;;  %v5905_v49 = vld [vmem:[#allocation2] sm:$0xff]  ;;  %v5907_v50 = vld [vmem:[#allocation2 + $0x8] sm:$0xff]  ;;  %v4055_v51 = vor.u32 %v4622_v46, %v4052_v47  ;;  %v4142_v56 = vld [vmem:[%s5815_s23 + $0xb0] sm:$0xf]  ;;  %vm1438_vm0 = vcmask 261120   ;;  %s6501_s0 = sld [smem:[#allocation37_spill]] }
  0x9b   : > { %1403 = vmatpush.bf16.msra.mxu1 %v4115_v19  ;;  %v5911_v52 = vpack.c.bf16 %v5907_v50, %v5905_v49  ;;  %v5916_v53 = vld [vmem:[%s5846_s9] sm:$0x7]  ;;  %v4130_v58 = vld [vmem:[%s5815_s23 + $0x98] sm:$0xf]  ;;  %v4143_v59 = vor.u32 %v4645_v57, %v4142_v56  ;;  %v4639_v3 = vld [vmem:[%s5815_s23 + $0x88] sm:$0xf0] }
  0x9c   : > { %v1253_v54 = vperm.slane %v5916_v53, 0  ;;  %v1254_v55 = vperm.slane %v5916_v53, 1  ;;  %v4642_v60 = vld [vmem:[%s5815_s23 + $0xa0] sm:$0xf0]  ;;  %v4118_v2 = vld [vmem:[%s5815_s23 + $0x80] sm:$0xf] }
  0x9d   : > { %1415 = vmatpush.bf16.msra.mxu2 %v4143_v59  ;;  %v4131_v0 = vor.u32 %v4642_v60, %v4130_v58  ;;  %v4119_v6 = vor.u32 %v4639_v3, %v4118_v2  ;;  %v4106_v10 = vld [vmem:[%s5815_s23 + $0x68] sm:$0xf]  ;;  %v4636_v11 = vld [vmem:[%s5815_s23 + $0x70] sm:$0xf0]  ;;  %s5490_s9 = smov 96   ;;  %vm1477_vm1 = vcmask 64512  }
  0x9e   : > { %1390 = vmatpush.bf16.msra.mxu0 %v4099_v25  ;;  %v4107_v16 = vor.u32 %v4636_v11, %v4106_v10  ;;  %v4094_v19 = vld [vmem:[%s5815_s23 + $0x50] sm:$0xf]  ;;  %v4633_v20 = vld [vmem:[%s5815_s23 + $0x58] sm:$0xf0]  ;;  %v4082_v27 = vld [vmem:[%s5815_s23 + $0x38] sm:$0xf] }
  0x9f   : > { %1404 = vmatpush.bf16.msra.mxu1 %v4103_v28  ;;  %v4095_v23 = vor.u32 %v4633_v20, %v4094_v19  ;;  %v4630_v28 = vld [vmem:[%s5815_s23 + $0x40] sm:$0xf0]  ;;  %v4070_v32 = vld [vmem:[%s5815_s23 + $0x20] sm:$0xf]  ;;  %v4627_v33 = vld [vmem:[%s5815_s23 + $0x28] sm:$0xf0] }
  0xa0   : > { %v4071_v35 = vor.u32 %v4627_v33, %v4070_v32  ;;  %v5964_v46 = vld [vmem:[%s6501_s0] sm:$0xff]  ;;  %vm1505_vm2 = vcmask 1043456   ;;  %s5491_s27 = smov 64   ;;  %s5492_s1 = smov 32   ;;  %vm2393_vm10 = vcmask 130048  }
  0xa1   : > { %1416 = vmatpush.bf16.msra.mxu2 %v4131_v0  ;;  %s6503_s4 = sld [smem:[#allocation47_spill]] }
  0xa2   : > { %1391 = vmatpush.bf16.msra.mxu0 %v4087_v30 }
  0xa3   : > { %1405 = vmatpush.bf16.msra.mxu1 %v4091_v31  ;;  %v4083_v31 = vor.u32 %v4630_v28, %v4082_v27 }
  0xa5   : > { %1417 = vmatpush.bf16.msra.mxu2 %v4119_v6 }
  0xa6   : > { %1392 = vmatpush.bf16.msra.mxu0 %v4075_v36  ;;  %v4058_v36 = vld [vmem:[%s5815_s23 + $0x8] sm:$0xf] }
  0xa7   : > { %1406 = vmatpush.bf16.msra.mxu1 %v4079_v37  ;;  %v4624_v37 = vld [vmem:[%s5815_s23 + $0x10] sm:$0xf0] }
  0xa8   : > { %v4059_v39 = vor.u32 %v4624_v37, %v4058_v36 }
  0xa9   : > { %1418 = vmatpush.bf16.msra.mxu2 %v4107_v16 }
  0xaa   : > { %1393 = vmatpush.bf16.msra.mxu0 %v4063_v42 }
  0xab   : > { %1407 = vmatpush.bf16.msra.mxu1 %v4067_v43 }
  0xad   : > { %1419 = vmatpush.bf16.msra.mxu2 %v4095_v23 }
  0xae   : > { %1394 = vmatpush.bf16.msra.mxu0 %v4051_v48 }
  0xaf   : > { %1408 = vmatpush.bf16.msra.mxu1 %v4055_v51 }
  0xb1   : > { %1395 = vmatmul.bf16.vlgmr.msra.gmra.mxu0 %v5911_v52  ;;  %1420 = vmatpush.bf16.msra.mxu2 %v4083_v31 }
  0xb2   : > { %1409 = vmatmul.bf16.vlgmr.msra.gmra.mxu1 %v5911_v52 }
  0xb5   : > { %1421 = vmatpush.bf16.msra.mxu2 %v4071_v35 }
  0xb9   : > { %1422 = vmatpush.bf16.msra.mxu2 %v4059_v39 }
  0xbc   : > { %1423 = vmatmul.bf16.vlgmr.msra.gmra.mxu2 %v5911_v52 }
 0x12e   : > { %v1396_v61 = vpop.f32.mrf.mxu0 }
 0x12f   : > { %v1397_v62 = vadd.f32 %v1396_v61, %v1253_v54  ;;  %v1410_v63 = vpop.f32.mrf.mxu1 }
 0x130   : > { %v1411_v1 = vadd.f32 %v1410_v63, %v1254_v55 }
 0x131   : > { %v1429_v4 = vmul.f32 0.17677669, %v1397_v62 }
 0x132   : > { %v1434_v5 = vpack.c.bf16 %v1411_v1, %v1411_v1 }
 0x133   : > { %v1432_v7 = vpack.c.bf16 %v1429_v4, %v1429_v4 }
 0x134   : > { %v1552_v8 = vunpack.c.l.b16 %v1434_v5  ;;  %v1443_v9 = vsel %vm1438_vm0, %v1434_v5, 0 }
 0x135   : > { %1452 = vmatpush.bf16.xpose.msra.mxu3 %v1443_v9  ;;  %v1547_v17 = vunpack.c.l.b16 %v1432_v7 }
 0x136   : > { %v5929_v12 = vpack.c.b16 %v1552_v8, %v1552_v8  ;;  %v1398_v13 = vpop.f32.mrf.mxu0 }
 0x137   : > { %v1399_v14 = vadd.f32 %v1398_v13, %v1253_v54  ;;  %v1412_v15 = vpop.f32.mrf.mxu1  ;;  %v5937_v26 = vpack.c.b16 %v1547_v17, %v1547_v17  ;;  %v1255_v54 = vperm.slane %v5916_v53, 2 }
 0x138   : > { %v1413_v18 = vadd.f32 %v1412_v15, %v1254_v55  ;;  %1554 = vrot.lane.b32.xlu0 %v5929_v12, %s5490_s9 }
 0x139   : > { %v1430_v21 = vmul.f32 0.17677669, %v1399_v14 }
 0x13a   : > { %v1435_v22 = vpack.c.bf16 %v1413_v18, %v1413_v18 }
 0x13b   : > { %v1433_v29 = vpack.c.bf16 %v1430_v21, %v1430_v21 }
 0x13c   : > { %v1581_v24 = vunpack.c.l.b16 %v1435_v22  ;;  %4144 = vmatmul.msk.bf16.vlgmr.msra.gmra.mxu3 %vm1438_vm0, %v1432_v7  ;;  %v1462_v25 = vsel %vm1438_vm0, %v1435_v22, 0 }
 0x13d   : > { %1471 = vmatpush.bf16.xpose.msrb.mxu3 %v1462_v25  ;;  %v1576_v34 = vunpack.c.l.b16 %v1433_v29 }
 0x13e   : > { %v5941_v30 = vpack.c.b16 %v1581_v24, %v1581_v24 }
 0x13f   : > { %v5951_v38 = vpack.c.b16 %v1576_v34, %v1576_v34  ;;  %v1424_v56 = vpop.f32.mrf.mxu2 }
 0x140   : > { %1583 = vrot.lane.b32.xlu1 %v5941_v30, %s5490_s9  ;;  %1549 = vrot.lane.b32.xlu0 %v5937_v26, %s5490_s9  ;;  %v1425_v57 = vadd.f32 %v1424_v56, %v1255_v54 }
 0x142   : > { %v1436_v58 = vpack.c.bf16 %v1425_v57, %v1425_v57 }
 0x144   : > { %v1507_v59 = vsel %vm1505_vm2, %v1436_v58, 0  ;;  %v1629_v7 = vunpack.c.l.b16 %v1436_v58  ;;  %v4649_v58 = vld [vmem:[%s5848_s3 + $0x18] sm:$0xff] }
 0x145   : > { %1516 = vmatpush.bf16.msra.mxu3 %v1507_v59 }
 0x146   : > { %v5974_v10 = vpack.c.b16 %v1629_v7, %v1629_v7 }
 0x147   : > { %v1426_v0 = vpop.f32.mrf.mxu2 }
 0x148   : > { %1578 = vrot.lane.b32.xlu1 %v5951_v38, %s5490_s9  ;;  %v1427_v15 = vadd.f32 %v1426_v0, %v1255_v54 }
 0x14a   : > { %v1437_v16 = vpack.c.bf16 %v1427_v15, %v1427_v15  ;;  %v4646_v15 = vld [vmem:[%s5848_s3] sm:$0xff] }
 0x14c   : > { %4145 = vmatmul.msk.bf16.vlgmr.msrb.gmra.mxu3 %vm1438_vm0, %v1433_v29  ;;  %v1526_v20 = vsel %vm1505_vm2, %v1437_v16, 0 }
 0x14d   : > { %1535 = vmatpush.bf16.msrb.mxu0 %v1526_v20 }
 0x1aa   : > { %v1555_v40 = vpop.permute.xlu0 %1554 }
 0x1ab   : > { %v1560_v41 = vsel %vm1438_vm0, %v1555_v40, 0 }
 0x1ac   : > { %1569 = vmatpush.bf16.xpose.msrb.mxu1 %v1560_v41 }
 0x1b2   : > { %v1584_v42 = vpop.permute.xlu1 %1583  ;;  %v1550_v43 = vpop.permute.xlu0 %1549 }
 0x1b3   : > { %4148 = vmatmul.msk.bf16.vlgmr.msrb.gmra.mxu1 %vm1438_vm0, %v1550_v43  ;;  %v1589_v44 = vsel %vm1438_vm0, %v1584_v42, 0 }
 0x1b4   : > { %1598 = vmatpush.bf16.xpose.msrb.mxu2 %v1589_v44  ;;  %1702 = vmatpush.bf16.msra.mxu1 %v4649_v58 }
 0x1ba   : > { %v1579_v45 = vpop.permute.xlu1 %1578 }
 0x1bb   : > { %4149 = vmatmul.msk.bf16.vlgmr.msrb.gmra.mxu2 %vm1438_vm0, %v1579_v45  ;;  %v1653_v45 = vunpack.c.l.b16 %v1437_v16 }
 0x1bf   : > { %v1454_v47 = vpop.f32.mrf.mxu3 }
 0x1c0   : > { %v1455_v48 = vadd.f32 %v1454_v47, %v5964_v46  ;;  %v5994_v47 = vpack.c.b16 %v1653_v45, %v1653_v45 }
 0x1c2   : > { %v1478_v51 = vsel %vm1477_vm1, %v1455_v48, -inf }
 0x1c3   : > { %1479 = vmax.xlane.f32.xlu2 %v1478_v51 }
 0x1c7   : > { %v1456_v52 = vpop.f32.mrf.mxu3 }
 0x1cf   : > { %v1473_v55 = vpop.f32.mrf.mxu3 }
 0x1d0   : > { %v1474_v13 = vadd.f32 %v1473_v55, %v5964_v46 }
 0x1d2   : > { %v1481_v14 = vsel %vm1477_vm1, %v1474_v13, -inf }
 0x1d7   : > { %v1475_v60 = vpop.f32.mrf.mxu3 }
 0x230   : > { %v1571_v61 = vpop.f32.mrf.mxu1 }
 0x231   : > { %v1572_v62 = vadd.f32 %v1571_v61, %v5964_v46  ;;  %v4648_v61 = vld [vmem:[%s5848_s3 + $0x10] sm:$0xff] }
 0x232   : > { %1703 = vmatpush.bf16.msra.mxu1 %v4648_v61 }
 0x233   : > { %v1604_v63 = vsel %vm1477_vm1, %v1572_v62, -inf }
 0x234   : > { %1605 = vmax.xlane.f32.xlu2 %v1604_v63 }
 0x236   : > { %v1480_v1 = vpop.xlane.xlu2 %1479 }
 0x237   : > { %v1484_v2 = vsub.f32 %v1455_v48, %v1480_v1 }
 0x238   : > { %v1573_v3 = vpop.f32.mrf.mxu1 }
 0x239   : > { %v1486_v53 = vmul.f32 1.442695, %v1484_v2 }
 0x23b   : > { %4884 = vpow2.f32 %v1486_v53 }
 0x23e   : > { %v1600_v4 = vpop.f32.mrf.mxu2 }
 0x23f   : > { %v1601_v8 = vadd.f32 %v1600_v4, %v5964_v46 }
 0x241   : > { %v4885_v5 = vpop.eup %4884  ;;  %v1607_v11 = vsel %vm1477_vm1, %v1601_v8, -inf }
 0x242   : > { %v1490_v6 = vsel %vm1477_vm1, %v4885_v5, 0.0 }
 0x243   : > { %1491 = vadd.xlane.f32.xlu0 %v1490_v6 }
 0x246   : > { %v1602_v9 = vpop.f32.mrf.mxu2 }
 0x24b   : > { %1608 = vmax.xlane.f32.xlu0 %v1607_v11 }
 0x24c   : > { %1631 = vrot.lane.b32.xlu2 %v5974_v10, %s5490_s9 }
 0x254   : > { %1741 = vrot.lane.b32.xlu2 %v5929_v12, %s5491_s27 }
 0x25c   : > { %1739 = vrot.lane.b32.xlu2 %v5937_v26, %s5491_s27 }
 0x285   : > { %1482 = vmax.xlane.f32.xlu2 %v1481_v14 }
 0x2a7   : > { %v1606_v17 = vpop.xlane.xlu2 %1605 }
 0x2a8   : > { %v1610_v18 = vsub.f32 %v1572_v62, %v1606_v17 }
 0x2aa   : > { %v1612_v19 = vmul.f32 1.442695, %v1610_v18 }
 0x2ac   : > { %4886 = vpow2.f32 %v1612_v19 }
 0x2af   : > { %v1632_v21 = vpop.permute.xlu2 %1631 }
 0x2b0   : > { %v1637_v22 = vsel %vm1505_vm2, %v1632_v21, 0 }
 0x2b1   : > { %1646 = vmatpush.bf16.msrb.mxu3 %v1637_v22 }
 0x2b2   : > { %v4887_v23 = vpop.eup %4886 }
 0x2b3   : > { %v1616_v24 = vsel %vm1477_vm1, %v4887_v23, 0.0 }
 0x2b4   : > { %1617 = vadd.xlane.f32.xlu1 %v1616_v24 }
 0x2b6   : > { %v1492_v25 = vpop.xlane.xlu0 %1491 }
 0x2b7   : > { %4888 = vrcp.f32 %v1492_v25  ;;  %v1742_v31 = vpop.permute.xlu2 %1741 }
 0x2b8   : > { %v1747_v35 = vsel %vm1438_vm0, %v1742_v31, 0 }
 0x2bd   : > { %v4889_v27 = vpop.eup %4888 }
 0x2be   : > { %v1498_v28 = vmul.f32 %v4889_v27, %v4885_v5  ;;  %v1609_v29 = vpop.xlane.xlu0 %1608 }
 0x2bf   : > { %v1611_v32 = vsub.f32 %v1601_v8, %v1609_v29  ;;  %v1740_v39 = vpop.permute.xlu2 %1739  ;;  %v4647_v8 = vld [vmem:[%s5848_s3 + $0x8] sm:$0xff] }
 0x2c0   : > { %v1500_v33 = vpack.c.bf16 %v1498_v28, %v1498_v28  ;;  %1731 = vmatpush.bf16.msra.mxu2 %v4647_v8 }
 0x2c1   : > { %v1614_v34 = vmul.f32 1.442695, %v1611_v32 }
 0x2c2   : > { %4146 = vmatmul.msk.bf16.vlgmr.msra.gmra.mxu3 %vm1477_vm1, %v1500_v33 }
 0x2c3   : > { %4890 = vpow2.f32 %v1614_v34  ;;  %1756 = vmatpush.bf16.xpose.msra.mxu3 %v1747_v35 }
 0x2c4   : > { %1732 = vmatpush.bf16.msra.mxu2 %v4646_v15 }
 0x2c9   : > { %v4891_v36 = vpop.eup %4890 }
 0x2ca   : > { %v1619_v37 = vsel %vm1477_vm1, %v4891_v36, 0.0 }
 0x2cb   : > { %1620 = vadd.xlane.f32.xlu0 %v1619_v37 }
 0x2df   : > { %1764 = vrot.lane.b32.xlu0 %v5941_v30, %s5491_s27 }
 0x2f8   : > { %v1483_v40 = vpop.xlane.xlu2 %1482 }
 0x2f9   : > { %v1485_v41 = vsub.f32 %v1474_v13, %v1483_v40 }
 0x2fb   : > { %v1488_v42 = vmul.f32 1.442695, %v1485_v41 }
 0x2fd   : > { %4892 = vpow2.f32 %v1488_v42 }
 0x303   : > { %v4893_v43 = vpop.eup %4892 }
 0x304   : > { %v1493_v44 = vsel %vm1477_vm1, %v4893_v43, 0.0 }
 0x305   : > { %1494 = vadd.xlane.f32.xlu1 %v1493_v44 }
 0x31e   : > { %1655 = vrot.lane.b32.xlu1 %v5994_v47, %s5490_s9 }
 0x326   : > { %1762 = vrot.lane.b32.xlu1 %v5951_v38, %s5491_s27 }
 0x327   : > { %v1618_v48 = vpop.xlane.xlu1 %1617 }
 0x328   : > { %4894 = vrcp.f32 %v1618_v48 }
 0x32e   : > { %v4895_v51 = vpop.eup %4894  ;;  %1809 = vrot.lane.b32.xlu1 %v5974_v10, %s5491_s27 }
 0x32f   : > { %v1624_v52 = vmul.f32 %v4895_v51, %v4887_v23 }
 0x331   : > { %v1626_v54 = vpack.c.bf16 %v1624_v52, %v1624_v52 }
 0x333   : > { %4150 = vmatmul.msk.bf16.vlgmr.msrb.gmra.mxu3 %vm1477_vm1, %v1626_v54 }
 0x336   : > { %1912 = vrot.lane.b32.xlu1 %v5941_v30, %s5492_s1 }
 0x33e   : > { %1887 = vrot.lane.b32.xlu1 %v5937_v26, %s5492_s1  ;;  %v1621_v30 = vpop.xlane.xlu0 %1620 }
 0x343   : > { %4170 = vmatmul.msk.bf16.vlgmr.msra.gmra.mxu3 %vm1438_vm0, %v1740_v39 }
 0x345   : > { %v1518_v55 = vpop.f32.mrf.mxu3 }
 0x346   : > { %1910 = vrot.lane.b32.xlu1 %v5951_v38, %s5492_s1 }
 0x34d   : > { %v1520_v56 = vpop.f32.mrf.mxu3 }
 0x351   : > { %v1765_v0 = vpop.permute.xlu0 %1764 }
 0x352   : > { %v1770_v2 = vsel %vm1438_vm0, %v1765_v0, 0 }
 0x378   : > { %v1495_v57 = vpop.xlane.xlu1 %1494 }
 0x379   : > { %4896 = vrcp.f32 %v1495_v57 }
 0x37a   : > { %4898 = vrcp.f32 %v1621_v30 }
 0x37f   : > { %v4897_v59 = vpop.eup %4896 }
 0x380   : > { %v1499_v60 = vmul.f32 %v4897_v59, %v4893_v43  ;;  %v4899_v26 = vpop.eup %4898 }
 0x381   : > { %v1625_v63 = vmul.f32 %v4899_v26, %v4891_v36 }
 0x382   : > { %v1501_v62 = vpack.c.bf16 %v1499_v60, %v1499_v60 }
 0x383   : > { %v1627_v3 = vpack.c.bf16 %v1625_v63, %v1625_v63 }
 0x384   : > { %4147 = vmatmul.msk.bf16.vlgmr.msrb.gmra.mxu0 %vm1477_vm1, %v1501_v62 }
 0x390   : > { %v1656_v1 = vpop.permute.xlu1 %1655 }
 0x391   : > { %v1661_v38 = vsel %vm1505_vm2, %v1656_v1, 0 }
 0x392   : > { %1670 = vmatpush.bf16.msra.mxu0 %v1661_v38 }
 0x395   : > { %4151 = vmatmul.msk.bf16.vlgmr.msra.gmra.mxu0 %vm1477_vm1, %v1627_v3 }
 0x396   : > { %1779 = vmatpush.bf16.xpose.msrb.mxu0 %v1770_v2 }
 0x398   : > { %v1763_v53 = vpop.permute.xlu1 %1762 }
 0x3a0   : > { %v1810_v4 = vpop.permute.xlu1 %1809 }
 0x3a1   : > { %v1815_v5 = vsel %vm1505_vm2, %v1810_v4, 0 }
 0x3a2   : > { %1824 = vmatpush.bf16.msrb.mxu1 %v1815_v5 }
 0x3a5   : > { %4171 = vmatmul.msk.bf16.vlgmr.msrb.gmra.mxu0 %vm1438_vm0, %v1763_v53 }
 0x3a8   : > { %v1913_v19 = vpop.permute.xlu1 %1912 }
 0x3a9   : > { %v1918_v22 = vsel %vm1438_vm0, %v1913_v19, 0 }
 0x3b6   : > { %v1648_v6 = vpop.f32.mrf.mxu3 }
 0x3be   : > { %v1650_v7 = vpop.f32.mrf.mxu3 }
 0x3c6   : > { %v1758_v9 = vpop.f32.mrf.mxu3 }
 0x3c7   : > { %v1759_v11 = vadd.f32 %v1758_v9, %v5964_v46 }
 0x3c9   : > { %v1785_v13 = vsel %vm1477_vm1, %v1759_v11, -inf }
 0x3ca   : > { %1786 = vmax.xlane.f32.xlu0 %v1785_v13 }
 0x3ce   : > { %v1760_v14 = vpop.f32.mrf.mxu3 }
 0x3cf   : > { %v4651_v14 = vld [vmem:[%s5848_s3 + $0x28] sm:$0xff] }
 0x3d0   : > { %1877 = vmatpush.bf16.msrb.mxu3 %v4651_v14  ;;  %v4667_v14 = vld [vmem:[%s5854_s24 + $0x24] sm:$0xf0] }
 0x3de   : > { %1830 = vrot.lane.b32.xlu0 %v5994_v47, %s5491_s27 }
 0x401   : > { %v1537_v16 = vpop.f32.mrf.mxu0 }
 0x402   : > { %v1541_v17 = vpack.c.bf16 %v1537_v16, %v1518_v55 }
 0x404   : > { %4169 = vmatmul.msk.bf16.vlgmr.msra.gmra.mxu2 %vm1438_vm0, %v1541_v17  ;;  %v4650_v17 = vld [vmem:[%s5848_s3 + $0x20] sm:$0xff] }
 0x405   : > { %1878 = vmatpush.bf16.msrb.mxu3 %v4650_v17 }
 0x409   : > { %v1539_v18 = vpop.f32.mrf.mxu0 }
 0x412   : > { %v1672_v20 = vpop.f32.mrf.mxu0 }
 0x413   : > { %v1676_v21 = vpack.c.bf16 %v1672_v20, %v1648_v6 }
 0x415   : > { %4160 = vmatmul.msk.bf16.vlgmr.msra.gmra.mxu1 %vm1438_vm0, %v1676_v21 }
 0x416   : > { %1927 = vmatpush.bf16.xpose.msra.mxu1 %v1918_v22 }
 0x41a   : > { %v1674_v23 = vpop.f32.mrf.mxu0 }
 0x422   : > { %v1781_v24 = vpop.f32.mrf.mxu0 }
 0x423   : > { %v1782_v35 = vadd.f32 %v1781_v24, %v5964_v46 }
 0x425   : > { %v1788_v36 = vsel %vm1477_vm1, %v1782_v35, -inf }
 0x42a   : > { %v1783_v25 = vpop.f32.mrf.mxu0 }
 0x43d   : > { %v1787_v27 = vpop.xlane.xlu0 %1786 }
 0x43e   : > { %v1791_v28 = vsub.f32 %v1759_v11, %v1787_v27 }
 0x440   : > { %v1793_v29 = vmul.f32 1.442695, %v1791_v28 }
 0x442   : > { %4900 = vpow2.f32 %v1793_v29 }
 0x448   : > { %v4901_v31 = vpop.eup %4900 }
 0x449   : > { %v1797_v32 = vsel %vm1477_vm1, %v4901_v31, 0.0 }
 0x44a   : > { %1798 = vadd.xlane.f32.xlu2 %v1797_v32 }
 0x450   : > { %v1831_v33 = vpop.permute.xlu0 %1830 }
 0x451   : > { %v1836_v34 = vsel %vm1505_vm2, %v1831_v33, 0 }
 0x452   : > { %1845 = vmatpush.bf16.msrb.mxu2 %v1836_v34 }
 0x462   : > { %1889 = vrot.lane.b32.xlu2 %v5929_v12, %s5492_s1  ;;  %v1888_v12 = vpop.permute.xlu1 %1887 }
 0x46a   : > { %v1911_v51 = vpop.permute.xlu1 %1910 }
 0x487   : > { %v1734_v37 = vpop.f32.mrf.mxu2 }
 0x48b   : > { %1789 = vmax.xlane.f32.xlu2 %v1788_v36  ;;  %v4653_v36 = vld [vmem:[%s5848_s3 + $0x38] sm:$0xff] }
 0x48f   : > { %v1736_v18 = vpop.f32.mrf.mxu2 }
 0x492   : > { %v1705_v39 = vpop.f32.mrf.mxu1 }
 0x493   : > { %v6033_v40 = vadd.f32 %v1734_v37, %v1705_v39  ;;  %v4652_v37 = vld [vmem:[%s5848_s3 + $0x30] sm:$0xff] }
 0x49a   : > { %v6040_v58 = vpop.f32.mrf.mxu1 }
 0x4bd   : > { %v1799_v41 = vpop.xlane.xlu2 %1798 }
 0x4be   : > { %4902 = vrcp.f32 %v1799_v41 }
 0x4c4   : > { %v4903_v42 = vpop.eup %4902 }
 0x4c5   : > { %v1805_v43 = vmul.f32 %v4903_v42, %v4901_v31  ;;  %v1890_v44 = vpop.permute.xlu2 %1889 }
 0x4c6   : > { %v1895_v45 = vsel %vm1438_vm0, %v1890_v44, 0 }
 0x4c7   : > { %v1807_v48 = vpack.c.bf16 %v1805_v43, %v1805_v43  ;;  %1904 = vmatpush.bf16.xpose.msra.mxu0 %v1895_v45 }
 0x4c9   : > { %4172 = vmatmul.msk.bf16.vlgmr.msrb.gmra.mxu1 %vm1477_vm1, %v1807_v48  ;;  %v4874_v48 = vld [vmem:[%s969_s10] ss:$0 sm:$0xff]  ;;  %s6502_s10 = scalar_lea.vmem [#allocation13], %s5812_s21  ;;  %s6505_s21 = sld [smem:[#allocation28_spill]] }
 0x4ce   : > { %4183 = vmatmul.msk.bf16.vlgmr.msra.gmra.mxu0 %vm1438_vm0, %v1888_v12 }
 0x4cf   : > { %2025 = vmatpush.bf16.msrb.mxu0 %v4653_v36  ;;  %v4674_v36 = vld [vmem:[%s5854_s24 + $0x64] sm:$0xf]  ;;  %p4608_p2 = scmp.ge.s32.totalorder %s6505_s21, 1 }
 0x4d3   : > { %2026 = vmatpush.bf16.msrb.mxu0 %v4652_v37  ;;  %v4288_v37 = vld [vmem:[%s5854_s24 + $0x68] sm:$0xf0] }
 0x4d9   : > { %4184 = vmatmul.msk.bf16.vlgmr.msra.gmra.mxu1 %vm1438_vm0, %v1911_v51 }
 0x4fe   : > { %v1790_v52 = vpop.xlane.xlu2 %1789 }
 0x4ff   : > { %v1792_v54 = vsub.f32 %v1782_v35, %v1790_v52 }
 0x501   : > { %v1795_v55 = vmul.f32 1.442695, %v1792_v54 }
 0x503   : > { %4904 = vpow2.f32 %v1795_v55 }
 0x509   : > { %v4905_v56 = vpop.eup %4904 }
 0x50a   : > { %v1800_v57 = vsel %vm1477_vm1, %v4905_v56, 0.0 }
 0x50b   : > { %1801 = vadd.xlane.f32.xlu1 %v1800_v57 }
 0x546   : > { %v1826_v59 = vpop.f32.mrf.mxu1 }
 0x54b   : > { %v1906_v60 = vpop.f32.mrf.mxu0 }
 0x54c   : > { %v1907_v61 = vadd.f32 %v1906_v60, %v5964_v46 }
 0x54e   : > { %v1828_v62 = vpop.f32.mrf.mxu1  ;;  %v1933_v30 = vsel %vm1477_vm1, %v1907_v61, -inf }
 0x54f   : > { %1934 = vmax.xlane.f32.xlu0 %v1933_v30 }
 0x553   : > { %v1908_v26 = vpop.f32.mrf.mxu0 }
 0x554   : > { %v4677_v26 = vld [vmem:[%s5854_s24 + $0x74] sm:$0xf0] }
 0x556   : > { %v1929_v63 = vpop.f32.mrf.mxu1 }
 0x557   : > { %v1930_v0 = vadd.f32 %v1929_v63, %v5964_v46 }
 0x559   : > { %v1936_v1 = vsel %vm1477_vm1, %v1930_v0, -inf }
 0x55a   : > { %1937 = vmax.xlane.f32.xlu2 %v1936_v1 }
 0x55e   : > { %v1931_v38 = vpop.f32.mrf.mxu1 }
 0x57e   : > { %v1802_v2 = vpop.xlane.xlu1 %1801 }
 0x57f   : > { %4906 = vrcp.f32 %v1802_v2  ;;  %v4278_v2 = vld [vmem:[%s5854_s24 + $0x50] sm:$0xf] }
 0x585   : > { %v4907_v3 = vpop.eup %4906 }
 0x586   : > { %v1806_v53 = vmul.f32 %v4907_v3, %v4905_v56 }
 0x588   : > { %v1808_v4 = vpack.c.bf16 %v1806_v53, %v1806_v53 }
 0x58a   : > { %4173 = vmatmul.msk.bf16.vlgmr.msrb.gmra.mxu2 %vm1477_vm1, %v1808_v4  ;;  %v4270_v4 = vld [vmem:[%s5854_s24 + $0x40] sm:$0xf] }
 0x5c2   : > { %v1935_v5 = vpop.xlane.xlu0 %1934 }
 0x5c3   : > { %v1939_v6 = vsub.f32 %v1907_v61, %v1935_v5  ;;  %v5493_v61 = vmov 128.0   ;;  %v4671_v5 = vld [vmem:[%s5854_s24 + $0x44] sm:$0xf0] }
 0x5c5   : > { %v1941_v7 = vmul.f32 1.442695, %v1939_v6 }
 0x5c7   : > { %4908 = vpow2.f32 %v1941_v7  ;;  %v4271_v7 = vor.u32 %v4671_v5, %v4270_v4 }
 0x5cd   : > { %v4909_v8 = vpop.eup %4908  ;;  %v1938_v9 = vpop.xlane.xlu2 %1937 }
 0x5ce   : > { %v1940_v46 = vsub.f32 %v1930_v0, %v1938_v9  ;;  %v1945_v11 = vsel %vm1477_vm1, %v4909_v8, 0.0  ;;  %v4675_v0 = vld [vmem:[%s5854_s24 + $0x64] sm:$0xf0]  ;;  %v4669_v9 = vld [vmem:[%s5854_s24 + $0x34] sm:$0xf0] }
 0x5cf   : > { %1946 = vadd.xlane.f32.xlu1 %v1945_v11 }
 0x5d0   : > { %v1943_v13 = vmul.f32 1.442695, %v1940_v46 }
 0x5d2   : > { %4910 = vpow2.f32 %v1943_v13  ;;  %v4254_v13 = vld [vmem:[%s5854_s24 + $0x20] sm:$0xf] }
 0x5d3   : > { %v4255_v17 = vor.u32 %v4667_v14, %v4254_v13 }
 0x5d8   : > { %v4911_v15 = vpop.eup %4910 }
 0x5d9   : > { %v1948_v16 = vsel %vm1477_vm1, %v4911_v15, 0.0 }
 0x5da   : > { %1949 = vadd.xlane.f32.xlu2 %v1948_v16 }
 0x5e8   : > { %1957 = vrot.lane.b32.xlu1 %v5974_v10, %s5492_s1 }
 0x5f2   : > { %1978 = vrot.lane.b32.xlu2 %v5994_v47, %s5492_s1 }
 0x60d   : > { %v1847_v19 = vpop.f32.mrf.mxu2 }
 0x60e   : > { %v1851_v20 = vpack.c.bf16 %v1847_v19, %v1826_v59  ;;  %v4246_v19 = vld [vmem:[%s5854_s24 + $0x10] sm:$0xf] }
 0x610   : > { %4182 = vmatmul.msk.bf16.vlgmr.msrb.gmra.mxu3 %vm1438_vm0, %v1851_v20  ;;  %v4665_v20 = vld [vmem:[%s5854_s24 + $0x14] sm:$0xf0] }
 0x615   : > { %v1849_v21 = vpop.f32.mrf.mxu2 }
 0x642   : > { %v1947_v22 = vpop.xlane.xlu1 %1946 }
 0x64d   : > { %v1950_v23 = vpop.xlane.xlu2 %1949 }
 0x64e   : > { %4912 = vrcp.f32 %v1950_v23 }
 0x64f   : > { %4914 = vrcp.f32 %v1947_v22  ;;  %v4247_v22 = vor.u32 %v4665_v20, %v4246_v19 }
 0x650   : > { %4916 = vrcp.f32 %v5493_v61  ;;  %v4655_v61 = vld [vmem:[%s5851_s11 + $0x8] sm:$0xff] }
 0x654   : > { %v4913_v24 = vpop.eup %4912 }
 0x655   : > { %v1954_v25 = vmul.f32 %v4913_v24, %v4911_v15  ;;  %v1979_v27 = vpop.permute.xlu2 %1978  ;;  %v4915_v10 = vpop.eup %4914 }
 0x656   : > { %v1984_v28 = vsel %vm1505_vm2, %v1979_v27, 0  ;;  %v1953_v47 = vmul.f32 %v4915_v10, %v4909_v8  ;;  %v4917_v62 = vpop.eup %4916  ;;  %v4262_v8 = vld [vmem:[%s5854_s24 + $0x30] sm:$0xf]  ;;  %v4238_v10 = vld [vmem:[%s5854_s24] sm:$0xf] }
 0x657   : > { %v1956_v29 = vpack.c.bf16 %v1954_v25, %v1954_v25  ;;  %1993 = vmatpush.bf16.msra.mxu3 %v1984_v28  ;;  %v2049_v30 = vmul.f32 128.0, %v4917_v62  ;;  %vm2053_vm3 = vweird.f32 %v4917_v62  ;;  %v4263_v11 = vor.u32 %v4669_v9, %v4262_v8  ;;  %v4663_v28 = vld [vmem:[%s5854_s24 + $0x4] sm:$0xf0] }
 0x658   : > { %v1955_v33 = vpack.c.bf16 %v1953_v47, %v1953_v47  ;;  %v4620_v47 = vld [vmem:[#allocation3] sm:$0xff] }
 0x659   : > { %v2050_v1 = vsub.f32 1.0, %v2049_v30  ;;  %v4664_v30 = vld [vmem:[%s5854_s24 + $0x14] sm:$0xf] }
 0x65a   : > { %v1958_v31 = vpop.permute.xlu1 %1957  ;;  %4186 = vmatmul.msk.bf16.vlgmr.msra.gmra.mxu3 %vm1477_vm1, %v1956_v29  ;;  %v4239_v29 = vor.u32 %v4663_v28, %v4238_v10  ;;  %v4876_v10 = vld [vmem:[%s5844_s8] ss:$0 sm:$0xff] }
 0x65b   : > { %v1963_v32 = vsel %vm1505_vm2, %v1958_v31, 0  ;;  %v2051_v3 = vmul.f32 %v4917_v62, %v2050_v1  ;;  %v4661_v31 = vld [vmem:[%s5851_s11 + $0x38] sm:$0xff] }
 0x65c   : > { %1972 = vmatpush.bf16.msra.mxu2 %v1963_v32  ;;  %2166 = vmatpush.bf16.msrb.mxu1 %v4661_v31  ;;  %v4676_v32 = vld [vmem:[%s5854_s24 + $0x74] sm:$0xf] }
 0x65d   : > { %v2052_v6 = vadd.f32 %v4917_v62, %v2051_v3 }
 0x65f   : > { %4185 = vmatmul.msk.bf16.vlgmr.msra.gmra.mxu2 %vm1477_vm1, %v1955_v33  ;;  %v6079_v46 = vsel %vm2053_vm3, %v4917_v62, %v2052_v6  ;;  %v4296_v33 = vld [vmem:[%s5854_s24 + $0x78] sm:$0xf0] }
 0x693   : > { %v1880_v34 = vpop.f32.mrf.mxu3 }
 0x694   : > { %v1885_v35 = vadd.f32 %v1880_v34, %v6033_v40  ;;  %v1737_v40 = vadd.f32 %v1736_v18, %v6040_v58  ;;  %v4294_v58 = vld [vmem:[%s5854_s24 + $0x70] sm:$0xf] }
 0x695   : > { %v4295_v63 = vor.u32 %v4677_v26, %v4294_v58  ;;  %v4660_v34 = vld [vmem:[%s5851_s11 + $0x30] sm:$0xff]  ;;  %v4248_v26 = vld [vmem:[%s5854_s24 + $0x18] sm:$0xf0] }
 0x696   : > { %2167 = vmatpush.bf16.msrb.mxu1 %v4660_v34 }
 0x697   : > { %2294 = vmatpush.bf16.msrb.mxu2 %v4295_v63  ;;  %v4654_v63 = vld [vmem:[%s5851_s11] sm:$0xff] }
 0x69b   : > { %v1882_v39 = vpop.f32.mrf.mxu3 }
 0x69c   : > { %v1886_v55 = vadd.f32 %v1882_v39, %v1737_v40  ;;  %v4659_v39 = vld [vmem:[%s5851_s11 + $0x28] sm:$0xff]  ;;  %v4668_v40 = vld [vmem:[%s5854_s24 + $0x34] sm:$0xf] }
 0x69d   : > { %2168 = vmatpush.bf16.msrb.mxu1 %v4659_v39 }
 0x6dd   : > { %v1995_v41 = vpop.f32.mrf.mxu3 }
 0x6e2   : > { %v1974_v42 = vpop.f32.mrf.mxu2 }
 0x6e3   : > { %v1999_v43 = vpack.c.bf16 %v1995_v41, %v1974_v42  ;;  %v4291_v41 = vor.u32 %v4674_v36, %v4288_v37  ;;  %v4672_v42 = vld [vmem:[%s5854_s24 + $0x54] sm:$0xf] }
 0x6e5   : > { %v1997_v44 = vpop.f32.mrf.mxu3  ;;  %4195 = vmatmul.msk.bf16.vlgmr.msrb.gmra.mxu0 %vm1438_vm0, %v1999_v43  ;;  %v4280_v43 = vld [vmem:[%s5854_s24 + $0x58] sm:$0xf0] }
 0x6e6   : > { %v4658_v44 = vld [vmem:[%s5851_s11 + $0x20] sm:$0xff] }
 0x6e7   : > { %2169 = vmatpush.bf16.msrb.mxu1 %v4658_v44 }
 0x6ea   : > { %v1976_v45 = vpop.f32.mrf.mxu2 }
 0x6eb   : > { %v4283_v45 = vor.u32 %v4672_v42, %v4280_v43 }
 0x762   : > { %v2028_v12 = vpop.f32.mrf.mxu0 }
 0x763   : > { %v2033_v51 = vadd.f32 %v2028_v12, %v1885_v35  ;;  %v4299_v35 = vor.u32 %v4676_v32, %v4296_v33  ;;  %v4272_v12 = vld [vmem:[%s5854_s24 + $0x48] sm:$0xf0] }
 0x765   : > { %v2038_v52 = vadd.f32 %v4874_v48, %v2033_v51  ;;  %2313 = vmatpush.bf16.msrb.mxu3 %v4299_v35  ;;  %v4657_v51 = vld [vmem:[%s5851_s11 + $0x18] sm:$0xff] }
 0x766   : > { %2170 = vmatpush.bf16.msrb.mxu1 %v4657_v51 }
 0x767   : > { %v2040_v54 = vadd.f32 %v2038_v52, %v5905_v49  ;;  %v4286_v49 = vld [vmem:[%s5854_s24 + $0x60] sm:$0xf] }
 0x768   : > { %v4287_v38 = vor.u32 %v4675_v0, %v4286_v49  ;;  %v4251_v0 = vor.u32 %v4664_v30, %v4248_v26 }
 0x769   : > { %2044 = vadd.xlane.f32.xlu0 %v2040_v54  ;;  %2314 = vmatpush.bf16.msrb.mxu3 %v4291_v41 }
 0x76a   : > { %v2030_v56 = vpop.f32.mrf.mxu0  ;;  %2295 = vmatpush.bf16.msrb.mxu2 %v4287_v38  ;;  %v4662_v38 = vld [vmem:[%s5854_s24 + $0x4] sm:$0xf] }
 0x76b   : > { %v2034_v57 = vadd.f32 %v2030_v56, %v1886_v55  ;;  %v4656_v55 = vld [vmem:[%s5851_s11 + $0x10] sm:$0xff] }
 0x76c   : > { %2171 = vmatpush.bf16.msrb.mxu1 %v4656_v55 }
 0x76d   : > { %v2039_v59 = vadd.f32 %v4874_v48, %v2034_v57  ;;  %2315 = vmatpush.bf16.msrb.mxu3 %v4283_v45  ;;  %v4670_v48 = vld [vmem:[%s5854_s24 + $0x44] sm:$0xf]  ;;  %v4621_v57 = vld [vmem:[#allocation3 + $0x8] sm:$0xff] }
 0x76e   : > { %v4275_v52 = vor.u32 %v4670_v48, %v4272_v12 }
 0x76f   : > { %v2041_v60 = vadd.f32 %v2039_v59, %v5907_v50  ;;  %v4673_v50 = vld [vmem:[%s5854_s24 + $0x54] sm:$0xf0]  ;;  %v4666_v59 = vld [vmem:[%s5854_s24 + $0x24] sm:$0xf] }
 0x770   : > { %v4279_v53 = vor.u32 %v4673_v50, %v4278_v2  ;;  %2172 = vmatpush.bf16.msrb.mxu1 %v4655_v61  ;;  %v4240_v2 = vld [vmem:[%s5854_s24 + $0x8] sm:$0xf0] }
 0x771   : > { %2046 = vadd.xlane.f32.xlu0 %v2041_v60  ;;  %2316 = vmatpush.bf16.msrb.mxu3 %v4275_v52  ;;  %v4243_v50 = vor.u32 %v4662_v38, %v4240_v2 }
 0x772   : > { %2296 = vmatpush.bf16.msrb.mxu2 %v4279_v53 }
 0x774   : > { %2173 = vmatpush.bf16.msrb.mxu1 %v4654_v63 }
 0x776   : > { %2297 = vmatpush.bf16.msrb.mxu2 %v4271_v7 }
 0x77a   : > { %2298 = vmatpush.bf16.msrb.mxu2 %v4263_v11 }
 0x77e   : > { %2299 = vmatpush.bf16.msrb.mxu2 %v4255_v17 }
 0x782   : > { %2300 = vmatpush.bf16.msrb.mxu2 %v4247_v22 }
 0x786   : > { %2301 = vmatpush.bf16.msrb.mxu2 %v4239_v29 }
 0x789   : > { %2302 = vmatmul.bf16.vlgmr.msrb.gmra.mxu2 %v4620_v47 }
 0x799   : > { %2307 = vmatmul.bf16.gmra.mxu2 %v4621_v57 }
 0x7dc   : > { %v2045_v15 = vpop.xlane.xlu0 %2044 }
 0x7dd   : > { %v2055_v16 = vmul.f32 %v6079_v46, %v2045_v15 }
 0x7df   : > { %v6084_v18 = vsub.f32 %v2040_v54, %v2055_v16  ;;  %v4264_v54 = vld [vmem:[%s5854_s24 + $0x38] sm:$0xf0] }
 0x7e0   : > { %v4267_v56 = vor.u32 %v4668_v40, %v4264_v54 }
 0x7e1   : > { %v2059_v21 = vmul.f32 %v6084_v18, %v6084_v18 }
 0x7e2   : > { %2317 = vmatpush.bf16.msrb.mxu3 %v4267_v56 }
 0x7e3   : > { %2061 = vadd.xlane.f32.xlu1 %v2059_v21  ;;  %v4875_v21 = vld [vmem:[%s5838_s7] ss:$0 sm:$0xff] }
 0x7e4   : > { %v2047_v23 = vpop.xlane.xlu0 %2046 }
 0x7e5   : > { %v2056_v24 = vmul.f32 %v6079_v46, %v2047_v23 }
 0x7e7   : > { %v6091_v25 = vsub.f32 %v2041_v60, %v2056_v24  ;;  %v4256_v60 = vld [vmem:[%s5854_s24 + $0x28] sm:$0xf0]  ;;  %s6504_s24 = scalar_lea.vmem %s6503_s4, %s5828_s26 }
 0x7e8   : > { %v4259_v62 = vor.u32 %v4666_v59, %v4256_v60 }
 0x7e9   : > { %v2060_v27 = vmul.f32 %v6091_v25, %v6091_v25 }
 0x7ea   : > { %2318 = vmatpush.bf16.msrb.mxu3 %v4259_v62 }
 0x7eb   : > { %2063 = vadd.xlane.f32.xlu2 %v2060_v27 }
 0x7ee   : > { %2319 = vmatpush.bf16.msrb.mxu3 %v4251_v0  ;;  %v4877_v0 = vld [vmem:[%s6502_s10] ss:$0 sm:$0xff] }
 0x7f2   : > { %2320 = vmatpush.bf16.msrb.mxu3 %v4243_v50 }
 0x7f5   : > { %2321 = vmatmul.bf16.vlgmr.msrb.gmra.mxu3 %v4620_v47 }
 0x805   : > { %2326 = vmatmul.bf16.gmra.mxu3 %v4621_v57 }
 0x80c   : > { %v2303_v33 = vpop.f32.mrf.mxu2 }
 0x814   : > { %v2305_v36 = vpop.f32.mrf.mxu2 }
 0x81c   : > { %v2308_v44 = vpop.f32.mrf.mxu2 }
 0x824   : > { %v2310_v12 = vpop.f32.mrf.mxu2 }
 0x856   : > { %v2062_v58 = vpop.xlane.xlu1 %2061 }
 0x857   : > { %v2065_v49 = vmul.f32 %v2062_v58, %v6079_v46 }
 0x859   : > { %v2067_v1 = vadd.f32 1e-05, %v2065_v49 }
 0x85b   : > { %4918 = vrsqrt.f32 %v2067_v1  ;;  %vm2075_vm5 = vweird.f32 %v2067_v1 }
 0x85e   : > { %v2064_v3 = vpop.xlane.xlu2 %2063 }
 0x85f   : > { %v2066_v53 = vmul.f32 %v2064_v3, %v6079_v46 }
 0x861   : > { %v4919_v4 = vpop.eup %4918  ;;  %v2068_v5 = vadd.f32 1e-05, %v2066_v53 }
 0x862   : > { %v2070_v6 = vmul.f32 %v4919_v4, %v2067_v1  ;;  %vm2076_vm4 = vweird.f32 %v4919_v4 }
 0x863   : > { %4920 = vrsqrt.f32 %v2068_v5  ;;  %vm2077_vm6 = vmor %vm2075_vm5, %vm2076_vm4  ;;  %vm2085_vm8 = vweird.f32 %v2068_v5 }
 0x864   : > { %v2071_v7 = vmul.f32 %v4919_v4, %v2070_v6 }
 0x866   : > { %v2072_v8 = vmul.f32 0.5, %v2071_v7 }
 0x868   : > { %v2073_v9 = vsub.f32 1.5, %v2072_v8 }
 0x869   : > { %v4921_v11 = vpop.eup %4920 }
 0x86a   : > { %v2074_v13 = vmul.f32 %v4919_v4, %v2073_v9  ;;  %v2080_v14 = vmul.f32 %v4921_v11, %v2068_v5  ;;  %vm2086_vm7 = vweird.f32 %v4921_v11 }
 0x86b   : > { %vm2087_vm9 = vmor %vm2085_vm8, %vm2086_vm7 }
 0x86c   : > { %v2081_v15 = vmul.f32 %v4921_v11, %v2080_v14  ;;  %v2078_v16 = vsel %vm2077_vm6, %v4919_v4, %v2074_v13 }
 0x86d   : > { %v2089_v20 = vmul.f32 %v2078_v16, %v6084_v18  ;;  %v2196_v18 = vld [vmem:[%s5856_s22] sm:$0x3] }
 0x86e   : > { %v2082_v17 = vmul.f32 0.5, %v2081_v15  ;;  %v2198_v32 = vperm.slane %v2196_v18, 0  ;;  %v6140_v57 = vperm.slane %v2196_v18, 1 }
 0x86f   : > { %v2092_v27 = vmul.f32 %v4875_v21, %v2089_v20 }
 0x870   : > { %v2083_v19 = vsub.f32 1.5, %v2082_v17  ;;  %v2304_v34 = vadd.f32 %v2303_v33, %v2198_v32  ;;  %v2306_v37 = vadd.f32 %v2305_v36, %v2198_v32  ;;  %v2309_v45 = vadd.f32 %v2308_v44, %v2198_v32 }
 0x871   : > { %v6127_v29 = vadd.f32 %v4876_v10, %v2092_v27  ;;  %v2311_v51 = vadd.f32 %v2310_v12, %v2198_v32 }
 0x872   : > { %v2084_v22 = vmul.f32 %v4921_v11, %v2083_v19  ;;  %v2337_v35 = vpack.c.bf16 %v2304_v34, %v2304_v34  ;;  %v2339_v48 = vpack.c.bf16 %v2309_v45, %v2309_v45 }
 0x873   : > { %v2340_v40 = vpack.c.bf16 %v2311_v51, %v2311_v51 }
 0x874   : > { %v2088_v23 = vsel %vm2087_vm9, %v4921_v11, %v2084_v22  ;;  %v2347_v39 = vunpack.c.l.b16 %v2337_v35  ;;  %v2371_v52 = vunpack.c.l.b16 %v2339_v48 }
 0x875   : > { %v2090_v24 = vmul.f32 %v2088_v23, %v6091_v25  ;;  %v2338_v25 = vpack.c.bf16 %v2306_v37, %v2306_v37  ;;  %v2372_v55 = vunpack.c.l.b16 %v2340_v40 }
 0x877   : > { %v2093_v28 = vmul.f32 %v4875_v21, %v2090_v24  ;;  %v2348_v41 = vunpack.c.l.b16 %v2338_v25  ;;  %v6138_v56 = vpack.c.b16 %v2372_v55, %v2371_v52 }
 0x878   : > { %v2322_v54 = vpop.f32.mrf.mxu3 }
 0x879   : > { %v6129_v47 = vadd.f32 %v4876_v10, %v2093_v28  ;;  %v6134_v42 = vpack.c.b16 %v2348_v41, %v2347_v39  ;;  %v2378_v59 = vsel %vm1438_vm0, %v6138_v56, 0  ;;  %v2323_v60 = vadd.f32 %v2322_v54, %v6140_v57 }
 0x87b   : > { %v2097_v31 = vpack.c.bf16 %v6129_v47, %v6127_v29  ;;  %v2354_v43 = vsel %vm1438_vm0, %v6134_v42, 0  ;;  %v2341_v61 = vpack.c.bf16 %v2323_v60, %v2323_v60 }
 0x87c   : > { %2363 = vmatpush.bf16.xpose.msra.mxu0 %v2354_v43 }
 0x87d   : > { %2174 = vmatmul.bf16.vlgmr.msrb.gmra.mxu1 %v2097_v31  ;;  %v2420_v58 = vunpack.c.l.b16 %v2341_v61 }
 0x880   : > { %v2324_v62 = vpop.f32.mrf.mxu3 }
 0x881   : > { %v2325_v30 = vadd.f32 %v2324_v62, %v6140_v57 }
 0x883   : > { %v2342_v26 = vpack.c.bf16 %v2325_v30, %v2325_v30 }
 0x884   : > { %2387 = vmatpush.bf16.xpose.msrb.mxu0 %v2378_v59 }
 0x885   : > { %v2421_v49 = vunpack.c.l.b16 %v2342_v26 }
 0x887   : > { %v6146_v63 = vpack.c.b16 %v2421_v49, %v2420_v58 }
 0x888   : > { %v2327_v43 = vpop.f32.mrf.mxu3 }
 0x889   : > { %2434 = vmatpush.bf16.msra.mxu1 %v6146_v63  ;;  %v2328_v45 = vadd.f32 %v2327_v43, %v6140_v57 }
 0x88b   : > { %v2343_v48 = vpack.c.bf16 %v2328_v45, %v2328_v45 }
 0x88d   : > { %v2442_v55 = vunpack.c.l.b16 %v2343_v48 }
 0x890   : > { %v2329_v51 = vpop.f32.mrf.mxu3 }
 0x891   : > { %v2330_v40 = vadd.f32 %v2329_v51, %v6140_v57 }
 0x893   : > { %v2344_v59 = vpack.c.bf16 %v2330_v40, %v2330_v40 }
 0x895   : > { %v2443_v60 = vunpack.c.l.b16 %v2344_v59 }
 0x897   : > { %v6187_v62 = vpack.c.b16 %v2443_v60, %v2442_v55 }
 0x8fa   : > { %v2175_v1 = vpop.f32.mrf.mxu1 }
 0x8fb   : > { %v2176_v38 = vadd.f32 %v4877_v0, %v2175_v1 }
 0x8fd   : > { %v2332_v2 = vmul.f32 0.17677669, %v2176_v38 }
 0x8ff   : > { %v2335_v50 = vpack.c.bf16 %v2332_v2, %v2332_v2 }
 0x901   : > { %v2468_v3 = vunpack.c.l.b16 %v2335_v50  ;;  %4300 = vmatmul.msk.bf16.vlgmr.msra.gmra.mxu0 %vm1438_vm0, %v2335_v50 }
 0x902   : > { %v2177_v53 = vpop.f32.mrf.mxu1  ;;  %2456 = vmatpush.bf16.msra.mxu0 %v6187_v62 }
 0x903   : > { %v2178_v4 = vadd.f32 %v4877_v0, %v2177_v53  ;;  %v6152_v5 = vpack.c.b16 %v2468_v3, %v2468_v3 }
 0x905   : > { %v2333_v6 = vmul.f32 0.17677669, %v2178_v4  ;;  %2470 = vrot.lane.b32.xlu1 %v6152_v5, %s5490_s9 }
 0x907   : > { %v2336_v7 = vpack.c.bf16 %v2333_v6, %v2333_v6 }
 0x909   : > { %v2494_v8 = vunpack.c.l.b16 %v2336_v7 }
 0x90b   : > { %v6156_v9 = vpack.c.b16 %v2494_v8, %v2494_v8 }
 0x90d   : > { %2496 = vrot.lane.b32.xlu2 %v6156_v9, %s5490_s9 }
 0x911   : > { %4301 = vmatmul.msk.bf16.vlgmr.msrb.gmra.mxu0 %vm1438_vm0, %v2336_v7 }
 0x915   : > { %2543 = vrot.lane.b32.xlu2 %v6146_v63, %s5490_s9 }
 0x91d   : > { %2646 = vrot.lane.b32.xlu2 %v6134_v42, %s5491_s27 }
 0x925   : > { %2644 = vrot.lane.b32.xlu2 %v6152_v5, %s5491_s27 }
 0x967   : > { %v2497_v11 = vpop.permute.xlu2 %2496 }
 0x96f   : > { %v2544_v13 = vpop.permute.xlu2 %2543 }
 0x970   : > { %2556 = vmatpush.bf16.msra.mxu3 %v2544_v13 }
 0x977   : > { %v2647_v14 = vpop.permute.xlu2 %2646  ;;  %v2471_v36 = vpop.permute.xlu1 %2470 }
 0x978   : > { %v2652_v15 = vsel %vm1438_vm0, %v2647_v14, 0 }
 0x979   : > { %2661 = vmatpush.bf16.xpose.msrb.mxu3 %v2652_v15 }
 0x97e   : > { %v2365_v16 = vpop.f32.mrf.mxu0 }
 0x97f   : > { %v2394_v17 = vsel %vm2393_vm10, %v2365_v16, -inf  ;;  %v6182_v44 = vpop.permute.xlu2 %2644 }
 0x980   : > { %2395 = vmax.xlane.f32.xlu0 %v2394_v17 }
 0x986   : > { %v2367_v19 = vpop.f32.mrf.mxu0 }
 0x987   : > { %v4679_v19 = vld [vmem:[%s5858_s18 + $0x8] sm:$0xff] }
 0x98e   : > { %v2389_v20 = vpop.f32.mrf.mxu0 }
 0x98f   : > { %v2397_v21 = vsel %vm2393_vm10, %v2389_v20, -inf }
 0x990   : > { %2398 = vmax.xlane.f32.xlu2 %v2397_v21 }
 0x996   : > { %v2391_v22 = vpop.f32.mrf.mxu0 }
 0x9f3   : > { %v2396_v23 = vpop.xlane.xlu0 %2395 }
 0x9f4   : > { %v2400_v24 = vsub.f32 %v2365_v16, %v2396_v23 }
 0x9f6   : > { %v2402_v27 = vmul.f32 1.442695, %v2400_v24  ;;  %v4681_v24 = vld [vmem:[%s5858_s18 + $0x18] sm:$0xff] }
 0x9f8   : > { %4922 = vpow2.f32 %v2402_v27 }
 0x9fe   : > { %v4923_v10 = vpop.eup %4922 }
 0x9ff   : > { %v2406_v28 = vsel %vm2393_vm10, %v4923_v10, 0.0 }
 0xa00   : > { %2407 = vadd.xlane.f32.xlu0 %v2406_v28 }
 0xa03   : > { %v2399_v54 = vpop.xlane.xlu2 %2398 }
 0xa04   : > { %v2401_v61 = vsub.f32 %v2389_v20, %v2399_v54  ;;  %v4678_v20 = vld [vmem:[%s5858_s18] sm:$0xff] }
 0xa06   : > { %v2404_v58 = vmul.f32 1.442695, %v2401_v61 }
 0xa14   : > { %2472 = vrot.lane.b32.xlu0 %v6134_v42, %s5490_s9 }
 0xa1c   : > { %2498 = vrot.lane.b32.xlu0 %v6138_v56, %s5490_s9 }
 0xa73   : > { %v2408_v31 = vpop.xlane.xlu0 %2407 }
 0xa74   : > { %4924 = vrcp.f32 %v2408_v31 }
 0xa75   : > { %4926 = vpow2.f32 %v2404_v58 }
 0xa7a   : > { %v4925_v18 = vpop.eup %4924 }
 0xa7b   : > { %v2414_v32 = vmul.f32 %v4925_v18, %v4923_v10  ;;  %v4927_v0 = vpop.eup %4926  ;;  %v4680_v10 = vld [vmem:[%s5858_s18 + $0x10] sm:$0xff] }
 0xa7c   : > { %v2409_v57 = vsel %vm2393_vm10, %v4927_v0, 0.0 }
 0xa7d   : > { %v2416_v33 = vpack.c.bf16 %v2414_v32, %v2414_v32 }
 0xa7f   : > { %4302 = vmatmul.msk.bf16.vlgmr.msra.gmra.mxu1 %vm2393_vm10, %v2416_v33 }
 0xa86   : > { %v2473_v34 = vpop.permute.xlu0 %2472 }
 0xa87   : > { %v2478_v35 = vsel %vm1438_vm0, %v2473_v34, 0 }
 0xa88   : > { %2487 = vmatpush.bf16.xpose.msrb.mxu1 %v2478_v35 }
 0xa8e   : > { %v2499_v37 = vpop.permute.xlu0 %2498 }
 0xa8f   : > { %v2504_v39 = vsel %vm1438_vm0, %v2499_v37, 0  ;;  %4304 = vmatmul.msk.bf16.vlgmr.msrb.gmra.mxu1 %vm1438_vm0, %v2471_v36 }
 0xa90   : > { %2513 = vmatpush.bf16.xpose.msra.mxu2 %v2504_v39  ;;  %2607 = vmatpush.bf16.msra.mxu1 %v4681_v24 }
 0xa94   : > { %2608 = vmatpush.bf16.msra.mxu1 %v4680_v10 }
 0xa97   : > { %4305 = vmatmul.msk.bf16.vlgmr.msra.gmra.mxu2 %vm1438_vm0, %v2497_v11 }
 0xa98   : > { %2636 = vmatpush.bf16.msrb.mxu2 %v4679_v19 }
 0xa9c   : > { %2637 = vmatpush.bf16.msrb.mxu2 %v4678_v20 }
 0xafc   : > { %v6180_v25 = vpop.f32.mrf.mxu1 }
 0xb04   : > { %v2438_v41 = vpop.f32.mrf.mxu1 }
 0xb0c   : > { %v2489_v12 = vpop.f32.mrf.mxu1 }
 0xb0d   : > { %v2519_v52 = vsel %vm2393_vm10, %v2489_v12, -inf }
 0xb0e   : > { %2520 = vmax.xlane.f32.xlu0 %v2519_v52 }
 0xb14   : > { %v2491_v30 = vpop.f32.mrf.mxu1 }
 0xb1a   : > { %v2515_v26 = vpop.f32.mrf.mxu2 }
 0xb1b   : > { %v2522_v49 = vsel %vm2393_vm10, %v2515_v26, -inf }
 0xb1c   : > { %2523 = vmax.xlane.f32.xlu0 %v2522_v49 }
 0xb22   : > { %v2517_v1 = vpop.f32.mrf.mxu2 }
 0xb24   : > { %2410 = vadd.xlane.f32.xlu0 %v2409_v57 }
 0xb38   : > { %2562 = vrot.lane.b32.xlu0 %v6187_v62, %s5490_s9 }
 0xb40   : > { %2667 = vrot.lane.b32.xlu0 %v6156_v9, %s5491_s27 }
 0xb81   : > { %v2521_v38 = vpop.xlane.xlu0 %2520 }
 0xb82   : > { %v2525_v2 = vsub.f32 %v2489_v12, %v2521_v38 }
 0xb84   : > { %v2527_v50 = vmul.f32 1.442695, %v2525_v2 }
 0xb86   : > { %4928 = vpow2.f32 %v2527_v50 }
 0xb8c   : > { %v4929_v3 = vpop.eup %4928 }
 0xb8d   : > { %v2531_v53 = vsel %vm2393_vm10, %v4929_v3, 0.0 }
 0xb8e   : > { %2532 = vadd.xlane.f32.xlu1 %v2531_v53 }
 0xb8f   : > { %v2524_v4 = vpop.xlane.xlu0 %2523 }
 0xb90   : > { %v2526_v6 = vsub.f32 %v2515_v26, %v2524_v4 }
 0xb92   : > { %v2529_v7 = vmul.f32 1.442695, %v2526_v6 }
 0xb94   : > { %4930 = vpow2.f32 %v2529_v7 }
 0xb97   : > { %v2411_v8 = vpop.xlane.xlu0 %2410 }
 0xb98   : > { %4932 = vrcp.f32 %v2411_v8 }
 0xb9a   : > { %v4931_v11 = vpop.eup %4930 }
 0xb9b   : > { %v2534_v13 = vsel %vm2393_vm10, %v4931_v11, 0.0 }
 0xb9c   : > { %2535 = vadd.xlane.f32.xlu1 %v2534_v13 }
 0xb9e   : > { %v4933_v14 = vpop.eup %4932 }
 0xb9f   : > { %v2415_v15 = vmul.f32 %v4933_v14, %v4927_v0 }
 0xba1   : > { %v2417_v16 = vpack.c.bf16 %v2415_v15, %v2415_v15 }
 0xba3   : > { %4303 = vmatmul.msk.bf16.vlgmr.msra.gmra.mxu0 %vm2393_vm10, %v2417_v16 }
 0xbaa   : > { %v2563_v17 = vpop.permute.xlu0 %2562 }
 0xbab   : > { %2575 = vmatpush.bf16.msrb.mxu0 %v2563_v17 }
 0xbb2   : > { %v2668_v35 = vpop.permute.xlu0 %2667 }
 0xbb5   : > { %2669 = vrot.lane.b32.xlu1 %v6138_v56, %s5491_s27 }
 0xbbd   : > { %2714 = vrot.lane.b32.xlu1 %v6146_v63, %s5491_s27 }
 0xbc5   : > { %2813 = vrot.lane.b32.xlu1 %v6138_v56, %s5492_s1 }
 0xbcd   : > { %2788 = vrot.lane.b32.xlu1 %v6152_v5, %s5492_s1 }
 0xbd5   : > { %2811 = vrot.lane.b32.xlu1 %v6156_v9, %s5492_s1 }
 0xc01   : > { %v2533_v21 = vpop.xlane.xlu1 %2532 }
 0xc02   : > { %4934 = vrcp.f32 %v2533_v21 }
 0xc08   : > { %v4935_v22 = vpop.eup %4934 }
 0xc09   : > { %v2539_v23 = vmul.f32 %v4935_v22, %v4929_v3 }
 0xc0b   : > { %v2541_v27 = vpack.c.bf16 %v2539_v23, %v2539_v23 }
 0xc0d   : > { %4306 = vmatmul.msk.bf16.vlgmr.msra.gmra.mxu3 %vm2393_vm10, %v2541_v27 }
 0xc0f   : > { %v2536_v56 = vpop.xlane.xlu1 %2535 }
 0xc10   : > { %4936 = vrcp.f32 %v2536_v56  ;;  %v4683_v56 = vld [vmem:[%s5858_s18 + $0x28] sm:$0xff] }
 0xc11   : > { %2778 = vmatpush.bf16.msra.mxu3 %v4683_v56 }
 0xc16   : > { %v4937_v5 = vpop.eup %4936 }
 0xc17   : > { %v2540_v28 = vmul.f32 %v4937_v5, %v4931_v11 }
 0xc19   : > { %v2542_v9 = vpack.c.bf16 %v2540_v28, %v2540_v28 }
 0xc1b   : > { %4307 = vmatmul.msk.bf16.vlgmr.msrb.gmra.mxu0 %vm2393_vm10, %v2542_v9 }
 0xc1d   : > { %4326 = vmatmul.msk.bf16.vlgmr.msrb.gmra.mxu3 %vm1438_vm0, %v6182_v44 }
 0xc20   : > { %v2458_v31 = vpop.f32.mrf.mxu0 }
 0xc21   : > { %v2462_v18 = vpack.c.bf16 %v2458_v31, %v6180_v25  ;;  %v4682_v31 = vld [vmem:[%s5858_s18 + $0x20] sm:$0xff] }
 0xc22   : > { %2779 = vmatpush.bf16.msra.mxu3 %v4682_v31  ;;  %v4450_v31 = vld [vmem:[%s5861_s6 + $0xc0] sm:$0xf] }
 0xc23   : > { %4325 = vmatmul.msk.bf16.vlgmr.msrb.gmra.mxu2 %vm1438_vm0, %v2462_v18 }
 0xc27   : > { %v2670_v32 = vpop.permute.xlu1 %2669 }
 0xc28   : > { %v2675_v33 = vsel %vm1438_vm0, %v2670_v32, 0  ;;  %v2460_v34 = vpop.f32.mrf.mxu0 }
 0xc29   : > { %2684 = vmatpush.bf16.xpose.msra.mxu0 %v2675_v33 }
 0xc2f   : > { %v2715_v36 = vpop.permute.xlu1 %2714 }
 0xc30   : > { %4327 = vmatmul.msk.bf16.vlgmr.msra.gmra.mxu0 %vm1438_vm0, %v2668_v35  ;;  %2727 = vmatpush.bf16.msrb.mxu1 %v2715_v36 }
 0xc37   : > { %v2814_v39 = vpop.permute.xlu1 %2813 }
 0xc38   : > { %v2819_v45 = vsel %vm1438_vm0, %v2814_v39, 0 }
 0xc3f   : > { %v2789_v49 = vpop.permute.xlu1 %2788 }
 0xc47   : > { %v2812_v11 = vpop.permute.xlu1 %2811 }
 0xc90   : > { %v2558_v37 = vpop.f32.mrf.mxu3 }
 0xc98   : > { %v2560_v41 = vpop.f32.mrf.mxu3  ;;  %v2577_v43 = vpop.f32.mrf.mxu0 }
 0xc99   : > { %v2581_v44 = vpack.c.bf16 %v2577_v43, %v2558_v37 }
 0xc9b   : > { %4316 = vmatmul.msk.bf16.vlgmr.msra.gmra.mxu1 %vm1438_vm0, %v2581_v44 }
 0xc9c   : > { %2828 = vmatpush.bf16.xpose.msra.mxu1 %v2819_v45 }
 0xca0   : > { %v2579_v25 = vpop.f32.mrf.mxu0  ;;  %v2663_v48 = vpop.f32.mrf.mxu3 }
 0xca1   : > { %v2690_v12 = vsel %vm2393_vm10, %v2663_v48, -inf }
 0xca2   : > { %2691 = vmax.xlane.f32.xlu2 %v2690_v12 }
 0xca6   : > { %v2639_v18 = vpop.f32.mrf.mxu2 }
 0xca8   : > { %v2665_v51 = vpop.f32.mrf.mxu3 }
 0xcad   : > { %v2686_v52 = vpop.f32.mrf.mxu0 }
 0xcae   : > { %v2693_v54 = vsel %vm2393_vm10, %v2686_v52, -inf  ;;  %v2641_v32 = vpop.f32.mrf.mxu2 }
 0xcb5   : > { %v2688_v40 = vpop.f32.mrf.mxu0 }
 0xcb6   : > { %v4685_v40 = vld [vmem:[%s5858_s18 + $0x38] sm:$0xff] }
 0xcba   : > { %2790 = vrot.lane.b32.xlu2 %v6134_v42, %s5492_s1 }
 0xce3   : > { %2694 = vmax.xlane.f32.xlu2 %v2693_v54 }
 0xd15   : > { %v2692_v55 = vpop.xlane.xlu2 %2691 }
 0xd16   : > { %v2696_v59 = vsub.f32 %v2663_v48, %v2692_v55 }
 0xd18   : > { %v2698_v60 = vmul.f32 1.442695, %v2696_v59  ;;  %v2610_v17 = vpop.f32.mrf.mxu1 }
 0xd19   : > { %v2640_v12 = vadd.f32 %v2639_v18, %v2610_v17  ;;  %v4712_v18 = vld [vmem:[%s5861_s6 + $0xcc] sm:$0xf0] }
 0xd1a   : > { %4938 = vpow2.f32 %v2698_v60 }
 0xd1d   : > { %v2791_v61 = vpop.permute.xlu2 %2790 }
 0xd1e   : > { %v2796_v30 = vsel %vm1438_vm0, %v2791_v61, 0 }
 0xd1f   : > { %2805 = vmatpush.bf16.xpose.msrb.mxu0 %v2796_v30 }
 0xd20   : > { %v4939_v58 = vpop.eup %4938  ;;  %v6237_v19 = vpop.f32.mrf.mxu1 }
 0xd21   : > { %v2702_v26 = vsel %vm2393_vm10, %v4939_v58, 0.0 }
 0xd22   : > { %2703 = vadd.xlane.f32.xlu0 %v2702_v26  ;;  %v4684_v26 = vld [vmem:[%s5858_s18 + $0x30] sm:$0xff] }
 0xd26   : > { %4339 = vmatmul.msk.bf16.vlgmr.msrb.gmra.mxu0 %vm1438_vm0, %v2789_v49 }
 0xd27   : > { %2922 = vmatpush.bf16.msra.mxu0 %v4685_v40 }
 0xd2b   : > { %2923 = vmatpush.bf16.msra.mxu0 %v4684_v26 }
 0xd36   : > { %2733 = vrot.lane.b32.xlu0 %v6187_v62, %s5491_s27 }
 0xd56   : > { %v2695_v42 = vpop.xlane.xlu2 %2694 }
 0xd57   : > { %v2697_v0 = vsub.f32 %v2686_v52, %v2695_v42 }
 0xd59   : > { %v2700_v1 = vmul.f32 1.442695, %v2697_v0 }
 0xd5b   : > { %4940 = vpow2.f32 %v2700_v1  ;;  %v4878_v1 = vld [vmem:[%s1027_s15] ss:$0 sm:$0xff] }
 0xd61   : > { %v4941_v57 = vpop.eup %4940 }
 0xd62   : > { %v2705_v38 = vsel %vm2393_vm10, %v4941_v57, 0.0 }
 0xd63   : > { %2706 = vadd.xlane.f32.xlu1 %v2705_v38 }
 0xd95   : > { %v2704_v2 = vpop.xlane.xlu0 %2703 }
 0xd96   : > { %4942 = vrcp.f32 %v2704_v2 }
 0xd9c   : > { %v4943_v50 = vpop.eup %4942 }
 0xd9d   : > { %v2710_v3 = vmul.f32 %v4943_v50, %v4939_v58  ;;  %v2642_v50 = vadd.f32 %v2641_v32, %v6237_v19  ;;  %v4466_v19 = vld [vmem:[%s5861_s6 + $0xe0] sm:$0xf]  ;;  %v4710_v32 = vld [vmem:[%s5861_s6 + $0xc4] sm:$0xf] }
 0xd9f   : > { %v2712_v53 = vpack.c.bf16 %v2710_v3, %v2710_v3 }
 0xda1   : > { %4328 = vmatmul.msk.bf16.vlgmr.msrb.gmra.mxu1 %vm2393_vm10, %v2712_v53 }
 0xda3   : > { %v2807_v4 = vpop.f32.mrf.mxu0 }
 0xda4   : > { %v2834_v6 = vsel %vm2393_vm10, %v2807_v4, -inf }
 0xda5   : > { %2835 = vmax.xlane.f32.xlu0 %v2834_v6 }
 0xda8   : > { %v2734_v7 = vpop.permute.xlu0 %2733 }
 0xda9   : > { %2746 = vmatpush.bf16.msra.mxu2 %v2734_v7 }
 0xdab   : > { %v2809_v8 = vpop.f32.mrf.mxu0 }
 0xdb1   : > { %4340 = vmatmul.msk.bf16.vlgmr.msra.gmra.mxu1 %vm1438_vm0, %v2812_v11 }
 0xdd6   : > { %v2707_v13 = vpop.xlane.xlu1 %2706 }
 0xdd7   : > { %4944 = vrcp.f32 %v2707_v13 }
 0xddd   : > { %v4945_v14 = vpop.eup %4944 }
 0xdde   : > { %v2711_v15 = vmul.f32 %v4945_v14, %v4941_v57 }
 0xde0   : > { %v2713_v16 = vpack.c.bf16 %v2711_v15, %v2711_v15 }
 0xde2   : > { %4329 = vmatmul.msk.bf16.vlgmr.msra.gmra.mxu2 %vm2393_vm10, %v2713_v16 }
 0xe18   : > { %v2836_v21 = vpop.xlane.xlu0 %2835 }
 0xe19   : > { %v2840_v22 = vsub.f32 %v2807_v4, %v2836_v21  ;;  %v4714_v21 = vld [vmem:[%s5861_s6 + $0xe4] sm:$0xf] }
 0xe1b   : > { %v2842_v24 = vmul.f32 1.442695, %v2840_v22 }
 0xe1d   : > { %4946 = vpow2.f32 %v2842_v24  ;;  %v4474_v24 = vld [vmem:[%s5861_s6 + $0xe8] sm:$0xf] }
 0xe1e   : > { %v2729_v20 = vpop.f32.mrf.mxu1 }
 0xe23   : > { %v4947_v5 = vpop.eup %4946 }
 0xe24   : > { %v2846_v9 = vsel %vm2393_vm10, %v4947_v5, 0.0 }
 0xe26   : > { %v2731_v23 = vpop.f32.mrf.mxu1 }
 0xe27   : > { %v4468_v23 = vld [vmem:[%s5861_s6 + $0xf0] sm:$0xf0] }
 0xe2e   : > { %v2830_v27 = vpop.f32.mrf.mxu1 }
 0xe2f   : > { %v2837_v10 = vsel %vm2393_vm10, %v2830_v27, -inf }
 0xe30   : > { %2838 = vmax.xlane.f32.xlu2 %v2837_v10  ;;  %v4471_v10 = vor.u32 %v4714_v21, %v4468_v23  ;;  %v4394_v23 = vld [vmem:[%s5861_s6 + $0x48] sm:$0xf] }
 0xe36   : > { %v2832_v28 = vpop.f32.mrf.mxu1 }
 0xe37   : > { %v4476_v28 = vld [vmem:[%s5861_s6 + $0xf8] sm:$0xf0] }
 0xe38   : > { %2847 = vadd.xlane.f32.xlu2 %v2846_v9 }
 0xe50   : > { %2858 = vrot.lane.b32.xlu2 %v6146_v63, %s5492_s1 }
 0xe65   : > { %v2748_v33 = vpop.f32.mrf.mxu2 }
 0xe66   : > { %v2752_v34 = vpack.c.bf16 %v2748_v33, %v2729_v20  ;;  %v4716_v20 = vld [vmem:[%s5861_s6 + $0xec] sm:$0xf0]  ;;  %v4451_v33 = vor.u32 %v4712_v18, %v4450_v31  ;;  %v4690_v18 = vld [vmem:[%s5861_s6 + $0x24] sm:$0xf] }
 0xe67   : > { %v4467_v22 = vor.u32 %v4716_v20, %v4466_v19  ;;  %v4696_v19 = vld [vmem:[%s5861_s6 + $0x4c] sm:$0xf0]  ;;  %v4694_v20 = vld [vmem:[%s5861_s6 + $0x44] sm:$0xf] }
 0xe68   : > { %4338 = vmatmul.msk.bf16.vlgmr.msra.gmra.mxu3 %vm1438_vm0, %v2752_v34  ;;  %v4452_v34 = vld [vmem:[%s5861_s6 + $0xd0] sm:$0xf0]  ;;  %v4692_v31 = vld [vmem:[%s5861_s6 + $0x2c] sm:$0xf0] }
 0xe69   : > { %3190 = vmatpush.bf16.msrb.mxu1 %v4467_v22  ;;  %v4388_v22 = vld [vmem:[%s5861_s6 + $0x50] sm:$0xf0] }
 0xe6d   : > { %v2750_v35 = vpop.f32.mrf.mxu2  ;;  %3191 = vmatpush.bf16.msrb.mxu1 %v4451_v33  ;;  %v4372_v33 = vld [vmem:[%s5861_s6 + $0x30] sm:$0xf0] }
 0xe6e   : > { %v4458_v35 = vld [vmem:[%s5861_s6 + $0xc8] sm:$0xf] }
 0xea3   : > { %v2839_v36 = vpop.xlane.xlu2 %2838 }
 0xea4   : > { %v2841_v37 = vsub.f32 %v2830_v27, %v2839_v36  ;;  %v4717_v27 = vld [vmem:[%s5861_s6 + $0xf4] sm:$0xf0] }
 0xea5   : > { %v4475_v56 = vor.u32 %v4717_v27, %v4474_v24  ;;  %v4713_v36 = vld [vmem:[%s5861_s6 + $0xd4] sm:$0xf0]  ;;  %v4391_v27 = vor.u32 %v4694_v20, %v4388_v22 }
 0xea6   : > { %v2844_v39 = vmul.f32 1.442695, %v2841_v37  ;;  %v4455_v37 = vor.u32 %v4710_v32, %v4452_v34  ;;  %v4697_v24 = vld [vmem:[%s5861_s6 + $0x54] sm:$0xf0]  ;;  %v4378_v34 = vld [vmem:[%s5861_s6 + $0x28] sm:$0xf] }
 0xea8   : > { %4948 = vpow2.f32 %v2844_v39  ;;  %v4459_v39 = vor.u32 %v4713_v36, %v4458_v35  ;;  %v4693_v35 = vld [vmem:[%s5861_s6 + $0x34] sm:$0xf0] }
 0xeab   : > { %v2848_v41 = vpop.xlane.xlu2 %2847 }
 0xeac   : > { %4950 = vrcp.f32 %v2848_v41  ;;  %v4711_v41 = vld [vmem:[%s5861_s6 + $0xcc] sm:$0xf] }
 0xeae   : > { %v4949_v43 = vpop.eup %4948 }
 0xeaf   : > { %v2849_v44 = vsel %vm2393_vm10, %v4949_v43, 0.0 }
 0xeb0   : > { %2850 = vadd.xlane.f32.xlu1 %v2849_v44 }
 0xeb2   : > { %v4951_v45 = vpop.eup %4950 }
 0xeb3   : > { %v2854_v63 = vmul.f32 %v4951_v45, %v4947_v5  ;;  %v2859_v25 = vpop.permute.xlu2 %2858  ;;  %v4715_v5 = vld [vmem:[%s5861_s6 + $0xec] sm:$0xf]  ;;  %v4434_v45 = vld [vmem:[%s5861_s6 + $0xa0] sm:$0xf] }
 0xeb4   : > { %2871 = vmatpush.bf16.msrb.mxu2 %v2859_v25  ;;  %v4479_v9 = vor.u32 %v4715_v5, %v4476_v28  ;;  %v4706_v25 = vld [vmem:[%s5861_s6 + $0xa4] sm:$0xf]  ;;  %v4396_v5 = vld [vmem:[%s5861_s6 + $0x58] sm:$0xf0] }
 0xeb5   : > { %v2856_v48 = vpack.c.bf16 %v2854_v63, %v2854_v63  ;;  %v4708_v63 = vld [vmem:[%s5861_s6 + $0xac] sm:$0xf0] }
 0xeb6   : > { %3232 = vmatpush.bf16.msrb.mxu0 %v4479_v9  ;;  %v4370_v9 = vld [vmem:[%s5861_s6 + $0x20] sm:$0xf] }
 0xeb7   : > { %4341 = vmatmul.msk.bf16.vlgmr.msrb.gmra.mxu2 %vm2393_vm10, %v2856_v48  ;;  %v4435_v48 = vor.u32 %v4708_v63, %v4434_v45  ;;  %v4371_v32 = vor.u32 %v4692_v31, %v4370_v9  ;;  %v4880_v31 = vld [vmem:[%s5844_s8 + $0x1] ss:$0 sm:$0xff] }
 0xeb8   : > { %3204 = vmatpush.bf16.msra.mxu2 %v4471_v10  ;;  %v4395_v10 = vor.u32 %v4697_v24, %v4394_v23 }
 0xeb9   : > { %3192 = vmatpush.bf16.msrb.mxu1 %v4435_v48  ;;  %v4686_v48 = vld [vmem:[%s5861_s6 + $0x4] sm:$0xf] }
 0xebc   : > { %3205 = vmatpush.bf16.msra.mxu2 %v4455_v37  ;;  %v4375_v37 = vor.u32 %v4690_v18, %v4372_v33 }
 0xec9   : > { %2877 = vrot.lane.b32.xlu1 %v6187_v62, %s5492_s1 }
 0xeeb   : > { %v2781_v51 = vpop.f32.mrf.mxu3 }
 0xeec   : > { %v2786_v52 = vadd.f32 %v2781_v51, %v2640_v12  ;;  %v4436_v12 = vld [vmem:[%s5861_s6 + $0xb0] sm:$0xf0]  ;;  %v4442_v51 = vld [vmem:[%s5861_s6 + $0xa8] sm:$0xf] }
 0xeed   : > { %v4439_v40 = vor.u32 %v4706_v25, %v4436_v12  ;;  %v4688_v25 = vld [vmem:[%s5861_s6 + $0xc] sm:$0xf0]  ;;  %v4356_v12 = vld [vmem:[%s5861_s6 + $0x10] sm:$0xf0] }
 0xeef   : > { %3206 = vmatpush.bf16.msra.mxu2 %v4439_v40  ;;  %v4362_v40 = vld [vmem:[%s5861_s6 + $0x8] sm:$0xf] }
 0xef3   : > { %v2783_v62 = vpop.f32.mrf.mxu3 }
 0xef4   : > { %v2787_v53 = vadd.f32 %v2783_v62, %v2642_v50  ;;  %v4420_v62 = vld [vmem:[%s5861_s6 + $0x90] sm:$0xf0]  ;;  %v4402_v50 = vld [vmem:[%s5861_s6 + $0x60] sm:$0xf] }
 0xf23   : > { %v2851_v54 = vpop.xlane.xlu1 %2850 }
 0xf24   : > { %4952 = vrcp.f32 %v2851_v54 }
 0xf2a   : > { %v4953_v55 = vpop.eup %4952 }
 0xf2b   : > { %v2855_v59 = vmul.f32 %v4953_v55, %v4949_v43  ;;  %v4460_v43 = vld [vmem:[%s5861_s6 + $0xd8] sm:$0xf0]  ;;  %v4707_v55 = vld [vmem:[%s5861_s6 + $0xac] sm:$0xf] }
 0xf2c   : > { %v4463_v44 = vor.u32 %v4711_v41, %v4460_v43  ;;  %v4691_v41 = vld [vmem:[%s5861_s6 + $0x2c] sm:$0xf]  ;;  %v4380_v43 = vld [vmem:[%s5861_s6 + $0x38] sm:$0xf0] }
 0xf2d   : > { %v2857_v30 = vpack.c.bf16 %v2855_v59, %v2855_v59  ;;  %v4444_v59 = vld [vmem:[%s5861_s6 + $0xb8] sm:$0xf0]  ;;  %v4383_v63 = vor.u32 %v4691_v41, %v4380_v43 }
 0xf2e   : > { %3233 = vmatpush.bf16.msrb.mxu0 %v4463_v44  ;;  %v4354_v44 = vld [vmem:[%s5861_s6] sm:$0xf]  ;;  %v4729_v41 = vld [vmem:[%s5863_s28 + $0x58] sm:$0xff] }
 0xf2f   : > { %v4737_v43 = vld [vmem:[%s5863_s28 + $0x98] sm:$0xff] }
 0xf3a   : > { %v2873_v60 = vpop.f32.mrf.mxu2 }
 0xf3b   : > { %v2878_v61 = vpop.permute.xlu1 %2877 }
 0xf3c   : > { %2890 = vmatpush.bf16.msrb.mxu3 %v2878_v61  ;;  %v4418_v61 = vld [vmem:[%s5861_s6 + $0x80] sm:$0xf] }
 0xf3f   : > { %4342 = vmatmul.msk.bf16.vlgmr.msrb.gmra.mxu3 %vm2393_vm10, %v2857_v30  ;;  %v4704_v30 = vld [vmem:[%s5861_s6 + $0x8c] sm:$0xf0] }
 0xf40   : > { %3218 = vmatpush.bf16.msra.mxu3 %v4475_v56  ;;  %v4419_v26 = vor.u32 %v4704_v30, %v4418_v61  ;;  %v4695_v56 = vld [vmem:[%s5861_s6 + $0x4c] sm:$0xf]  ;;  %v4364_v61 = vld [vmem:[%s5861_s6 + $0x18] sm:$0xf0] }
 0xf41   : > { %v4399_v28 = vor.u32 %v4695_v56, %v4396_v5 }
 0xf42   : > { %v2875_v58 = vpop.f32.mrf.mxu2  ;;  %3193 = vmatpush.bf16.msrb.mxu1 %v4419_v26  ;;  %v4725_v26 = vld [vmem:[%s5863_s28 + $0x38] sm:$0xff] }
 0xf43   : > { %v4702_v58 = vld [vmem:[%s5861_s6 + $0x84] sm:$0xf] }
 0xf44   : > { %3219 = vmatpush.bf16.msra.mxu3 %v4459_v39  ;;  %v4379_v39 = vor.u32 %v4693_v35, %v4378_v34  ;;  %v4745_v34 = vld [vmem:[%s5863_s28 + $0xd8] sm:$0xff]  ;;  %v4730_v35 = vld [vmem:[%s5863_s28 + $0x60] sm:$0xff] }
 0xfc2   : > { %v2892_v49 = vpop.f32.mrf.mxu3 }
 0xfc3   : > { %v2896_v42 = vpack.c.bf16 %v2892_v49, %v2873_v60  ;;  %v4447_v60 = vor.u32 %v4707_v55, %v4444_v59  ;;  %v4426_v49 = vld [vmem:[%s5861_s6 + $0x88] sm:$0xf]  ;;  %v4687_v55 = vld [vmem:[%s5861_s6 + $0xc] sm:$0xf] }
 0xfc4   : > { %v4367_v30 = vor.u32 %v4687_v55, %v4364_v61  ;;  %v3020_v55 = vld [vmem:[%s6504_s24] sm:$0xf] }
 0xfc5   : > { %4351 = vmatmul.msk.bf16.vlgmr.msra.gmra.mxu0 %vm1438_vm0, %v2896_v42  ;;  %v4705_v42 = vld [vmem:[%s5861_s6 + $0x94] sm:$0xf0]  ;;  %v3022_v61 = vperm.slane %v3020_v55, 0 }
 0xfc6   : > { %3234 = vmatpush.bf16.msrb.mxu0 %v4447_v60 }
 0xfca   : > { %v2894_v0 = vpop.f32.mrf.mxu3 }
 0xfcb   : > { %v4423_v0 = vor.u32 %v4702_v58, %v4420_v62  ;;  %v4749_v62 = vld [vmem:[%s5863_s28 + $0xf8] sm:$0xff] }
 0xfcd   : > { %3207 = vmatpush.bf16.msra.mxu2 %v4423_v0  ;;  %v4741_v0 = vld [vmem:[%s5863_s28 + $0xb8] sm:$0xff] }
0x1042   : > { %v2925_v57 = vpop.f32.mrf.mxu0 }
0x1043   : > { %v2930_v38 = vadd.f32 %v2925_v57, %v2786_v52  ;;  %v4709_v52 = vld [vmem:[%s5861_s6 + $0xb4] sm:$0xf0]  ;;  %v4703_v57 = vld [vmem:[%s5861_s6 + $0x8c] sm:$0xf] }
0x1044   : > { %v4443_v54 = vor.u32 %v4709_v52, %v4442_v51  ;;  %v4355_v51 = vor.u32 %v4688_v25, %v4354_v44  ;;  %v4359_v52 = vor.u32 %v4686_v48, %v4356_v12  ;;  %v4719_v44 = vld [vmem:[%s5863_s28 + $0x8] sm:$0xff]  ;;  %v4736_v25 = vld [vmem:[%s5863_s28 + $0x90] sm:$0xff]  ;;  %v4718_v48 = vld [vmem:[%s5863_s28] sm:$0xff] }
0x1045   : > { %v2935_v2 = vadd.f32 %v4878_v1, %v2930_v38  ;;  %v4428_v38 = vld [vmem:[%s5861_s6 + $0x98] sm:$0xf0]  ;;  %v4742_v12 = vld [vmem:[%s5863_s28 + $0xc0] sm:$0xff] }
0x1046   : > { %3220 = vmatpush.bf16.msra.mxu3 %v4443_v54  ;;  %v4689_v54 = vld [vmem:[%s5861_s6 + $0x14] sm:$0xf0] }
0x1047   : > { %v2937_v3 = vadd.f32 %v2935_v2, %v6127_v29  ;;  %v4431_v2 = vor.u32 %v4703_v57, %v4428_v38  ;;  %v4363_v60 = vor.u32 %v4689_v54, %v4362_v40  ;;  %v4748_v57 = vld [vmem:[%s5863_s28 + $0xf0] sm:$0xff]  ;;  %v4726_v40 = vld [vmem:[%s5863_s28 + $0x40] sm:$0xff] }
0x1048   : > { %v4734_v54 = vld [vmem:[%s5863_s28 + $0x80] sm:$0xff] }
0x1049   : > { %2941 = vadd.xlane.f32.xlu0 %v2937_v3  ;;  %3235 = vmatpush.bf16.msrb.mxu0 %v4431_v2 }
0x104a   : > { %v2927_v4 = vpop.f32.mrf.mxu0 }
0x104b   : > { %v2931_v6 = vadd.f32 %v2927_v4, %v2787_v53  ;;  %v4698_v53 = vld [vmem:[%s5861_s6 + $0x64] sm:$0xf] }
0x104d   : > { %v2936_v7 = vadd.f32 %v4878_v1, %v2931_v6  ;;  %v4427_v1 = vor.u32 %v4705_v42, %v4426_v49  ;;  %v4404_v6 = vld [vmem:[%s5861_s6 + $0x70] sm:$0xf0]  ;;  %v4733_v42 = vld [vmem:[%s5863_s28 + $0x78] sm:$0xff] }
0x104f   : > { %v2938_v8 = vadd.f32 %v2936_v7, %v6129_v47  ;;  %3221 = vmatpush.bf16.msra.mxu3 %v4427_v1  ;;  %v4410_v7 = vld [vmem:[%s5861_s6 + $0x68] sm:$0xf]  ;;  %v4724_v1 = vld [vmem:[%s5863_s28 + $0x30] sm:$0xff] }
0x1051   : > { %2943 = vadd.xlane.f32.xlu2 %v2938_v8 }
0x10bc   : > { %v2942_v11 = vpop.xlane.xlu0 %2941 }
0x10bd   : > { %v2945_v13 = vmul.f32 %v2942_v11, %v6079_v46  ;;  %v4407_v11 = vor.u32 %v4698_v53, %v4404_v6  ;;  %v4723_v6 = vld [vmem:[%s5863_s28 + $0x28] sm:$0xff] }
0x10bf   : > { %v6260_v14 = vsub.f32 %v2937_v3, %v2945_v13  ;;  %v4700_v3 = vld [vmem:[%s5861_s6 + $0x6c] sm:$0xf0]  ;;  %3208 = vmatpush.bf16.msra.mxu2 %v4407_v11  ;;  %v4739_v11 = vld [vmem:[%s5863_s28 + $0xa8] sm:$0xff] }
0x10c0   : > { %v4403_v4 = vor.u32 %v4700_v3, %v4402_v50  ;;  %v4732_v50 = vld [vmem:[%s5863_s28 + $0x70] sm:$0xff] }
0x10c1   : > { %v2949_v29 = vmul.f32 %v6260_v14, %v6260_v14  ;;  %v4740_v3 = vld [vmem:[%s5863_s28 + $0xb0] sm:$0xff] }
0x10c2   : > { %3194 = vmatpush.bf16.msrb.mxu1 %v4403_v4 }
0x10c3   : > { %2951 = vadd.xlane.f32.xlu1 %v2949_v29  ;;  %v4699_v29 = vld [vmem:[%s5861_s6 + $0x6c] sm:$0xf]  ;;  %3209 = vmatpush.bf16.msra.mxu2 %v4391_v27 }
0x10c4   : > { %v2944_v15 = vpop.xlane.xlu2 %2943 }
0x10c5   : > { %v2946_v16 = vmul.f32 %v2944_v15, %v6079_v46  ;;  %v4412_v15 = vld [vmem:[%s5861_s6 + $0x78] sm:$0xf0] }
0x10c7   : > { %v6265_v17 = vsub.f32 %v2938_v8, %v2946_v16  ;;  %v4701_v8 = vld [vmem:[%s5861_s6 + $0x74] sm:$0xf0]  ;;  %v4415_v16 = vor.u32 %v4699_v29, %v4412_v15  ;;  %3210 = vmatpush.bf16.msra.mxu2 %v4375_v37  ;;  %v4722_v15 = vld [vmem:[%s5863_s28 + $0x20] sm:$0xff]  ;;  %v4720_v37 = vld [vmem:[%s5863_s28 + $0x10] sm:$0xff] }
0x10c8   : > { %v4411_v13 = vor.u32 %v4701_v8, %v4410_v7  ;;  %v4747_v7 = vld [vmem:[%s5863_s28 + $0xe8] sm:$0xff] }
0x10c9   : > { %v2950_v47 = vmul.f32 %v6265_v17, %v6265_v17  ;;  %3236 = vmatpush.bf16.msrb.mxu0 %v4415_v16  ;;  %v4731_v8 = vld [vmem:[%s5863_s28 + $0x68] sm:$0xff]  ;;  %v4746_v16 = vld [vmem:[%s5863_s28 + $0xe0] sm:$0xff] }
0x10ca   : > { %3222 = vmatpush.bf16.msra.mxu3 %v4411_v13 }
0x10cb   : > { %2953 = vadd.xlane.f32.xlu0 %v2950_v47  ;;  %v4386_v47 = vld [vmem:[%s5861_s6 + $0x40] sm:$0xf]  ;;  %3211 = vmatpush.bf16.msra.mxu2 %v4359_v52  ;;  %v4735_v52 = vld [vmem:[%s5863_s28 + $0x88] sm:$0xff] }
0x10cc   : > { %v4387_v21 = vor.u32 %v4696_v19, %v4386_v47 }
0x10cd   : > { %3237 = vmatpush.bf16.msrb.mxu0 %v4399_v28 }
0x10ce   : > { %3195 = vmatpush.bf16.msrb.mxu1 %v4387_v21  ;;  %3223 = vmatpush.bf16.msra.mxu3 %v4395_v10  ;;  %v4879_v10 = vld [vmem:[%s5838_s7 + $0x1] ss:$0 sm:$0xff] }
0x10cf   : > { %3532 = vmatpush.bf16.msrb.mxu2 %v4733_v42 }
0x10d1   : > { %3238 = vmatpush.bf16.msrb.mxu0 %v4383_v63  ;;  %v4728_v63 = vld [vmem:[%s5863_s28 + $0x50] sm:$0xff] }
0x10d2   : > { %3196 = vmatpush.bf16.msrb.mxu1 %v4371_v32  ;;  %3224 = vmatpush.bf16.msra.mxu3 %v4379_v39  ;;  %v4744_v39 = vld [vmem:[%s5863_s28 + $0xd0] sm:$0xff] }
0x10d3   : > { %3533 = vmatpush.bf16.msrb.mxu2 %v4732_v50 }
0x10d5   : > { %3239 = vmatpush.bf16.msrb.mxu0 %v4367_v30  ;;  %v3025_v30 = vperm.slane %v3020_v55, 3 }
0x10d6   : > { %3197 = vmatpush.bf16.msrb.mxu1 %v4355_v51  ;;  %3225 = vmatpush.bf16.msra.mxu3 %v4363_v60  ;;  %v4727_v51 = vld [vmem:[%s5863_s28 + $0x48] sm:$0xff] }
0x10d7   : > { %3534 = vmatpush.bf16.msrb.mxu2 %v4731_v8 }
0x10d9   : > { %3560 = vmatpush.bf16.msra.mxu0 %v4749_v62 }
0x10da   : > { %3518 = vmatpush.bf16.msra.mxu1 %v4725_v26  ;;  %3546 = vmatpush.bf16.msrb.mxu3 %v4741_v0  ;;  %v3023_v0 = vperm.slane %v3020_v55, 1 }
0x10db   : > { %3535 = vmatpush.bf16.msrb.mxu2 %v4730_v35 }
0x10dd   : > { %3561 = vmatpush.bf16.msra.mxu0 %v4748_v57 }
0x10de   : > { %3519 = vmatpush.bf16.msra.mxu1 %v4724_v1  ;;  %3547 = vmatpush.bf16.msrb.mxu3 %v4740_v3 }
0x10df   : > { %3536 = vmatpush.bf16.msrb.mxu2 %v4729_v41 }
0x10e1   : > { %3562 = vmatpush.bf16.msra.mxu0 %v4747_v7 }
0x10e2   : > { %3520 = vmatpush.bf16.msra.mxu1 %v4723_v6  ;;  %3548 = vmatpush.bf16.msrb.mxu3 %v4739_v11 }
0x10e3   : > { %3537 = vmatpush.bf16.msrb.mxu2 %v4728_v63 }
0x10e5   : > { %3563 = vmatpush.bf16.msra.mxu0 %v4746_v16 }
0x10e6   : > { %3521 = vmatpush.bf16.msra.mxu1 %v4722_v15 }
0x10e7   : > { %3538 = vmatpush.bf16.msrb.mxu2 %v4727_v51 }
0x10e9   : > { %3564 = vmatpush.bf16.msra.mxu0 %v4745_v34 }
0x10eb   : > { %3539 = vmatpush.bf16.msrb.mxu2 %v4726_v40 }
0x10ed   : > { %3565 = vmatpush.bf16.msra.mxu0 %v4744_v39 }
0x1136   : > { %v2952_v36 = vpop.xlane.xlu1 %2951 }
0x1137   : > { %v2955_v45 = vmul.f32 %v2952_v36, %v6079_v46  ;;  %v4738_v36 = vld [vmem:[%s5863_s28 + $0xa0] sm:$0xff] }
0x1138   : > { %3549 = vmatpush.bf16.msrb.mxu3 %v4738_v36 }
0x1139   : > { %v2957_v59 = vadd.f32 1e-05, %v2955_v45  ;;  %v4743_v45 = vld [vmem:[%s5863_s28 + $0xc8] sm:$0xff] }
0x113a   : > { %3566 = vmatpush.bf16.msra.mxu0 %v4743_v45 }
0x113b   : > { %4954 = vrsqrt.f32 %v2957_v59  ;;  %vm2965_vm12 = vweird.f32 %v2957_v59 }
0x113c   : > { %3550 = vmatpush.bf16.msrb.mxu3 %v4737_v43 }
0x113e   : > { %v2954_v58 = vpop.xlane.xlu0 %2953  ;;  %3567 = vmatpush.bf16.msra.mxu0 %v4742_v12 }
0x113f   : > { %v2956_v49 = vmul.f32 %v2954_v58, %v6079_v46 }
0x1140   : > { %3551 = vmatpush.bf16.msrb.mxu3 %v4736_v25 }
0x1141   : > { %v4955_v38 = vpop.eup %4954  ;;  %v2958_v2 = vadd.f32 1e-05, %v2956_v49 }
0x1142   : > { %v2960_v53 = vmul.f32 %v4955_v38, %v2957_v59  ;;  %vm2966_vm11 = vweird.f32 %v4955_v38 }
0x1143   : > { %4956 = vrsqrt.f32 %v2958_v2  ;;  %vm2967_vm13 = vmor %vm2965_vm12, %vm2966_vm11  ;;  %vm2975_vm15 = vweird.f32 %v2958_v2 }
0x1144   : > { %v2961_v4 = vmul.f32 %v4955_v38, %v2960_v53  ;;  %3552 = vmatpush.bf16.msrb.mxu3 %v4735_v52 }
0x1146   : > { %v2962_v13 = vmul.f32 0.5, %v2961_v4 }
0x1148   : > { %v2963_v29 = vsub.f32 1.5, %v2962_v13  ;;  %3553 = vmatpush.bf16.msrb.mxu3 %v4734_v54 }
0x1149   : > { %v4957_v47 = vpop.eup %4956 }
0x114a   : > { %v2964_v19 = vmul.f32 %v4955_v38, %v2963_v29  ;;  %v2970_v20 = vmul.f32 %v4957_v47, %v2958_v2  ;;  %vm2976_vm14 = vweird.f32 %v4957_v47 }
0x114b   : > { %vm2977_vm0 = vmor %vm2975_vm15, %vm2976_vm14 }
0x114c   : > { %v2971_v21 = vmul.f32 %v4957_v47, %v2970_v20  ;;  %v2968_v22 = vsel %vm2967_vm13, %v4955_v38, %v2964_v19  ;;  %v3024_v38 = vperm.slane %v3020_v55, 2 }
0x114d   : > { %v2979_v27 = vmul.f32 %v2968_v22, %v6260_v14 }
0x114e   : > { %v2972_v23 = vmul.f32 0.5, %v2971_v21 }
0x114f   : > { %v2982_v9 = vmul.f32 %v4879_v10, %v2979_v27  ;;  %v4881_v27 = vld [vmem:[%s1056_s20] ss:$0 sm:$0xff] }
0x1150   : > { %v2973_v24 = vsub.f32 1.5, %v2972_v23 }
0x1151   : > { %v6353_v32 = vadd.f32 %v4880_v31, %v2982_v9 }
0x1152   : > { %v2974_v56 = vmul.f32 %v4957_v47, %v2973_v24 }
0x1154   : > { %v2978_v5 = vsel %vm2977_vm0, %v4957_v47, %v2974_v56 }
0x1155   : > { %v2980_v28 = vmul.f32 %v2978_v5, %v6265_v17  ;;  %v4721_v17 = vld [vmem:[%s5863_s28 + $0x18] sm:$0xff] }
0x1156   : > { %3522 = vmatpush.bf16.msra.mxu1 %v4721_v17 }
0x1157   : > { %v2983_v18 = vmul.f32 %v4879_v10, %v2980_v28 }
0x1159   : > { %v6355_v33 = vadd.f32 %v4880_v31, %v2983_v18 }
0x115a   : > { %3523 = vmatpush.bf16.msra.mxu1 %v4720_v37 }
0x115b   : > { %v2987_v14 = vpack.c.bf16 %v6355_v33, %v6353_v32 }
0x115d   : > { %3198 = vmatmul.bf16.vlgmr.msrb.gmra.mxu1 %v2987_v14  ;;  %3212 = vmatmul.bf16.vlgmr.msra.gmra.mxu2 %v2987_v14 }
0x115e   : > { %3226 = vmatmul.bf16.vlgmr.msra.gmra.mxu3 %v2987_v14  ;;  %3240 = vmatmul.bf16.vlgmr.msrb.gmra.mxu0 %v2987_v14 }
0x115f   : > { %3524 = vmatpush.bf16.msra.mxu1 %v4719_v44 }
0x1163   : > { %3525 = vmatpush.bf16.msra.mxu1 %v4718_v48 }
0x11da   : > { %v3199_v59 = vpop.f32.mrf.mxu1 }
0x11db   : > { %v3241_v60 = vpop.f32.mrf.mxu0  ;;  %v3200_v26 = vadd.f32 %v3199_v59, %v3022_v61 }
0x11dc   : > { %v3242_v49 = vadd.f32 %v3241_v60, %v3025_v30 }
0x11dd   : > { %v3246_v50 = vmax.f32 %v3200_v26, 0.0 }
0x11de   : > { %v3249_v53 = vmax.f32 %v3242_v49, 0.0 }
0x11e0   : > { %v3213_v58 = vpop.f32.mrf.mxu2 }
0x11e1   : > { %v3227_v62 = vpop.f32.mrf.mxu3  ;;  %v3214_v6 = vadd.f32 %v3213_v58, %v3023_v0 }
0x11e2   : > { %v3201_v42 = vpop.f32.mrf.mxu1  ;;  %v3228_v8 = vadd.f32 %v3227_v62, %v3024_v38 }
0x11e3   : > { %v3202_v1 = vadd.f32 %v3201_v42, %v3022_v61  ;;  %v3243_v57 = vpop.f32.mrf.mxu0  ;;  %v3247_v47 = vmax.f32 %v3214_v6, 0.0 }
0x11e4   : > { %v3244_v2 = vadd.f32 %v3243_v57, %v3025_v30  ;;  %v3248_v20 = vmax.f32 %v3228_v8, 0.0 }
0x11e5   : > { %v3250_v3 = vmax.f32 %v3202_v1, 0.0  ;;  %v4882_v1 = vld [vmem:[%s5838_s7 + $0x2] ss:$0 sm:$0xff] }
0x11e6   : > { %v3253_v4 = vmax.f32 %v3244_v2, 0.0  ;;  %v4883_v2 = vld [vmem:[%s5844_s8 + $0x2] ss:$0 sm:$0xff] }
0x11e7   : > { %v3254_v7 = vpack.c.bf16 %v3250_v3, %v3246_v50 }
0x11e8   : > { %v3257_v11 = vpack.c.bf16 %v3253_v4, %v3249_v53  ;;  %v3215_v13 = vpop.f32.mrf.mxu2 }
0x11e9   : > { %v3216_v29 = vadd.f32 %v3215_v13, %v3023_v0  ;;  %v3229_v15 = vpop.f32.mrf.mxu3  ;;  %3526 = vmatmul.bf16.vlgmr.msra.gmra.mxu1 %v3254_v7 }
0x11ea   : > { %v3230_v16 = vadd.f32 %v3229_v15, %v3024_v38  ;;  %3568 = vmatmul.bf16.vlgmr.msra.gmra.mxu0 %v3257_v11 }
0x11eb   : > { %v3251_v19 = vmax.f32 %v3216_v29, 0.0 }
0x11ec   : > { %v3252_v21 = vmax.f32 %v3230_v16, 0.0 }
0x11ed   : > { %v3255_v22 = vpack.c.bf16 %v3251_v19, %v3247_v47 }
0x11ee   : > { %v3256_v23 = vpack.c.bf16 %v3252_v21, %v3248_v20 }
0x11ef   : > { %3540 = vmatmul.bf16.vlgmr.msrb.gmra.mxu2 %v3255_v22 }
0x11f0   : > { %3554 = vmatmul.bf16.vlgmr.msrb.gmra.mxu3 %v3256_v23 }
0x1266   : > { %v3527_v24 = vpop.f32.mrf.mxu1 }
0x1267   : > { %v3528_v10 = vadd.f32 %v4881_v27, %v3527_v24  ;;  %v3569_v9 = vpop.f32.mrf.mxu0 }
0x126e   : > { %v3529_v18 = vpop.f32.mrf.mxu1 }
0x126f   : > { %v3530_v17 = vadd.f32 %v4881_v27, %v3529_v18  ;;  %v3571_v41 = vpop.f32.mrf.mxu0 }
0x1272   : > { %v3541_v56 = vpop.f32.mrf.mxu2 }
0x1273   : > { %v3542_v5 = vadd.f32 %v3541_v56, %v3528_v10  ;;  %v3555_v28 = vpop.f32.mrf.mxu3 }
0x1275   : > { %v3556_v31 = vadd.f32 %v3555_v28, %v3542_v5 }
0x1277   : > { %v3570_v14 = vadd.f32 %v3569_v9, %v3556_v31 }
0x1279   : > { %v3574_v34 = vadd.f32 %v3570_v14, %v6353_v32 }
0x127a   : > { %v3543_v35 = vpop.f32.mrf.mxu2 }
0x127b   : > { %v3544_v36 = vadd.f32 %v3543_v35, %v3530_v17  ;;  %3578 = vadd.xlane.f32.xlu0 %v3574_v34  ;;  %v3557_v37 = vpop.f32.mrf.mxu3 }
0x127d   : > { %v3558_v39 = vadd.f32 %v3557_v37, %v3544_v36 }
0x127f   : > { %v3572_v43 = vadd.f32 %v3571_v41, %v3558_v39 }
0x1281   : > { %v3575_v44 = vadd.f32 %v3572_v43, %v6355_v33 }
0x1283   : > { %3580 = vadd.xlane.f32.xlu0 %v3575_v44 }
0x12ee   : > { %v3579_v45 = vpop.xlane.xlu0 %3578 }
0x12ef   : > { %v3582_v63 = vmul.f32 %v3579_v45, %v6079_v46 }
0x12f1   : > { %v3584_v25 = vsub.f32 %v3574_v34, %v3582_v63 }
0x12f3   : > { %v3586_v48 = vmul.f32 %v3584_v25, %v3584_v25 }
0x12f5   : > { %3588 = vadd.xlane.f32.xlu0 %v3586_v48 }
0x12f6   : > { %v3581_v12 = vpop.xlane.xlu0 %3580 }
0x12f7   : > { %v3583_v51 = vmul.f32 %v3581_v12, %v6079_v46 }
0x12f9   : > { %v3585_v32 = vsub.f32 %v3575_v44, %v3583_v51 }
0x12fb   : > { %v3587_v52 = vmul.f32 %v3585_v32, %v3585_v32 }
0x12fd   : > { %3590 = vadd.xlane.f32.xlu0 %v3587_v52 }
0x1368   : > { %v3589_v40 = vpop.xlane.xlu0 %3588 }
0x1369   : > { %v3592_v54 = vmul.f32 %v3589_v40, %v6079_v46 }
0x136b   : > { %v3594_v55 = vadd.f32 1e-05, %v3592_v54 }
0x136d   : > { %4958 = vrsqrt.f32 %v3594_v55  ;;  %vm3602_vm2 = vweird.f32 %v3594_v55 }
0x1370   : > { %v3591_v33 = vpop.xlane.xlu0 %3590 }
0x1371   : > { %v3593_v59 = vmul.f32 %v3591_v33, %v6079_v46 }
0x1373   : > { %v4959_v60 = vpop.eup %4958  ;;  %v3595_v61 = vadd.f32 1e-05, %v3593_v59 }
0x1374   : > { %v3597_v30 = vmul.f32 %v4959_v60, %v3594_v55  ;;  %vm3603_vm1 = vweird.f32 %v4959_v60 }
0x1375   : > { %4960 = vrsqrt.f32 %v3595_v61  ;;  %vm3604_vm3 = vmor %vm3602_vm2, %vm3603_vm1  ;;  %vm3612_vm5 = vweird.f32 %v3595_v61 }
0x1376   : > { %v3598_v58 = vmul.f32 %v4959_v60, %v3597_v30 }
0x1378   : > { %v3599_v26 = vmul.f32 0.5, %v3598_v58 }
0x137a   : > { %v3600_v62 = vsub.f32 1.5, %v3599_v26 }
0x137b   : > { %v4961_v49 = vpop.eup %4960 }
0x137c   : > { %v3601_v42 = vmul.f32 %v4959_v60, %v3600_v62  ;;  %v3607_v0 = vmul.f32 %v4961_v49, %v3595_v61  ;;  %vm3613_vm4 = vweird.f32 %v4961_v49 }
0x137d   : > { %vm3614_vm6 = vmor %vm3612_vm5, %vm3613_vm4 }
0x137e   : > { %v3605_v57 = vsel %vm3604_vm3, %v4959_v60, %v3601_v42  ;;  %v3608_v38 = vmul.f32 %v4961_v49, %v3607_v0 }
0x137f   : > { %v3616_v50 = vmul.f32 %v3605_v57, %v3584_v25 }
0x1380   : > { %v3609_v46 = vmul.f32 0.5, %v3608_v38 }
0x1381   : > { %v3619_v3 = vmul.f32 %v4882_v1, %v3616_v50 }
0x1382   : > { %v3610_v53 = vsub.f32 1.5, %v3609_v46 }
0x1383   : > { %v3622_v4 = vadd.f32 %v4883_v2, %v3619_v3 }
0x1384   : > { %v3611_v6 = vmul.f32 %v4961_v49, %v3610_v53 }
0x1386   : > { %v3615_v7 = vsel %vm3614_vm6, %v4961_v49, %v3611_v6 }
0x1387   : > { %v3617_v8 = vmul.f32 %v3615_v7, %v3585_v32  ;;  %3627 = sbr.rel (%p4608_p2) target bundleno = 5006 (0x138e), region = 168 }
0x1389   : > { %v3620_v11 = vmul.f32 %v4882_v1, %v3617_v8 }
0x138b   : > { %v3623_v13 = vadd.f32 %v4883_v2, %v3620_v11 }
0x138c   : > { %3628 = vst [vmem:[#allocation2] sm:$0xff] %v3622_v4 }
0x138d   : > { %3629 = vst [vmem:[#allocation2 + $0x8] sm:$0xff] %v3623_v13 }
0x138e PF: > { %s6506_s8 = sld [smem:[#allocation28_spill]] }
0x1394   : > { %p4609_p3 = scmp.ne.s32.totalorder %s6506_s8, 1 }
0x1396   : > { %3633 = sbr.rel (%p4609_p3) target bundleno = 5021 (0x139d), region = 172 }
0x139b   : > { %3634 = vst [vmem:[#allocation21] sm:$0xff] %v3622_v4 }
0x139c   : > { %3635 = vst [vmem:[#allocation21 + $0x8] sm:$0xff] %v3623_v13 }
0x139d PF: > { %s6507_s26 = sld [smem:[#allocation30_spill]]  ;;  %s5494_s6 = smov [#allocation21]  }
0x139e   : > { %s6508_s18 = sld [smem:[#allocation50_spill]]  ;;  %s3644_s28 = sshll.u32 %s5494_s6, 4  ;;  %s3645_s28 = int_to_ptr.vmem [resolvable:$true] %s3644_s28 }
0x139f   : > { %s5495_s20 = smov 128   ;;  %s5496_s25 = smov 8  }
0x13a3   : > { %p4805_p4 = scmp.eq.s32.totalorder %s6507_s26, 1 }
0x13a4   : > { %s3646_s15 = sshll.u32 %s6508_s18, 4  ;;  %s3647_s15 = int_to_ptr.hbm [resolvable:$true] %s3646_s15 }
0x13a5   : > { %4791 = dma.vmem_to_hbm [thread:$0]  (%p4805_p4), %s3645_s28, 256, %s3647_s15, [#allocation5], %s5495_s20, %s5495_s20, %s5496_s25  }
0x13a6   : > { %5451 = dma.done.wait (%p4805_p4), [#allocation5], 256  }
0x13a7   : > { %5453 = vsyncadd (%p4805_p4), [#allocation5], 4294967040 }
0x13a8 PF: > { %s6509_s19 = sld [smem:[#allocation29_spill]]  ;;  %s6514_s24 = smov %s5472_s2 }
0x13a9   : > { %s6510_s1 = sld [smem:[#allocation26_spill]] }
0x13aa   : > { %s6511_s22 = sld [smem:[#allocation27_spill]] }
0x13ab   : > { %s6512_s23 = sld [smem:[#allocation33_spill]] }
0x13ac   : > { %s6513_s30 = sld [smem:[#allocation31_spill]] }
0x13ae   : > { %s33_s25 = sadd.s32 1, %s6509_s19  }
0x13af   : > { %p30_p5 = scmp.ge.s32.totalorder %s33_s25, 4  }
0x13b1   :  { %32 = sbr.rel (!%p30_p5) target bundleno = 22 (0x16), region = 302 }
0x13b2   : > { %s6515_s2 = smov %s6513_s30 }
0x13b6   :  { %3663 = vsyncpa [#allocation4], 1 }
0x13b7   :  { %3665 = vsyncpa [#allocation4 + $0x1], 1 }
0x13b8   :  { %3666 = vsyncpa [#allocation7], 1 }
0x13b9   :  { %3667 = vsyncpa [#allocation5], 1 }
0x13ba   :  { %3669 = vsyncpa [#allocation5 + $0x1], 1 }

</bundles_post_ra>
